<compile_context>
chip_gen: v7x
topology: tpu7x:2x2x1
jax: 0.10.0
libtpu: 0.0.40
codegen_flags: <defaults>
</compile_context>

<pallas_src>
import functools

import numpy as np
import jax
import jax.numpy as jnp
from jax.experimental import pallas as pl
from jax.experimental.pallas import tpu as pltpu

MXU_DTYPE = jnp.bfloat16   # MXU operand dtype (f32 accumulate) on v5e/v6e/v7x.


# ------------------------------ in-kernel helpers -----------------------------

def _cbam_rows(y, pool, expand, w1t, b1, w2t, b2, sgm, sga, sgb):
    """CBAM on a (B_tile*HW, C) slab of rows (row = b_local*HW + p).

    Per-sample structure (mean pool over HW, channel-weight broadcast, padded
    7x7 spatial conv incl. edge masks) is expressed through small precomputed
    dense matrices, so everything maps to MXU dots + lane reductions -- no
    reshapes, no per-tap slice loops.  Note: the torch module's channel gate
    uses average pooling only (no max branch).
    """
    # ---- channel gate: avg-pool -> 1x1 conv -> ReLU -> 1x1 conv -> sigmoid
    pooled = y if pool is None else jnp.dot(pool, y, preferred_element_type=jnp.float32)
    h = jnp.maximum(jnp.dot(pooled, w1t, preferred_element_type=jnp.float32) + b1, 0.0)
    cw = jax.nn.sigmoid(jnp.dot(h, w2t, preferred_element_type=jnp.float32) + b2)
    if expand is not None:                       # broadcast (B, C) -> (B*HW, C)
        cw = jnp.dot(expand, cw, preferred_element_type=jnp.float32)
    xc = y * cw

    # ---- spatial gate: 7x7 conv (pad 3) over [channel-max, channel-mean]
    maxp = jnp.max(xc, axis=1, keepdims=True)    # (B*HW, 1)
    avgp = jnp.mean(xc, axis=1, keepdims=True)   # (B*HW, 1)
    if pool is None:     # HW == 1: the padded 7x7 conv reduces to its centre tap
        s = maxp * sgm + avgp * sga + sgb
    else:                # block-diagonal (B*HW, B*HW) operator -> one MXU dot per map
        s = (jnp.dot(sgm, maxp, preferred_element_type=jnp.float32)
             + jnp.dot(sga, avgp, preferred_element_type=jnp.float32) + sgb)
    return xc * jax.nn.sigmoid(s)


# -------------------------------- kernel bodies --------------------------------

def _conv1_cbam_kernel(cols_ref, w_ref, b_ref, pool_ref, exp_ref, w1t_ref, b1_ref,
                       w2t_ref, b2_ref, sgm_ref, sga_ref, sgb_ref, out_ref):
    # conv1 as a single batch-folded (B*HW, K)@(K, C) MXU dot, fused bias + ReLU.
    y = jnp.maximum(
        jnp.dot(cols_ref[...], w_ref[...], preferred_element_type=jnp.float32)
        + b_ref[...], 0.0)
    out_ref[...] = _cbam_rows(y, pool_ref[...], exp_ref[...], w1t_ref[...], b1_ref[...],
                              w2t_ref[...], b2_ref[...], sgm_ref[...], sga_ref[...],
                              sgb_ref[...])


def _block23_fc_kernel(cols_ref, w2_ref, b2_ref,
                       pool2_ref, exp2_ref, c2w1t_ref, c2b1_ref, c2w2t_ref, c2b2_ref,
                       sgm2_ref, sga2_ref, sgb2_ref,
                       sel3_ref, w3_ref, b3_ref,
                       c3w1t_ref, c3b1_ref, c3w2t_ref, c3b2_ref,
                       sgm3_ref, sga3_ref, sgb3_ref,
                       fc1w_ref, fc1b_ref, fc2w_ref, fc2b_ref,
                       out_ref, *, B, HW2):
    # conv2 (4x4 /2) + ReLU + CBAM(64), batch-folded rows (B*HW2, .)
    y2 = jnp.maximum(
        jnp.dot(cols_ref[0], w2_ref[...], preferred_element_type=jnp.float32)
        + b2_ref[...], 0.0)
    x2 = _cbam_rows(y2, pool2_ref[...], exp2_ref[...], c2w1t_ref[...], c2b1_ref[...],
                    c2w2t_ref[...], c2b2_ref[...], sgm2_ref[...], sga2_ref[...],
                    sgb2_ref[...])

    # conv3 (3x3 /1): its receptive field is block2's whole 3x3 map, so its im2col
    # is just a flatten of x2 -- consumed straight from vregs.  To avoid an
    # unaligned sublane->lane reshape, the (B, 9*64)@(9*64, 64) contraction runs
    # as HW2 accumulated dots, each picking one spatial tap via a 0/1 matrix.
    C2 = y2.shape[1]
    y3 = b3_ref[...]
    for p in range(HW2):
        xp = jnp.dot(sel3_ref[pl.ds(p * B, B), :], x2,
                     preferred_element_type=jnp.float32)             # (B, C2)
        y3 = y3 + jnp.dot(xp.astype(MXU_DTYPE), w3_ref[pl.ds(p * C2, C2), :],
                          preferred_element_type=jnp.float32)
    x3 = jnp.maximum(y3, 0.0)                                        # (B, 64)
    x3 = _cbam_rows(x3, None, None, c3w1t_ref[...], c3b1_ref[...], c3w2t_ref[...],
                    c3b2_ref[...], sgm3_ref[...], sga3_ref[...], sgb3_ref[...])

    # Flatten (H=W=1, already flat) + fc1 + ReLU + (Dropout=identity) + fc2
    h1 = jnp.maximum(
        jnp.dot(x3.astype(MXU_DTYPE), fc1w_ref[...], preferred_element_type=jnp.float32)
        + fc1b_ref[...], 0.0)
    # TODO(synk): torch.nn.Dropout(0.5) is identity at inference; no training path.
    out_ref[0] = (jnp.dot(h1.astype(MXU_DTYPE), fc2w_ref[...],
                          preferred_element_type=jnp.float32) + fc2b_ref[...])


# ------------------------------- kernel wrappers --------------------------------

def _const_spec(a):
    nd = a.ndim
    return pl.BlockSpec(a.shape, lambda n, _nd=nd: (0,) * _nd)


def conv1_cbam(cols, bp, *, B, HW):
    """Kernel 1: conv1 + ReLU + CBAM over a batch-folded (B*HW, K) slab per step."""
    rows, K = cols.shape
    C = bp["conv_w"].shape[1]
    nt = rows // (B * HW)
    cb = bp["cbam"]
    args = [cols, bp["conv_w"], bp["conv_b"],
            cb["pool"], cb["expand"], cb["w1t"], cb["b1"], cb["w2t"], cb["b2"],
            cb["sgm"], cb["sga"], cb["sgb"]]
    in_specs = ([pl.BlockSpec((B * HW, K), lambda n: (n, 0))]
                + [_const_spec(a) for a in args[1:]])
    return pl.pallas_call(
        _conv1_cbam_kernel,
        out_shape=jax.ShapeDtypeStruct((rows, C), jnp.float32),
        grid=(nt,),
        in_specs=in_specs,
        out_specs=pl.BlockSpec((B * HW, C), lambda n: (n, 0)),
        compiler_params=pltpu.CompilerParams(
            dimension_semantics=("parallel",)),       # batch tiles -> both TCs on v7x
    )(*args)


def block23_fc_head(cols, kp, *, B, HW2):
    """Kernel 2: conv2+CBAM + conv3+CBAM + Flatten + fc1 + ReLU + fc2 (fused)."""
    nt, rows, K = cols.shape
    assert rows == B * HW2, (rows, B, HW2)
    b2 = kp["block2"]
    b3 = kp["block3"]
    cb2, cb3 = b2["cbam"], b3["cbam"]
    # conv3's im2col width must equal block2's flattened activation (pure flatten).
    assert b3["conv_w"].shape[0] == HW2 * b2["conv_w"].shape[1]
    A = kp["fc2_w"].shape[1]
    args = [cols, b2["conv_w"], b2["conv_b"],
            cb2["pool"], cb2["expand"], cb2["w1t"], cb2["b1"], cb2["w2t"], cb2["b2"],
            cb2["sgm"], cb2["sga"], cb2["sgb"],
            kp["sel3"], b3["conv_w"], b3["conv_b"],
            cb3["w1t"], cb3["b1"], cb3["w2t"], cb3["b2"],
            cb3["sgm"], cb3["sga"], cb3["sgb"],
            kp["fc1_w"], kp["fc1_b"], kp["fc2_w"], kp["fc2_b"]]
    in_specs = ([pl.BlockSpec((1, rows, K), lambda n: (n, 0, 0))]
                + [_const_spec(a) for a in args[1:]])
    return pl.pallas_call(
        functools.partial(_block23_fc_kernel, B=B, HW2=HW2),
        out_shape=jax.ShapeDtypeStruct((nt, B, A), jnp.float32),
        grid=(nt,),
        in_specs=in_specs,
        out_specs=pl.BlockSpec((1, B, A), lambda n: (n, 0, 0)),
        compiler_params=pltpu.CompilerParams(
            dimension_semantics=("parallel",)),
    )(*args)


# ---------------------------------- JAX glue ------------------------------------

def im2col(x_nhwc, k, stride):
    """Extract (kh, kw, c)-ordered patches -> (N, OH*OW, k*k*C)."""
    N, H, W, C = x_nhwc.shape
    OH = (H - k) // stride + 1
    OW = (W - k) // stride + 1
    cols = []
    for i in range(k):
        for j in range(k):
            cols.append(x_nhwc[:, i:i + stride * OH:stride,
                               j:j + stride * OW:stride, :])
    cols = jnp.stack(cols, axis=3)                       # (N, OH, OW, k*k, C)
    return cols.reshape(N, OH * OW, k * k * C), OH, OW


def agentnn_forward(x_nchw, kp, *, batch_tile):
    """Inference forward pass.  x: (N, C, H, W) float32 (torch layout)."""
    N = x_nchw.shape[0]
    assert N % batch_tile == 0, (N, batch_tile)
    x = jnp.transpose(x_nchw, (0, 2, 3, 1)).astype(jnp.float32)      # NCHW -> NHWC

    # kernel 1: conv1 (8x8 /4) + ReLU + CBAM(32)   (batch folded into the M axis)
    cols, OH, OW = im2col(x, 8, 4)
    cols = cols.reshape(N * OH * OW, -1).astype(MXU_DTYPE)
    a1 = conv1_cbam(cols, kp["block1"], B=batch_tile, HW=OH * OW)     # (N*HW, 32)
    x = a1.reshape(N, OH, OW, -1)

    # kernel 2: conv2+CBAM + conv3+CBAM + Flatten + fc1 + ReLU + (Dropout) + fc2
    cols, OH2, OW2 = im2col(x, 4, 2)
    nt = N // batch_tile
    cols = cols.reshape(nt, batch_tile * OH2 * OW2, -1).astype(MXU_DTYPE)
    out = block23_fc_head(cols, kp, B=batch_tile, HW2=OH2 * OW2)      # (nt, B, A)
    return out.reshape(N, -1)


# --------------------------------- parameters ------------------------------------

def _cdim(h, k, s):
    return (h - k) // s + 1


def init_params(key, in_ch, H, W, n_actions):
    """Torch-layout parameters (same shapes as the nn.Module)."""
    keys = iter(jax.random.split(key, 64))

    def w(shape, scale=0.05):
        return scale * jax.random.normal(next(keys), shape, dtype=jnp.float32)

    def cbam_p(C, r=16):
        Cr = max(C // r, 1)
        return {
            "cg1_w": w((Cr, C, 1, 1)), "cg1_b": w((Cr,)),
            "cg2_w": w((C, Cr, 1, 1)), "cg2_b": w((C,)),
            "sg_w": w((1, 2, 7, 7)),   "sg_b": w((1,)),
        }

    oh = _cdim(_cdim(_cdim(H, 8, 4), 4, 2), 3, 1)
    ow = _cdim(_cdim(_cdim(W, 8, 4), 4, 2), 3, 1)
    conv_out = 64 * oh * ow

    return {
        "c1_w": w((32, in_ch, 8, 8)), "c1_b": w((32,)),
        "cbam1": cbam_p(32),
        "c2_w": w((64, 32, 4, 4)), "c2_b": w((64,)),
        "cbam2": cbam_p(64),
        "c3_w": w((64, 64, 3, 3)), "c3_b": w((64,)),
        "cbam3": cbam_p(64),
        "fc1_w": w((512, conv_out)), "fc1_b": w((512,)),
        "fc2_w": w((n_actions, 512)), "fc2_b": w((n_actions,)),
    }


def _cbam_prep(c, Hc, Wc, C, B):
    """Precompute CBAM operators for a (B, Hc*Wc) batch tile.

    - w1t/b1/w2t/b2: channel-gate 1x1-conv MLP as (C, Cr) / (Cr, C) matrices.
    - pool/expand:   per-sample mean pool over HW and channel-weight broadcast as
                     constant 0/1 matrices (avoids non-8-aligned in-kernel reshapes).
    - sgm/sga:       padded 7x7 spatial-gate conv as a dense (HW, HW) operator per
                     input map (max / avg channels), replicated block-diagonally
                     over the batch tile -> a single MXU dot in-kernel.
    """
    Cr = c["cg1_w"].shape[0]
    HW = Hc * Wc
    sg = np.asarray(c["sg_w"], np.float32).reshape(2, 7, 7)
    m_max = np.zeros((HW, HW), np.float32)
    m_avg = np.zeros((HW, HW), np.float32)
    for q in range(HW):
        qy, qx = divmod(q, Wc)
        for ky in range(7):
            for kx in range(7):
                iy, ix = qy + ky - 3, qx + kx - 3
                if 0 <= iy < Hc and 0 <= ix < Wc:
                    r = iy * Wc + ix
                    m_max[q, r] += sg[0, ky, kx]
                    m_avg[q, r] += sg[1, ky, kx]
    out = {
        "w1t": jnp.asarray(np.asarray(c["cg1_w"], np.float32).reshape(Cr, C).T),
        "b1": jnp.asarray(np.asarray(c["cg1_b"], np.float32).reshape(1, Cr)),
        "w2t": jnp.asarray(np.asarray(c["cg2_w"], np.float32).reshape(C, Cr).T),
        "b2": jnp.asarray(np.asarray(c["cg2_b"], np.float32).reshape(1, C)),
        "sgb": jnp.asarray(np.asarray(c["sg_b"], np.float32).reshape(1, 1)),
    }
    if HW > 1:
        eye = np.eye(B, dtype=np.float32)
        out["pool"] = jnp.asarray(np.kron(eye, np.full((1, HW), 1.0 / HW, np.float32)))
        out["expand"] = jnp.asarray(np.kron(eye, np.ones((HW, 1), np.float32)))
        out["sgm"] = jnp.asarray(np.kron(eye, m_max))
        out["sga"] = jnp.asarray(np.kron(eye, m_avg))
    else:                       # 1x1 map: centre tap only, applied elementwise
        out["sgm"] = jnp.asarray(m_max)         # (1, 1)
        out["sga"] = jnp.asarray(m_avg)         # (1, 1)
    return out


def prepare_params(p, in_shape, batch_tile):
    """One-time conversion to kernel layout (done once, outside the forward)."""
    _, H, W = in_shape
    H1, W1 = _cdim(H, 8, 4), _cdim(W, 8, 4)
    H2, W2 = _cdim(H1, 4, 2), _cdim(W1, 4, 2)
    H3, W3 = _cdim(H2, 3, 1), _cdim(W2, 3, 1)
    # The fused block2+block3 kernel relies on conv3's 3x3 window covering block2's
    # entire output map (so conv3's im2col is a pure flatten of its activation).
    assert (H2, W2) == (3, 3) and (H3, W3) == (1, 1), (H2, W2, H3, W3)
    B = batch_tile

    def conv_mat(w):                      # (O, I, kh, kw) -> (kh*kw*I, O) bf16
        O, I, kh, kw = w.shape
        return jnp.transpose(w, (2, 3, 1, 0)).reshape(kh * kw * I, O).astype(MXU_DTYPE)

    def block(conv_w, conv_b, cbam, Hc, Wc):
        return {"conv_w": conv_mat(conv_w),
                "conv_b": conv_b.reshape(1, -1).astype(jnp.float32),
                "cbam": _cbam_prep(cbam, Hc, Wc, conv_w.shape[0], B)}

    # 0/1 selection matrices regrouping block2's (B*9, 64) rows into per-spatial-tap
    # (B, 64) slabs for the fused conv3 contraction.
    HW2 = H2 * W2
    sel3 = np.zeros((HW2 * B, B * HW2), np.float32)
    for pos in range(HW2):
        for b in range(B):
            sel3[pos * B + b, b * HW2 + pos] = 1.0

    C3 = p["c3_w"].shape[0]
    D = p["fc1_w"].shape[0]
    # torch Flatten order is (C, H, W); the kernel flattens (H, W, C) (trivial here
    # since H3 = W3 = 1) -- permute fc1's input columns once.
    fc1_w = (p["fc1_w"].reshape(D, C3, H3, W3).transpose(0, 2, 3, 1)
             .reshape(D, H3 * W3 * C3).T.astype(MXU_DTYPE))

    return {
        "block1": block(p["c1_w"], p["c1_b"], p["cbam1"], H1, W1),
        "block2": block(p["c2_w"], p["c2_b"], p["cbam2"], H2, W2),
        "block3": block(p["c3_w"], p["c3_b"], p["cbam3"], H3, W3),
        "sel3": jnp.asarray(sel3),
        "fc1_w": fc1_w,
        "fc1_b": p["fc1_b"].reshape(1, -1).astype(jnp.float32),
        "fc2_w": p["fc2_w"].T.astype(MXU_DTYPE),
        "fc2_b": p["fc2_b"].reshape(1, -1).astype(jnp.float32),
    }


# --------------------------- plain-JAX reference (f32) ---------------------------

def _torch_conv2d_nhwc(x, w, b, stride, padding="VALID"):
    out = jax.lax.conv_general_dilated(
        x, jnp.transpose(w, (2, 3, 1, 0)), window_strides=(stride, stride),
        padding=padding, dimension_numbers=("NHWC", "HWIO", "NHWC"))
    return out + b.reshape(1, 1, 1, -1)


def _cbam_ref(x, c):
    Cr = c["cg1_w"].shape[0]
    C = x.shape[-1]
    pooled = jnp.mean(x, axis=(1, 2))                                  # (N, C)
    h = jnp.maximum(pooled @ c["cg1_w"].reshape(Cr, C).T + c["cg1_b"], 0.0)
    cw = jax.nn.sigmoid(h @ c["cg2_w"].reshape(C, Cr).T + c["cg2_b"])
    x = x * cw[:, None, None, :]
    mp = jnp.max(x, axis=-1, keepdims=True)
    ap = jnp.mean(x, axis=-1, keepdims=True)
    sp = jnp.concatenate([mp, ap], axis=-1)                            # (N, H, W, 2)
    sw = _torch_conv2d_nhwc(sp, c["sg_w"], c["sg_b"], 1, padding=((3, 3), (3, 3)))
    return x * jax.nn.sigmoid(sw)


def agentnn_reference(x_nchw, p):
    x = jnp.transpose(x_nchw, (0, 2, 3, 1))
    x = jnp.maximum(_torch_conv2d_nhwc(x, p["c1_w"], p["c1_b"], 4), 0.0)
    x = _cbam_ref(x, p["cbam1"])
    x = jnp.maximum(_torch_conv2d_nhwc(x, p["c2_w"], p["c2_b"], 2), 0.0)
    x = _cbam_ref(x, p["cbam2"])
    x = jnp.maximum(_torch_conv2d_nhwc(x, p["c3_w"], p["c3_b"], 1), 0.0)
    x = _cbam_ref(x, p["cbam3"])
    x = jnp.transpose(x, (0, 3, 1, 2)).reshape(x.shape[0], -1)         # torch Flatten
    h = jnp.maximum(x @ p["fc1_w"].T + p["fc1_b"], 0.0)
    return h @ p["fc2_w"].T + p["fc2_b"]


# ------------------------------------ main ----------------------------------------

if __name__ == "__main__":
    BATCH, IN_CH, H, W = 8, 4, 36, 36       # 36 -> 8 -> 3 -> 1 spatial; conv_out = 64
    N_ACTIONS = 6
    B_TILE = 4                              # 2 grid steps (both v7x TCs busy);
                                            # B_TILE*64 = 256 conv1 MXU rows.

    key = jax.random.PRNGKey(0)
    kx, kparams = jax.random.split(key)
    x = jax.random.normal(kx, (BATCH, IN_CH, H, W), dtype=jnp.float32)  # NCHW (torch)
    params = init_params(kparams, IN_CH, H, W, N_ACTIONS)
    kp = prepare_params(params, (IN_CH, H, W), batch_tile=B_TILE)

    fwd = jax.jit(functools.partial(agentnn_forward, batch_tile=B_TILE))
    out = jax.block_until_ready(fwd(x, kp))
    assert out.shape == (BATCH, N_ACTIONS), out.shape
    assert bool(jnp.all(jnp.isfinite(out)))

    # Cross-check against a plain-JAX f32 reimplementation of the torch module
    # (bf16 MXU operands -> loose tolerance).
    ref = jax.block_until_ready(jax.jit(agentnn_reference)(x, params))
    assert bool(jnp.allclose(out, ref, atol=5e-2, rtol=5e-2)), (
        float(jnp.max(jnp.abs(out - ref))))
    print("KERNEL_OK")
</pallas_src>

<mosaic_0001>
module attributes {stable_mosaic.version = 11 : i64} {
  func.func @_conv1_cbam_kernel(%arg0: i32, %arg1: memref<256x256xbf16, #tpu.memory_space<vmem>>, %arg2: memref<256x32xbf16, #tpu.memory_space<vmem>>, %arg3: memref<1x32xf32, #tpu.memory_space<vmem>>, %arg4: memref<4x256xf32, #tpu.memory_space<vmem>>, %arg5: memref<256x4xf32, #tpu.memory_space<vmem>>, %arg6: memref<32x2xf32, #tpu.memory_space<vmem>>, %arg7: memref<1x2xf32, #tpu.memory_space<vmem>>, %arg8: memref<2x32xf32, #tpu.memory_space<vmem>>, %arg9: memref<1x32xf32, #tpu.memory_space<vmem>>, %arg10: memref<256x256xf32, #tpu.memory_space<vmem>>, %arg11: memref<256x256xf32, #tpu.memory_space<vmem>>, %arg12: memref<1x1xf32, #tpu.memory_space<vmem>>, %arg13: memref<256x32xf32, #tpu.memory_space<vmem>>) attributes {dimension_semantics = [#tpu.dimension_semantics<parallel>], iteration_bounds = array<i64: 2>, scalar_prefetch = 0 : i64, scratch_operands = 0 : i64, tpu.core_type = #tpu.core_type<tc>, window_params = [{transform_indices = @transform_0, window_bounds = array<i64: 256, 256>}, {pipeline_mode = #tpu.pipeline_mode<synchronous>, transform_indices = @transform_1, window_bounds = array<i64: 256, 32>}, {pipeline_mode = #tpu.pipeline_mode<synchronous>, transform_indices = @transform_2, window_bounds = array<i64: 1, 32>}, {pipeline_mode = #tpu.pipeline_mode<synchronous>, transform_indices = @transform_3, window_bounds = array<i64: 4, 256>}, {pipeline_mode = #tpu.pipeline_mode<synchronous>, transform_indices = @transform_4, window_bounds = array<i64: 256, 4>}, {pipeline_mode = #tpu.pipeline_mode<synchronous>, transform_indices = @transform_5, window_bounds = array<i64: 32, 2>}, {pipeline_mode = #tpu.pipeline_mode<synchronous>, transform_indices = @transform_6, window_bounds = array<i64: 1, 2>}, {pipeline_mode = #tpu.pipeline_mode<synchronous>, transform_indices = @transform_7, window_bounds = array<i64: 2, 32>}, {pipeline_mode = #tpu.pipeline_mode<synchronous>, transform_indices = @transform_8, window_bounds = array<i64: 1, 32>}, {pipeline_mode = #tpu.pipeline_mode<synchronous>, transform_indices = @transform_9, window_bounds = array<i64: 256, 256>}, {pipeline_mode = #tpu.pipeline_mode<synchronous>, transform_indices = @transform_10, window_bounds = array<i64: 256, 256>}, {pipeline_mode = #tpu.pipeline_mode<synchronous>, transform_indices = @transform_11, window_bounds = array<i64: 1, 1>}, {transform_indices = @transform_12, window_bounds = array<i64: 256, 32>}]} {
    %c0 = arith.constant 0 : index
    %c0_0 = arith.constant 0 : index
    %0 = vector.load %arg1[%c0, %c0_0] : memref<256x256xbf16, #tpu.memory_space<vmem>>, vector<256x256xbf16>
    %c0_1 = arith.constant 0 : index
    %c0_2 = arith.constant 0 : index
    %1 = vector.load %arg2[%c0_1, %c0_2] : memref<256x32xbf16, #tpu.memory_space<vmem>>, vector<256x32xbf16>
    %cst = arith.constant dense<0.000000e+00> : vector<256x32xf32>
    %2 = tpu.matmul %0, %1, %cst {dimension_numbers = #tpu.dot_dimension_numbers<[1], [0], [0], [1], [0, 0, 1, 1], [], []>} : vector<256x256xbf16>, vector<256x32xbf16>, vector<256x32xf32> -> vector<256x32xf32>
    %c0_3 = arith.constant 0 : index
    %c0_4 = arith.constant 0 : index
    %3 = vector.load %arg3[%c0_3, %c0_4] : memref<1x32xf32, #tpu.memory_space<vmem>>, vector<1x32xf32>
    %4 = vector.broadcast %3 : vector<1x32xf32> to vector<256x32xf32>
    %5 = arith.addf %2, %4 : vector<256x32xf32>
    %cst_5 = arith.constant 0.000000e+00 : f32
    %6 = vector.broadcast %cst_5 : f32 to vector<256x32xf32>
    %7 = arith.maximumf %5, %6 : vector<256x32xf32>
    %c0_6 = arith.constant 0 : index
    %c0_7 = arith.constant 0 : index
    %8 = vector.load %arg4[%c0_6, %c0_7] : memref<4x256xf32, #tpu.memory_space<vmem>>, vector<4x256xf32>
    %c0_8 = arith.constant 0 : index
    %c0_9 = arith.constant 0 : index
    %9 = vector.load %arg5[%c0_8, %c0_9] : memref<256x4xf32, #tpu.memory_space<vmem>>, vector<256x4xf32>
    %c0_10 = arith.constant 0 : index
    %c0_11 = arith.constant 0 : index
    %10 = vector.load %arg6[%c0_10, %c0_11] : memref<32x2xf32, #tpu.memory_space<vmem>>, vector<32x2xf32>
    %c0_12 = arith.constant 0 : index
    %c0_13 = arith.constant 0 : index
    %11 = vector.load %arg7[%c0_12, %c0_13] : memref<1x2xf32, #tpu.memory_space<vmem>>, vector<1x2xf32>
    %c0_14 = arith.constant 0 : index
    %c0_15 = arith.constant 0 : index
    %12 = vector.load %arg8[%c0_14, %c0_15] : memref<2x32xf32, #tpu.memory_space<vmem>>, vector<2x32xf32>
    %c0_16 = arith.constant 0 : index
    %c0_17 = arith.constant 0 : index
    %13 = vector.load %arg9[%c0_16, %c0_17] : memref<1x32xf32, #tpu.memory_space<vmem>>, vector<1x32xf32>
    %c0_18 = arith.constant 0 : index
    %c0_19 = arith.constant 0 : index
    %14 = vector.load %arg10[%c0_18, %c0_19] : memref<256x256xf32, #tpu.memory_space<vmem>>, vector<256x256xf32>
    %c0_20 = arith.constant 0 : index
    %c0_21 = arith.constant 0 : index
    %15 = vector.load %arg11[%c0_20, %c0_21] : memref<256x256xf32, #tpu.memory_space<vmem>>, vector<256x256xf32>
    %c0_22 = arith.constant 0 : index
    %c0_23 = arith.constant 0 : index
    %16 = vector.load %arg12[%c0_22, %c0_23] : memref<1x1xf32, #tpu.memory_space<vmem>>, vector<1x1xf32>
    %cst_24 = arith.constant dense<0.000000e+00> : vector<4x32xf32>
    %17 = tpu.matmul %8, %7, %cst_24 {dimension_numbers = #tpu.dot_dimension_numbers<[1], [0], [0], [1], [0, 0, 1, 1], [], []>} : vector<4x256xf32>, vector<256x32xf32>, vector<4x32xf32> -> vector<4x32xf32>
    %cst_25 = arith.constant dense<0.000000e+00> : vector<4x2xf32>
    %18 = tpu.matmul %17, %10, %cst_25 {dimension_numbers = #tpu.dot_dimension_numbers<[1], [0], [0], [1], [0, 0, 1, 1], [], []>} : vector<4x32xf32>, vector<32x2xf32>, vector<4x2xf32> -> vector<4x2xf32>
    %19 = vector.broadcast %11 : vector<1x2xf32> to vector<4x2xf32>
    %20 = arith.addf %18, %19 : vector<4x2xf32>
    %cst_26 = arith.constant 0.000000e+00 : f32
    %21 = vector.broadcast %cst_26 : f32 to vector<4x2xf32>
    %22 = arith.maximumf %20, %21 : vector<4x2xf32>
    %cst_27 = arith.constant dense<0.000000e+00> : vector<4x32xf32>
    %23 = tpu.matmul %22, %12, %cst_27 {dimension_numbers = #tpu.dot_dimension_numbers<[1], [0], [0], [1], [0, 0, 1, 1], [], []>} : vector<4x2xf32>, vector<2x32xf32>, vector<4x32xf32> -> vector<4x32xf32>
    %24 = vector.broadcast %13 : vector<1x32xf32> to vector<4x32xf32>
    %25 = arith.addf %23, %24 : vector<4x32xf32>
    %26 = arith.negf %25 : vector<4x32xf32>
    %27 = math.exp %26 : vector<4x32xf32>
    %cst_28 = arith.constant 1.000000e+00 : f32
    %28 = vector.broadcast %cst_28 : f32 to vector<4x32xf32>
    %29 = arith.addf %28, %27 : vector<4x32xf32>
    %30 = arith.divf %28, %29 : vector<4x32xf32>
    %cst_29 = arith.constant dense<0.000000e+00> : vector<256x32xf32>
    %31 = tpu.matmul %9, %30, %cst_29 {dimension_numbers = #tpu.dot_dimension_numbers<[1], [0], [0], [1], [0, 0, 1, 1], [], []>} : vector<256x4xf32>, vector<4x32xf32>, vector<256x32xf32> -> vector<256x32xf32>
    %32 = arith.mulf %7, %31 : vector<256x32xf32>
    %cst_30 = arith.constant dense<0xFF800000> : vector<256xf32>
    %33 = vector.multi_reduction <maximumf>, %32, %cst_30 [1] : vector<256x32xf32> to vector<256xf32>
    %34 = vector.shape_cast %33 : vector<256xf32> to vector<256x1xf32>
    %cst_31 = arith.constant dense<0.000000e+00> : vector<256xf32>
    %35 = vector.multi_reduction <add>, %32, %cst_31 [1] : vector<256x32xf32> to vector<256xf32>
    %36 = vector.shape_cast %35 : vector<256xf32> to vector<256x1xf32>
    %cst_32 = arith.constant 3.200000e+01 : f32
    %37 = vector.broadcast %cst_32 : f32 to vector<256x1xf32>
    %38 = arith.divf %36, %37 : vector<256x1xf32>
    %cst_33 = arith.constant dense<0.000000e+00> : vector<256x1xf32>
    %39 = tpu.matmul %14, %34, %cst_33 {dimension_numbers = #tpu.dot_dimension_numbers<[1], [0], [0], [1], [0, 0, 1, 1], [], []>} : vector<256x256xf32>, vector<256x1xf32>, vector<256x1xf32> -> vector<256x1xf32>
    %cst_34 = arith.constant dense<0.000000e+00> : vector<256x1xf32>
    %40 = tpu.matmul %15, %38, %cst_34 {dimension_numbers = #tpu.dot_dimension_numbers<[1], [0], [0], [1], [0, 0, 1, 1], [], []>} : vector<256x256xf32>, vector<256x1xf32>, vector<256x1xf32> -> vector<256x1xf32>
    %41 = arith.addf %39, %40 : vector<256x1xf32>
    %42 = vector.broadcast %16 : vector<1x1xf32> to vector<256x1xf32>
    %43 = arith.addf %41, %42 : vector<256x1xf32>
    %44 = arith.negf %43 : vector<256x1xf32>
    %45 = math.exp %44 : vector<256x1xf32>
    %cst_35 = arith.constant 1.000000e+00 : f32
    %46 = vector.broadcast %cst_35 : f32 to vector<256x1xf32>
    %47 = arith.addf %46, %45 : vector<256x1xf32>
    %48 = arith.divf %46, %47 : vector<256x1xf32>
    %49 = vector.broadcast %48 : vector<256x1xf32> to vector<256x32xf32>
    %50 = arith.mulf %32, %49 : vector<256x32xf32>
    %c0_36 = arith.constant 0 : index
    %c0_37 = arith.constant 0 : index
    %51 = vector.load %arg13[%c0_36, %c0_37] : memref<256x32xf32, #tpu.memory_space<vmem>>, vector<256x32xf32>
    tpu.vector_store %arg13[%c0_36, %c0_37], %50 {strides = array<i32>} : memref<256x32xf32, #tpu.memory_space<vmem>>, vector<256x32xf32>,
    return
  }
  func.func @transform_0(%arg0: i32) -> (i32, i32) {
    %c0_i32 = arith.constant 0 : i32
    %c0_i32_0 = arith.constant 0 : i32
    return %arg0, %c0_i32 : i32, i32
  }
  func.func @transform_1(%arg0: i32) -> (i32, i32) {
    %c0_i32 = arith.constant 0 : i32
    %c0_i32_0 = arith.constant 0 : i32
    %c0_i32_1 = arith.constant 0 : i32
    return %c0_i32, %c0_i32_0 : i32, i32
  }
  func.func @transform_2(%arg0: i32) -> (i32, i32) {
    %c0_i32 = arith.constant 0 : i32
    %c0_i32_0 = arith.constant 0 : i32
    %c0_i32_1 = arith.constant 0 : i32
    return %c0_i32, %c0_i32_0 : i32, i32
  }
  func.func @transform_3(%arg0: i32) -> (i32, i32) {
    %c0_i32 = arith.constant 0 : i32
    %c0_i32_0 = arith.constant 0 : i32
    %c0_i32_1 = arith.constant 0 : i32
    return %c0_i32, %c0_i32_0 : i32, i32
  }
  func.func @transform_4(%arg0: i32) -> (i32, i32) {
    %c0_i32 = arith.constant 0 : i32
    %c0_i32_0 = arith.constant 0 : i32
    %c0_i32_1 = arith.constant 0 : i32
    return %c0_i32, %c0_i32_0 : i32, i32
  }
  func.func @transform_5(%arg0: i32) -> (i32, i32) {
    %c0_i32 = arith.constant 0 : i32
    %c0_i32_0 = arith.constant 0 : i32
    %c0_i32_1 = arith.constant 0 : i32
    return %c0_i32, %c0_i32_0 : i32, i32
  }
  func.func @transform_6(%arg0: i32) -> (i32, i32) {
    %c0_i32 = arith.constant 0 : i32
    %c0_i32_0 = arith.constant 0 : i32
    %c0_i32_1 = arith.constant 0 : i32
    return %c0_i32, %c0_i32_0 : i32, i32
  }
  func.func @transform_7(%arg0: i32) -> (i32, i32) {
    %c0_i32 = arith.constant 0 : i32
    %c0_i32_0 = arith.constant 0 : i32
    %c0_i32_1 = arith.constant 0 : i32
    return %c0_i32, %c0_i32_0 : i32, i32
  }
  func.func @transform_8(%arg0: i32) -> (i32, i32) {
    %c0_i32 = arith.constant 0 : i32
    %c0_i32_0 = arith.constant 0 : i32
    %c0_i32_1 = arith.constant 0 : i32
    return %c0_i32, %c0_i32_0 : i32, i32
  }
  func.func @transform_9(%arg0: i32) -> (i32, i32) {
    %c0_i32 = arith.constant 0 : i32
    %c0_i32_0 = arith.constant 0 : i32
    %c0_i32_1 = arith.constant 0 : i32
    return %c0_i32, %c0_i32_0 : i32, i32
  }
  func.func @transform_10(%arg0: i32) -> (i32, i32) {
    %c0_i32 = arith.constant 0 : i32
    %c0_i32_0 = arith.constant 0 : i32
    %c0_i32_1 = arith.constant 0 : i32
    return %c0_i32, %c0_i32_0 : i32, i32
  }
  func.func @transform_11(%arg0: i32) -> (i32, i32) {
    %c0_i32 = arith.constant 0 : i32
    %c0_i32_0 = arith.constant 0 : i32
    %c0_i32_1 = arith.constant 0 : i32
    return %c0_i32, %c0_i32_0 : i32, i32
  }
  func.func @transform_12(%arg0: i32) -> (i32, i32) {
    %c0_i32 = arith.constant 0 : i32
    %c0_i32_0 = arith.constant 0 : i32
    return %arg0, %c0_i32 : i32, i32
  }
}

module attributes {stable_mosaic.version = 11 : i64} {
  func.func @_block23_fc_kernel(%arg0: i32, %arg1: memref<1x36x512xbf16, #tpu.memory_space<vmem>>, %arg2: memref<512x64xbf16, #tpu.memory_space<vmem>>, %arg3: memref<1x64xf32, #tpu.memory_space<vmem>>, %arg4: memref<4x36xf32, #tpu.memory_space<vmem>>, %arg5: memref<36x4xf32, #tpu.memory_space<vmem>>, %arg6: memref<64x4xf32, #tpu.memory_space<vmem>>, %arg7: memref<1x4xf32, #tpu.memory_space<vmem>>, %arg8: memref<4x64xf32, #tpu.memory_space<vmem>>, %arg9: memref<1x64xf32, #tpu.memory_space<vmem>>, %arg10: memref<36x36xf32, #tpu.memory_space<vmem>>, %arg11: memref<36x36xf32, #tpu.memory_space<vmem>>, %arg12: memref<1x1xf32, #tpu.memory_space<vmem>>, %arg13: memref<36x36xf32, #tpu.memory_space<vmem>>, %arg14: memref<576x64xbf16, #tpu.memory_space<vmem>>, %arg15: memref<1x64xf32, #tpu.memory_space<vmem>>, %arg16: memref<64x4xf32, #tpu.memory_space<vmem>>, %arg17: memref<1x4xf32, #tpu.memory_space<vmem>>, %arg18: memref<4x64xf32, #tpu.memory_space<vmem>>, %arg19: memref<1x64xf32, #tpu.memory_space<vmem>>, %arg20: memref<1x1xf32, #tpu.memory_space<vmem>>, %arg21: memref<1x1xf32, #tpu.memory_space<vmem>>, %arg22: memref<1x1xf32, #tpu.memory_space<vmem>>, %arg23: memref<64x512xbf16, #tpu.memory_space<vmem>>, %arg24: memref<1x512xf32, #tpu.memory_space<vmem>>, %arg25: memref<512x6xbf16, #tpu.memory_space<vmem>>, %arg26: memref<1x6xf32, #tpu.memory_space<vmem>>, %arg27: memref<1x4x6xf32, #tpu.memory_space<vmem>>) attributes {dimension_semantics = [#tpu.dimension_semantics<parallel>], iteration_bounds = array<i64: 2>, scalar_prefetch = 0 : i64, scratch_operands = 0 : i64, tpu.core_type = #tpu.core_type<tc>, window_params = [{transform_indices = @transform_0, window_bounds = array<i64: 1, 36, 512>}, {pipeline_mode = #tpu.pipeline_mode<synchronous>, transform_indices = @transform_1, window_bounds = array<i64: 512, 64>}, {pipeline_mode = #tpu.pipeline_mode<synchronous>, transform_indices = @transform_2, window_bounds = array<i64: 1, 64>}, {pipeline_mode = #tpu.pipeline_mode<synchronous>, transform_indices = @transform_3, window_bounds = array<i64: 4, 36>}, {pipeline_mode = #tpu.pipeline_mode<synchronous>, transform_indices = @transform_4, window_bounds = array<i64: 36, 4>}, {pipeline_mode = #tpu.pipeline_mode<synchronous>, transform_indices = @transform_5, window_bounds = array<i64: 64, 4>}, {pipeline_mode = #tpu.pipeline_mode<synchronous>, transform_indices = @transform_6, window_bounds = array<i64: 1, 4>}, {pipeline_mode = #tpu.pipeline_mode<synchronous>, transform_indices = @transform_7, window_bounds = array<i64: 4, 64>}, {pipeline_mode = #tpu.pipeline_mode<synchronous>, transform_indices = @transform_8, window_bounds = array<i64: 1, 64>}, {pipeline_mode = #tpu.pipeline_mode<synchronous>, transform_indices = @transform_9, window_bounds = array<i64: 36, 36>}, {pipeline_mode = #tpu.pipeline_mode<synchronous>, transform_indices = @transform_10, window_bounds = array<i64: 36, 36>}, {pipeline_mode = #tpu.pipeline_mode<synchronous>, transform_indices = @transform_11, window_bounds = array<i64: 1, 1>}, {pipeline_mode = #tpu.pipeline_mode<synchronous>, transform_indices = @transform_12, window_bounds = array<i64: 36, 36>}, {pipeline_mode = #tpu.pipeline_mode<synchronous>, transform_indices = @transform_13, window_bounds = array<i64: 576, 64>}, {pipeline_mode = #tpu.pipeline_mode<synchronous>, transform_indices = @transform_14, window_bounds = array<i64: 1, 64>}, {pipeline_mode = #tpu.pipeline_mode<synchronous>, transform_indices = @transform_15, window_bounds = array<i64: 64, 4>}, {pipeline_mode = #tpu.pipeline_mode<synchronous>, transform_indices = @transform_16, window_bounds = array<i64: 1, 4>}, {pipeline_mode = #tpu.pipeline_mode<synchronous>, transform_indices = @transform_17, window_bounds = array<i64: 4, 64>}, {pipeline_mode = #tpu.pipeline_mode<synchronous>, transform_indices = @transform_18, window_bounds = array<i64: 1, 64>}, {pipeline_mode = #tpu.pipeline_mode<synchronous>, transform_indices = @transform_19, window_bounds = array<i64: 1, 1>}, {pipeline_mode = #tpu.pipeline_mode<synchronous>, transform_indices = @transform_20, window_bounds = array<i64: 1, 1>}, {pipeline_mode = #tpu.pipeline_mode<synchronous>, transform_indices = @transform_21, window_bounds = array<i64: 1, 1>}, {pipeline_mode = #tpu.pipeline_mode<synchronous>, transform_indices = @transform_22, window_bounds = array<i64: 64, 512>}, {pipeline_mode = #tpu.pipeline_mode<synchronous>, transform_indices = @transform_23, window_bounds = array<i64: 1, 512>}, {pipeline_mode = #tpu.pipeline_mode<synchronous>, transform_indices = @transform_24, window_bounds = array<i64: 512, 6>}, {pipeline_mode = #tpu.pipeline_mode<synchronous>, transform_indices = @transform_25, window_bounds = array<i64: 1, 6>}, {transform_indices = @transform_26, window_bounds = array<i64: 1, 4, 6>}]} {
    %c0 = arith.constant 0 : index
    %c0_0 = arith.constant 0 : index
    %c0_1 = arith.constant 0 : index
    %0 = vector.load %arg1[%c0, %c0_0, %c0_1] : memref<1x36x512xbf16, #tpu.memory_space<vmem>>, vector<1x36x512xbf16>
    %1 = vector.shape_cast %0 : vector<1x36x512xbf16> to vector<36x512xbf16>
    %c0_2 = arith.constant 0 : index
    %c0_3 = arith.constant 0 : index
    %2 = vector.load %arg2[%c0_2, %c0_3] : memref<512x64xbf16, #tpu.memory_space<vmem>>, vector<512x64xbf16>
    %cst = arith.constant dense<0.000000e+00> : vector<36x64xf32>
    %3 = tpu.matmul %1, %2, %cst {dimension_numbers = #tpu.dot_dimension_numbers<[1], [0], [0], [1], [0, 0, 1, 1], [], []>} : vector<36x512xbf16>, vector<512x64xbf16>, vector<36x64xf32> -> vector<36x64xf32>
    %c0_4 = arith.constant 0 : index
    %c0_5 = arith.constant 0 : index
    %4 = vector.load %arg3[%c0_4, %c0_5] : memref<1x64xf32, #tpu.memory_space<vmem>>, vector<1x64xf32>
    %5 = vector.broadcast %4 : vector<1x64xf32> to vector<36x64xf32>
    %6 = arith.addf %3, %5 : vector<36x64xf32>
    %cst_6 = arith.constant 0.000000e+00 : f32
    %7 = vector.broadcast %cst_6 : f32 to vector<36x64xf32>
    %8 = arith.maximumf %6, %7 : vector<36x64xf32>
    %c0_7 = arith.constant 0 : index
    %c0_8 = arith.constant 0 : index
    %9 = vector.load %arg4[%c0_7, %c0_8] : memref<4x36xf32, #tpu.memory_space<vmem>>, vector<4x36xf32>
    %c0_9 = arith.constant 0 : index
    %c0_10 = arith.constant 0 : index
    %10 = vector.load %arg5[%c0_9, %c0_10] : memref<36x4xf32, #tpu.memory_space<vmem>>, vector<36x4xf32>
    %c0_11 = arith.constant 0 : index
    %c0_12 = arith.constant 0 : index
    %11 = vector.load %arg6[%c0_11, %c0_12] : memref<64x4xf32, #tpu.memory_space<vmem>>, vector<64x4xf32>
    %c0_13 = arith.constant 0 : index
    %c0_14 = arith.constant 0 : index
    %12 = vector.load %arg7[%c0_13, %c0_14] : memref<1x4xf32, #tpu.memory_space<vmem>>, vector<1x4xf32>
    %c0_15 = arith.constant 0 : index
    %c0_16 = arith.constant 0 : index
    %13 = vector.load %arg8[%c0_15, %c0_16] : memref<4x64xf32, #tpu.memory_space<vmem>>, vector<4x64xf32>
    %c0_17 = arith.constant 0 : index
    %c0_18 = arith.constant 0 : index
    %14 = vector.load %arg9[%c0_17, %c0_18] : memref<1x64xf32, #tpu.memory_space<vmem>>, vector<1x64xf32>
    %c0_19 = arith.constant 0 : index
    %c0_20 = arith.constant 0 : index
    %15 = vector.load %arg10[%c0_19, %c0_20] : memref<36x36xf32, #tpu.memory_space<vmem>>, vector<36x36xf32>
    %c0_21 = arith.constant 0 : index
    %c0_22 = arith.constant 0 : index
    %16 = vector.load %arg11[%c0_21, %c0_22] : memref<36x36xf32, #tpu.memory_space<vmem>>, vector<36x36xf32>
    %c0_23 = arith.constant 0 : index
    %c0_24 = arith.constant 0 : index
    %17 = vector.load %arg12[%c0_23, %c0_24] : memref<1x1xf32, #tpu.memory_space<vmem>>, vector<1x1xf32>
    %cst_25 = arith.constant dense<0.000000e+00> : vector<4x64xf32>
    %18 = tpu.matmul %9, %8, %cst_25 {dimension_numbers = #tpu.dot_dimension_numbers<[1], [0], [0], [1], [0, 0, 1, 1], [], []>} : vector<4x36xf32>, vector<36x64xf32>, vector<4x64xf32> -> vector<4x64xf32>
    %cst_26 = arith.constant dense<0.000000e+00> : vector<4x4xf32>
    %19 = tpu.matmul %18, %11, %cst_26 {dimension_numbers = #tpu.dot_dimension_numbers<[1], [0], [0], [1], [0, 0, 1, 1], [], []>} : vector<4x64xf32>, vector<64x4xf32>, vector<4x4xf32> -> vector<4x4xf32>
    %20 = vector.broadcast %12 : vector<1x4xf32> to vector<4x4xf32>
    %21 = arith.addf %19, %20 : vector<4x4xf32>
    %cst_27 = arith.constant 0.000000e+00 : f32
    %22 = vector.broadcast %cst_27 : f32 to vector<4x4xf32>
    %23 = arith.maximumf %21, %22 : vector<4x4xf32>
    %cst_28 = arith.constant dense<0.000000e+00> : vector<4x64xf32>
    %24 = tpu.matmul %23, %13, %cst_28 {dimension_numbers = #tpu.dot_dimension_numbers<[1], [0], [0], [1], [0, 0, 1, 1], [], []>} : vector<4x4xf32>, vector<4x64xf32>, vector<4x64xf32> -> vector<4x64xf32>
    %25 = vector.broadcast %14 : vector<1x64xf32> to vector<4x64xf32>
    %26 = arith.addf %24, %25 : vector<4x64xf32>
    %27 = arith.negf %26 : vector<4x64xf32>
    %28 = math.exp %27 : vector<4x64xf32>
    %cst_29 = arith.constant 1.000000e+00 : f32
    %29 = vector.broadcast %cst_29 : f32 to vector<4x64xf32>
    %30 = arith.addf %29, %28 : vector<4x64xf32>
    %31 = arith.divf %29, %30 : vector<4x64xf32>
    %cst_30 = arith.constant dense<0.000000e+00> : vector<36x64xf32>
    %32 = tpu.matmul %10, %31, %cst_30 {dimension_numbers = #tpu.dot_dimension_numbers<[1], [0], [0], [1], [0, 0, 1, 1], [], []>} : vector<36x4xf32>, vector<4x64xf32>, vector<36x64xf32> -> vector<36x64xf32>
    %33 = arith.mulf %8, %32 : vector<36x64xf32>
    %cst_31 = arith.constant dense<0xFF800000> : vector<36xf32>
    %34 = vector.multi_reduction <maximumf>, %33, %cst_31 [1] : vector<36x64xf32> to vector<36xf32>
    %35 = vector.shape_cast %34 : vector<36xf32> to vector<36x1xf32>
    %cst_32 = arith.constant dense<0.000000e+00> : vector<36xf32>
    %36 = vector.multi_reduction <add>, %33, %cst_32 [1] : vector<36x64xf32> to vector<36xf32>
    %37 = vector.shape_cast %36 : vector<36xf32> to vector<36x1xf32>
    %cst_33 = arith.constant 6.400000e+01 : f32
    %38 = vector.broadcast %cst_33 : f32 to vector<36x1xf32>
    %39 = arith.divf %37, %38 : vector<36x1xf32>
    %cst_34 = arith.constant dense<0.000000e+00> : vector<36x1xf32>
    %40 = tpu.matmul %15, %35, %cst_34 {dimension_numbers = #tpu.dot_dimension_numbers<[1], [0], [0], [1], [0, 0, 1, 1], [], []>} : vector<36x36xf32>, vector<36x1xf32>, vector<36x1xf32> -> vector<36x1xf32>
    %cst_35 = arith.constant dense<0.000000e+00> : vector<36x1xf32>
    %41 = tpu.matmul %16, %39, %cst_35 {dimension_numbers = #tpu.dot_dimension_numbers<[1], [0], [0], [1], [0, 0, 1, 1], [], []>} : vector<36x36xf32>, vector<36x1xf32>, vector<36x1xf32> -> vector<36x1xf32>
    %42 = arith.addf %40, %41 : vector<36x1xf32>
    %43 = vector.broadcast %17 : vector<1x1xf32> to vector<36x1xf32>
    %44 = arith.addf %42, %43 : vector<36x1xf32>
    %45 = arith.negf %44 : vector<36x1xf32>
    %46 = math.exp %45 : vector<36x1xf32>
    %cst_36 = arith.constant 1.000000e+00 : f32
    %47 = vector.broadcast %cst_36 : f32 to vector<36x1xf32>
    %48 = arith.addf %47, %46 : vector<36x1xf32>
    %49 = arith.divf %47, %48 : vector<36x1xf32>
    %50 = vector.broadcast %49 : vector<36x1xf32> to vector<36x64xf32>
    %51 = arith.mulf %33, %50 : vector<36x64xf32>
    %c0_37 = arith.constant 0 : index
    %c0_38 = arith.constant 0 : index
    %52 = vector.load %arg15[%c0_37, %c0_38] : memref<1x64xf32, #tpu.memory_space<vmem>>, vector<1x64xf32>
    %c0_39 = arith.constant 0 : index
    %c0_40 = arith.constant 0 : index
    %53 = vector.load %arg13[%c0_39, %c0_40] : memref<36x36xf32, #tpu.memory_space<vmem>>, vector<4x36xf32>
    %cst_41 = arith.constant dense<0.000000e+00> : vector<4x64xf32>
    %54 = tpu.matmul %53, %51, %cst_41 {dimension_numbers = #tpu.dot_dimension_numbers<[1], [0], [0], [1], [0, 0, 1, 1], [], []>} : vector<4x36xf32>, vector<36x64xf32>, vector<4x64xf32> -> vector<4x64xf32>
    %55 = arith.truncf %54 : vector<4x64xf32> to vector<4x64xbf16>
    %c0_42 = arith.constant 0 : index
    %c0_43 = arith.constant 0 : index
    %56 = vector.load %arg14[%c0_42, %c0_43] : memref<576x64xbf16, #tpu.memory_space<vmem>>, vector<64x64xbf16>
    %cst_44 = arith.constant dense<0.000000e+00> : vector<4x64xf32>
    %57 = tpu.matmul %55, %56, %cst_44 {dimension_numbers = #tpu.dot_dimension_numbers<[1], [0], [0], [1], [0, 0, 1, 1], [], []>} : vector<4x64xbf16>, vector<64x64xbf16>, vector<4x64xf32> -> vector<4x64xf32>
    %58 = vector.broadcast %52 : vector<1x64xf32> to vector<4x64xf32>
    %59 = arith.addf %58, %57 : vector<4x64xf32>
    %c4 = arith.constant 4 : index
    %c0_45 = arith.constant 0 : index
    %60 = vector.load %arg13[%c4, %c0_45] : memref<36x36xf32, #tpu.memory_space<vmem>>, vector<4x36xf32>
    %cst_46 = arith.constant dense<0.000000e+00> : vector<4x64xf32>
    %61 = tpu.matmul %60, %51, %cst_46 {dimension_numbers = #tpu.dot_dimension_numbers<[1], [0], [0], [1], [0, 0, 1, 1], [], []>} : vector<4x36xf32>, vector<36x64xf32>, vector<4x64xf32> -> vector<4x64xf32>
    %62 = arith.truncf %61 : vector<4x64xf32> to vector<4x64xbf16>
    %c64 = arith.constant 64 : index
    %c0_47 = arith.constant 0 : index
    %63 = vector.load %arg14[%c64, %c0_47] : memref<576x64xbf16, #tpu.memory_space<vmem>>, vector<64x64xbf16>
    %cst_48 = arith.constant dense<0.000000e+00> : vector<4x64xf32>
    %64 = tpu.matmul %62, %63, %cst_48 {dimension_numbers = #tpu.dot_dimension_numbers<[1], [0], [0], [1], [0, 0, 1, 1], [], []>} : vector<4x64xbf16>, vector<64x64xbf16>, vector<4x64xf32> -> vector<4x64xf32>
    %65 = arith.addf %59, %64 : vector<4x64xf32>
    %c8 = arith.constant 8 : index
    %c0_49 = arith.constant 0 : index
    %66 = vector.load %arg13[%c8, %c0_49] : memref<36x36xf32, #tpu.memory_space<vmem>>, vector<4x36xf32>
    %cst_50 = arith.constant dense<0.000000e+00> : vector<4x64xf32>
    %67 = tpu.matmul %66, %51, %cst_50 {dimension_numbers = #tpu.dot_dimension_numbers<[1], [0], [0], [1], [0, 0, 1, 1], [], []>} : vector<4x36xf32>, vector<36x64xf32>, vector<4x64xf32> -> vector<4x64xf32>
    %68 = arith.truncf %67 : vector<4x64xf32> to vector<4x64xbf16>
    %c128 = arith.constant 128 : index
    %c0_51 = arith.constant 0 : index
    %69 = vector.load %arg14[%c128, %c0_51] : memref<576x64xbf16, #tpu.memory_space<vmem>>, vector<64x64xbf16>
    %cst_52 = arith.constant dense<0.000000e+00> : vector<4x64xf32>
    %70 = tpu.matmul %68, %69, %cst_52 {dimension_numbers = #tpu.dot_dimension_numbers<[1], [0], [0], [1], [0, 0, 1, 1], [], []>} : vector<4x64xbf16>, vector<64x64xbf16>, vector<4x64xf32> -> vector<4x64xf32>
    %71 = arith.addf %65, %70 : vector<4x64xf32>
    %c12 = arith.constant 12 : index
    %c0_53 = arith.constant 0 : index
    %72 = vector.load %arg13[%c12, %c0_53] : memref<36x36xf32, #tpu.memory_space<vmem>>, vector<4x36xf32>
    %cst_54 = arith.constant dense<0.000000e+00> : vector<4x64xf32>
    %73 = tpu.matmul %72, %51, %cst_54 {dimension_numbers = #tpu.dot_dimension_numbers<[1], [0], [0], [1], [0, 0, 1, 1], [], []>} : vector<4x36xf32>, vector<36x64xf32>, vector<4x64xf32> -> vector<4x64xf32>
    %74 = arith.truncf %73 : vector<4x64xf32> to vector<4x64xbf16>
    %c192 = arith.constant 192 : index
    %c0_55 = arith.constant 0 : index
    %75 = vector.load %arg14[%c192, %c0_55] : memref<576x64xbf16, #tpu.memory_space<vmem>>, vector<64x64xbf16>
    %cst_56 = arith.constant dense<0.000000e+00> : vector<4x64xf32>
    %76 = tpu.matmul %74, %75, %cst_56 {dimension_numbers = #tpu.dot_dimension_numbers<[1], [0], [0], [1], [0, 0, 1, 1], [], []>} : vector<4x64xbf16>, vector<64x64xbf16>, vector<4x64xf32> -> vector<4x64xf32>
    %77 = arith.addf %71, %76 : vector<4x64xf32>
    %c16 = arith.constant 16 : index
    %c0_57 = arith.constant 0 : index
    %78 = vector.load %arg13[%c16, %c0_57] : memref<36x36xf32, #tpu.memory_space<vmem>>, vector<4x36xf32>
    %cst_58 = arith.constant dense<0.000000e+00> : vector<4x64xf32>
    %79 = tpu.matmul %78, %51, %cst_58 {dimension_numbers = #tpu.dot_dimension_numbers<[1], [0], [0], [1], [0, 0, 1, 1], [], []>} : vector<4x36xf32>, vector<36x64xf32>, vector<4x64xf32> -> vector<4x64xf32>
    %80 = arith.truncf %79 : vector<4x64xf32> to vector<4x64xbf16>
    %c256 = arith.constant 256 : index
    %c0_59 = arith.constant 0 : index
    %81 = vector.load %arg14[%c256, %c0_59] : memref<576x64xbf16, #tpu.memory_space<vmem>>, vector<64x64xbf16>
    %cst_60 = arith.constant dense<0.000000e+00> : vector<4x64xf32>
    %82 = tpu.matmul %80, %81, %cst_60 {dimension_numbers = #tpu.dot_dimension_numbers<[1], [0], [0], [1], [0, 0, 1, 1], [], []>} : vector<4x64xbf16>, vector<64x64xbf16>, vector<4x64xf32> -> vector<4x64xf32>
    %83 = arith.addf %77, %82 : vector<4x64xf32>
    %c20 = arith.constant 20 : index
    %c0_61 = arith.constant 0 : index
    %84 = vector.load %arg13[%c20, %c0_61] : memref<36x36xf32, #tpu.memory_space<vmem>>, vector<4x36xf32>
    %cst_62 = arith.constant dense<0.000000e+00> : vector<4x64xf32>
    %85 = tpu.matmul %84, %51, %cst_62 {dimension_numbers = #tpu.dot_dimension_numbers<[1], [0], [0], [1], [0, 0, 1, 1], [], []>} : vector<4x36xf32>, vector<36x64xf32>, vector<4x64xf32> -> vector<4x64xf32>
    %86 = arith.truncf %85 : vector<4x64xf32> to vector<4x64xbf16>
    %c320 = arith.constant 320 : index
    %c0_63 = arith.constant 0 : index
    %87 = vector.load %arg14[%c320, %c0_63] : memref<576x64xbf16, #tpu.memory_space<vmem>>, vector<64x64xbf16>
    %cst_64 = arith.constant dense<0.000000e+00> : vector<4x64xf32>
    %88 = tpu.matmul %86, %87, %cst_64 {dimension_numbers = #tpu.dot_dimension_numbers<[1], [0], [0], [1], [0, 0, 1, 1], [], []>} : vector<4x64xbf16>, vector<64x64xbf16>, vector<4x64xf32> -> vector<4x64xf32>
    %89 = arith.addf %83, %88 : vector<4x64xf32>
    %c24 = arith.constant 24 : index
    %c0_65 = arith.constant 0 : index
    %90 = vector.load %arg13[%c24, %c0_65] : memref<36x36xf32, #tpu.memory_space<vmem>>, vector<4x36xf32>
    %cst_66 = arith.constant dense<0.000000e+00> : vector<4x64xf32>
    %91 = tpu.matmul %90, %51, %cst_66 {dimension_numbers = #tpu.dot_dimension_numbers<[1], [0], [0], [1], [0, 0, 1, 1], [], []>} : vector<4x36xf32>, vector<36x64xf32>, vector<4x64xf32> -> vector<4x64xf32>
    %92 = arith.truncf %91 : vector<4x64xf32> to vector<4x64xbf16>
    %c384 = arith.constant 384 : index
    %c0_67 = arith.constant 0 : index
    %93 = vector.load %arg14[%c384, %c0_67] : memref<576x64xbf16, #tpu.memory_space<vmem>>, vector<64x64xbf16>
    %cst_68 = arith.constant dense<0.000000e+00> : vector<4x64xf32>
    %94 = tpu.matmul %92, %93, %cst_68 {dimension_numbers = #tpu.dot_dimension_numbers<[1], [0], [0], [1], [0, 0, 1, 1], [], []>} : vector<4x64xbf16>, vector<64x64xbf16>, vector<4x64xf32> -> vector<4x64xf32>
    %95 = arith.addf %89, %94 : vector<4x64xf32>
    %c28 = arith.constant 28 : index
    %c0_69 = arith.constant 0 : index
    %96 = vector.load %arg13[%c28, %c0_69] : memref<36x36xf32, #tpu.memory_space<vmem>>, vector<4x36xf32>
    %cst_70 = arith.constant dense<0.000000e+00> : vector<4x64xf32>
    %97 = tpu.matmul %96, %51, %cst_70 {dimension_numbers = #tpu.dot_dimension_numbers<[1], [0], [0], [1], [0, 0, 1, 1], [], []>} : vector<4x36xf32>, vector<36x64xf32>, vector<4x64xf32> -> vector<4x64xf32>
    %98 = arith.truncf %97 : vector<4x64xf32> to vector<4x64xbf16>
    %c448 = arith.constant 448 : index
    %c0_71 = arith.constant 0 : index
    %99 = vector.load %arg14[%c448, %c0_71] : memref<576x64xbf16, #tpu.memory_space<vmem>>, vector<64x64xbf16>
    %cst_72 = arith.constant dense<0.000000e+00> : vector<4x64xf32>
    %100 = tpu.matmul %98, %99, %cst_72 {dimension_numbers = #tpu.dot_dimension_numbers<[1], [0], [0], [1], [0, 0, 1, 1], [], []>} : vector<4x64xbf16>, vector<64x64xbf16>, vector<4x64xf32> -> vector<4x64xf32>
    %101 = arith.addf %95, %100 : vector<4x64xf32>
    %c32 = arith.constant 32 : index
    %c0_73 = arith.constant 0 : index
    %102 = vector.load %arg13[%c32, %c0_73] : memref<36x36xf32, #tpu.memory_space<vmem>>, vector<4x36xf32>
    %cst_74 = arith.constant dense<0.000000e+00> : vector<4x64xf32>
    %103 = tpu.matmul %102, %51, %cst_74 {dimension_numbers = #tpu.dot_dimension_numbers<[1], [0], [0], [1], [0, 0, 1, 1], [], []>} : vector<4x36xf32>, vector<36x64xf32>, vector<4x64xf32> -> vector<4x64xf32>
    %104 = arith.truncf %103 : vector<4x64xf32> to vector<4x64xbf16>
    %c512 = arith.constant 512 : index
    %c0_75 = arith.constant 0 : index
    %105 = vector.load %arg14[%c512, %c0_75] : memref<576x64xbf16, #tpu.memory_space<vmem>>, vector<64x64xbf16>
    %cst_76 = arith.constant dense<0.000000e+00> : vector<4x64xf32>
    %106 = tpu.matmul %104, %105, %cst_76 {dimension_numbers = #tpu.dot_dimension_numbers<[1], [0], [0], [1], [0, 0, 1, 1], [], []>} : vector<4x64xbf16>, vector<64x64xbf16>, vector<4x64xf32> -> vector<4x64xf32>
    %107 = arith.addf %101, %106 : vector<4x64xf32>
    %cst_77 = arith.constant 0.000000e+00 : f32
    %108 = vector.broadcast %cst_77 : f32 to vector<4x64xf32>
    %109 = arith.maximumf %107, %108 : vector<4x64xf32>
    %c0_78 = arith.constant 0 : index
    %c0_79 = arith.constant 0 : index
    %110 = vector.load %arg16[%c0_78, %c0_79] : memref<64x4xf32, #tpu.memory_space<vmem>>, vector<64x4xf32>
    %c0_80 = arith.constant 0 : index
    %c0_81 = arith.constant 0 : index
    %111 = vector.load %arg17[%c0_80, %c0_81] : memref<1x4xf32, #tpu.memory_space<vmem>>, vector<1x4xf32>
    %c0_82 = arith.constant 0 : index
    %c0_83 = arith.constant 0 : index
    %112 = vector.load %arg18[%c0_82, %c0_83] : memref<4x64xf32, #tpu.memory_space<vmem>>, vector<4x64xf32>
    %c0_84 = arith.constant 0 : index
    %c0_85 = arith.constant 0 : index
    %113 = vector.load %arg19[%c0_84, %c0_85] : memref<1x64xf32, #tpu.memory_space<vmem>>, vector<1x64xf32>
    %c0_86 = arith.constant 0 : index
    %c0_87 = arith.constant 0 : index
    %114 = vector.load %arg20[%c0_86, %c0_87] : memref<1x1xf32, #tpu.memory_space<vmem>>, vector<1x1xf32>
    %c0_88 = arith.constant 0 : index
    %c0_89 = arith.constant 0 : index
    %115 = vector.load %arg21[%c0_88, %c0_89] : memref<1x1xf32, #tpu.memory_space<vmem>>, vector<1x1xf32>
    %c0_90 = arith.constant 0 : index
    %c0_91 = arith.constant 0 : index
    %116 = vector.load %arg22[%c0_90, %c0_91] : memref<1x1xf32, #tpu.memory_space<vmem>>, vector<1x1xf32>
    %cst_92 = arith.constant dense<0.000000e+00> : vector<4x4xf32>
    %117 = tpu.matmul %109, %110, %cst_92 {dimension_numbers = #tpu.dot_dimension_numbers<[1], [0], [0], [1], [0, 0, 1, 1], [], []>} : vector<4x64xf32>, vector<64x4xf32>, vector<4x4xf32> -> vector<4x4xf32>
    %118 = vector.broadcast %111 : vector<1x4xf32> to vector<4x4xf32>
    %119 = arith.addf %117, %118 : vector<4x4xf32>
    %cst_93 = arith.constant 0.000000e+00 : f32
    %120 = vector.broadcast %cst_93 : f32 to vector<4x4xf32>
    %121 = arith.maximumf %119, %120 : vector<4x4xf32>
    %cst_94 = arith.constant dense<0.000000e+00> : vector<4x64xf32>
    %122 = tpu.matmul %121, %112, %cst_94 {dimension_numbers = #tpu.dot_dimension_numbers<[1], [0], [0], [1], [0, 0, 1, 1], [], []>} : vector<4x4xf32>, vector<4x64xf32>, vector<4x64xf32> -> vector<4x64xf32>
    %123 = vector.broadcast %113 : vector<1x64xf32> to vector<4x64xf32>
    %124 = arith.addf %122, %123 : vector<4x64xf32>
    %125 = arith.negf %124 : vector<4x64xf32>
    %126 = math.exp %125 : vector<4x64xf32>
    %cst_95 = arith.constant 1.000000e+00 : f32
    %127 = vector.broadcast %cst_95 : f32 to vector<4x64xf32>
    %128 = arith.addf %127, %126 : vector<4x64xf32>
    %129 = arith.divf %127, %128 : vector<4x64xf32>
    %130 = arith.mulf %109, %129 : vector<4x64xf32>
    %cst_96 = arith.constant dense<0xFF800000> : vector<4xf32>
    %131 = vector.multi_reduction <maximumf>, %130, %cst_96 [1] : vector<4x64xf32> to vector<4xf32>
    %132 = vector.shape_cast %131 : vector<4xf32> to vector<4x1xf32>
    %cst_97 = arith.constant dense<0.000000e+00> : vector<4xf32>
    %133 = vector.multi_reduction <add>, %130, %cst_97 [1] : vector<4x64xf32> to vector<4xf32>
    %134 = vector.shape_cast %133 : vector<4xf32> to vector<4x1xf32>
    %cst_98 = arith.constant 6.400000e+01 : f32
    %135 = vector.broadcast %cst_98 : f32 to vector<4x1xf32>
    %136 = arith.divf %134, %135 : vector<4x1xf32>
    %137 = vector.broadcast %114 : vector<1x1xf32> to vector<4x1xf32>
    %138 = arith.mulf %132, %137 : vector<4x1xf32>
    %139 = vector.broadcast %115 : vector<1x1xf32> to vector<4x1xf32>
    %140 = arith.mulf %136, %139 : vector<4x1xf32>
    %141 = arith.addf %138, %140 : vector<4x1xf32>
    %142 = vector.broadcast %116 : vector<1x1xf32> to vector<4x1xf32>
    %143 = arith.addf %141, %142 : vector<4x1xf32>
    %144 = arith.negf %143 : vector<4x1xf32>
    %145 = math.exp %144 : vector<4x1xf32>
    %cst_99 = arith.constant 1.000000e+00 : f32
    %146 = vector.broadcast %cst_99 : f32 to vector<4x1xf32>
    %147 = arith.addf %146, %145 : vector<4x1xf32>
    %148 = arith.divf %146, %147 : vector<4x1xf32>
    %149 = vector.broadcast %148 : vector<4x1xf32> to vector<4x64xf32>
    %150 = arith.mulf %130, %149 : vector<4x64xf32>
    %151 = arith.truncf %150 : vector<4x64xf32> to vector<4x64xbf16>
    %c0_100 = arith.constant 0 : index
    %c0_101 = arith.constant 0 : index
    %152 = vector.load %arg23[%c0_100, %c0_101] : memref<64x512xbf16, #tpu.memory_space<vmem>>, vector<64x512xbf16>
    %cst_102 = arith.constant dense<0.000000e+00> : vector<4x512xf32>
    %153 = tpu.matmul %151, %152, %cst_102 {dimension_numbers = #tpu.dot_dimension_numbers<[1], [0], [0], [1], [0, 0, 1, 1], [], []>} : vector<4x64xbf16>, vector<64x512xbf16>, vector<4x512xf32> -> vector<4x512xf32>
    %c0_103 = arith.constant 0 : index
    %c0_104 = arith.constant 0 : index
    %154 = vector.load %arg24[%c0_103, %c0_104] : memref<1x512xf32, #tpu.memory_space<vmem>>, vector<1x512xf32>
    %155 = vector.broadcast %154 : vector<1x512xf32> to vector<4x512xf32>
    %156 = arith.addf %153, %155 : vector<4x512xf32>
    %cst_105 = arith.constant 0.000000e+00 : f32
    %157 = vector.broadcast %cst_105 : f32 to vector<4x512xf32>
    %158 = arith.maximumf %156, %157 : vector<4x512xf32>
    %159 = arith.truncf %158 : vector<4x512xf32> to vector<4x512xbf16>
    %c0_106 = arith.constant 0 : index
    %c0_107 = arith.constant 0 : index
    %160 = vector.load %arg25[%c0_106, %c0_107] : memref<512x6xbf16, #tpu.memory_space<vmem>>, vector<512x6xbf16>
    %cst_108 = arith.constant dense<0.000000e+00> : vector<4x6xf32>
    %161 = tpu.matmul %159, %160, %cst_108 {dimension_numbers = #tpu.dot_dimension_numbers<[1], [0], [0], [1], [0, 0, 1, 1], [], []>} : vector<4x512xbf16>, vector<512x6xbf16>, vector<4x6xf32> -> vector<4x6xf32>
    %c0_109 = arith.constant 0 : index
    %c0_110 = arith.constant 0 : index
    %162 = vector.load %arg26[%c0_109, %c0_110] : memref<1x6xf32, #tpu.memory_space<vmem>>, vector<1x6xf32>
    %163 = vector.broadcast %162 : vector<1x6xf32> to vector<4x6xf32>
    %164 = arith.addf %161, %163 : vector<4x6xf32>
    %c0_111 = arith.constant 0 : index
    %c0_112 = arith.constant 0 : index
    %c0_113 = arith.constant 0 : index
    %165 = vector.load %arg27[%c0_111, %c0_112, %c0_113] : memref<1x4x6xf32, #tpu.memory_space<vmem>>, vector<1x4x6xf32>
    %166 = vector.shape_cast %165 : vector<1x4x6xf32> to vector<4x6xf32>
    %167 = vector.shape_cast %164 : vector<4x6xf32> to vector<1x4x6xf32>
    tpu.vector_store %arg27[%c0_111, %c0_112, %c0_113], %167 {strides = array<i32>} : memref<1x4x6xf32, #tpu.memory_space<vmem>>, vector<1x4x6xf32>,
    return
  }
  func.func @transform_0(%arg0: i32) -> (i32, i32, i32) {
    %c0_i32 = arith.constant 0 : i32
    %c0_i32_0 = arith.constant 0 : i32
    %c0_i32_1 = arith.constant 0 : i32
    return %arg0, %c0_i32, %c0_i32_0 : i32, i32, i32
  }
  func.func @transform_1(%arg0: i32) -> (i32, i32) {
    %c0_i32 = arith.constant 0 : i32
    %c0_i32_0 = arith.constant 0 : i32
    %c0_i32_1 = arith.constant 0 : i32
    return %c0_i32, %c0_i32_0 : i32, i32
  }
  func.func @transform_2(%arg0: i32) -> (i32, i32) {
    %c0_i32 = arith.constant 0 : i32
    %c0_i32_0 = arith.constant 0 : i32
    %c0_i32_1 = arith.constant 0 : i32
    return %c0_i32, %c0_i32_0 : i32, i32
  }
  func.func @transform_3(%arg0: i32) -> (i32, i32) {
    %c0_i32 = arith.constant 0 : i32
    %c0_i32_0 = arith.constant 0 : i32
    %c0_i32_1 = arith.constant 0 : i32
    return %c0_i32, %c0_i32_0 : i32, i32
  }
  func.func @transform_4(%arg0: i32) -> (i32, i32) {
    %c0_i32 = arith.constant 0 : i32
    %c0_i32_0 = arith.constant 0 : i32
    %c0_i32_1 = arith.constant 0 : i32
    return %c0_i32, %c0_i32_0 : i32, i32
  }
  func.func @transform_5(%arg0: i32) -> (i32, i32) {
    %c0_i32 = arith.constant 0 : i32
    %c0_i32_0 = arith.constant 0 : i32
    %c0_i32_1 = arith.constant 0 : i32
    return %c0_i32, %c0_i32_0 : i32, i32
  }
  func.func @transform_6(%arg0: i32) -> (i32, i32) {
    %c0_i32 = arith.constant 0 : i32
    %c0_i32_0 = arith.constant 0 : i32
    %c0_i32_1 = arith.constant 0 : i32
    return %c0_i32, %c0_i32_0 : i32, i32
  }
  func.func @transform_7(%arg0: i32) -> (i32, i32) {
    %c0_i32 = arith.constant 0 : i32
    %c0_i32_0 = arith.constant 0 : i32
    %c0_i32_1 = arith.constant 0 : i32
    return %c0_i32, %c0_i32_0 : i32, i32
  }
  func.func @transform_8(%arg0: i32) -> (i32, i32) {
    %c0_i32 = arith.constant 0 : i32
    %c0_i32_0 = arith.constant 0 : i32
    %c0_i32_1 = arith.constant 0 : i32
    return %c0_i32, %c0_i32_0 : i32, i32
  }
  func.func @transform_9(%arg0: i32) -> (i32, i32) {
    %c0_i32 = arith.constant 0 : i32
    %c0_i32_0 = arith.constant 0 : i32
    %c0_i32_1 = arith.constant 0 : i32
    return %c0_i32, %c0_i32_0 : i32, i32
  }
  func.func @transform_10(%arg0: i32) -> (i32, i32) {
    %c0_i32 = arith.constant 0 : i32
    %c0_i32_0 = arith.constant 0 : i32
    %c0_i32_1 = arith.constant 0 : i32
    return %c0_i32, %c0_i32_0 : i32, i32
  }
  func.func @transform_11(%arg0: i32) -> (i32, i32) {
    %c0_i32 = arith.constant 0 : i32
    %c0_i32_0 = arith.constant 0 : i32
    %c0_i32_1 = arith.constant 0 : i32
    return %c0_i32, %c0_i32_0 : i32, i32
  }
  func.func @transform_12(%arg0: i32) -> (i32, i32) {
    %c0_i32 = arith.constant 0 : i32
    %c0_i32_0 = arith.constant 0 : i32
    %c0_i32_1 = arith.constant 0 : i32
    return %c0_i32, %c0_i32_0 : i32, i32
  }
  func.func @transform_13(%arg0: i32) -> (i32, i32) {
    %c0_i32 = arith.constant 0 : i32
    %c0_i32_0 = arith.constant 0 : i32
    %c0_i32_1 = arith.constant 0 : i32
    return %c0_i32, %c0_i32_0 : i32, i32
  }
  func.func @transform_14(%arg0: i32) -> (i32, i32) {
    %c0_i32 = arith.constant 0 : i32
    %c0_i32_0 = arith.constant 0 : i32
    %c0_i32_1 = arith.constant 0 : i32
    return %c0_i32, %c0_i32_0 : i32, i32
  }
  func.func @transform_15(%arg0: i32) -> (i32, i32) {
    %c0_i32 = arith.constant 0 : i32
    %c0_i32_0 = arith.constant 0 : i32
    %c0_i32_1 = arith.constant 0 : i32
    return %c0_i32, %c0_i32_0 : i32, i32
  }
  func.func @transform_16(%arg0: i32) -> (i32, i32) {
    %c0_i32 = arith.constant 0 : i32
    %c0_i32_0 = arith.constant 0 : i32
    %c0_i32_1 = arith.constant 0 : i32
    return %c0_i32, %c0_i32_0 : i32, i32
  }
  func.func @transform_17(%arg0: i32) -> (i32, i32) {
    %c0_i32 = arith.constant 0 : i32
    %c0_i32_0 = arith.constant 0 : i32
    %c0_i32_1 = arith.constant 0 : i32
    return %c0_i32, %c0_i32_0 : i32, i32
  }
  func.func @transform_18(%arg0: i32) -> (i32, i32) {
    %c0_i32 = arith.constant 0 : i32
    %c0_i32_0 = arith.constant 0 : i32
    %c0_i32_1 = arith.constant 0 : i32
    return %c0_i32, %c0_i32_0 : i32, i32
  }
  func.func @transform_19(%arg0: i32) -> (i32, i32) {
    %c0_i32 = arith.constant 0 : i32
    %c0_i32_0 = arith.constant 0 : i32
    %c0_i32_1 = arith.constant 0 : i32
    return %c0_i32, %c0_i32_0 : i32, i32
  }
  func.func @transform_20(%arg0: i32) -> (i32, i32) {
    %c0_i32 = arith.constant 0 : i32
    %c0_i32_0 = arith.constant 0 : i32
    %c0_i32_1 = arith.constant 0 : i32
    return %c0_i32, %c0_i32_0 : i32, i32
  }
  func.func @transform_21(%arg0: i32) -> (i32, i32) {
    %c0_i32 = arith.constant 0 : i32
    %c0_i32_0 = arith.constant 0 : i32
    %c0_i32_1 = arith.constant 0 : i32
    return %c0_i32, %c0_i32_0 : i32, i32
  }
  func.func @transform_22(%arg0: i32) -> (i32, i32) {
    %c0_i32 = arith.constant 0 : i32
    %c0_i32_0 = arith.constant 0 : i32
    %c0_i32_1 = arith.constant 0 : i32
    return %c0_i32, %c0_i32_0 : i32, i32
  }
  func.func @transform_23(%arg0: i32) -> (i32, i32) {
    %c0_i32 = arith.constant 0 : i32
    %c0_i32_0 = arith.constant 0 : i32
    %c0_i32_1 = arith.constant 0 : i32
    return %c0_i32, %c0_i32_0 : i32, i32
  }
  func.func @transform_24(%arg0: i32) -> (i32, i32) {
    %c0_i32 = arith.constant 0 : i32
    %c0_i32_0 = arith.constant 0 : i32
    %c0_i32_1 = arith.constant 0 : i32
    return %c0_i32, %c0_i32_0 : i32, i32
  }
  func.func @transform_25(%arg0: i32) -> (i32, i32) {
    %c0_i32 = arith.constant 0 : i32
    %c0_i32_0 = arith.constant 0 : i32
    %c0_i32_1 = arith.constant 0 : i32
    return %c0_i32, %c0_i32_0 : i32, i32
  }
  func.func @transform_26(%arg0: i32) -> (i32, i32, i32) {
    %c0_i32 = arith.constant 0 : i32
    %c0_i32_0 = arith.constant 0 : i32
    %c0_i32_1 = arith.constant 0 : i32
    return %arg0, %c0_i32, %c0_i32_0 : i32, i32, i32
  }
}

</mosaic_0001>

<bundles_post_ra>
// kernel: agentnn_forward.2
= control target key start
LH: loop header
LB: loop body
LE: loop exit
PB: predicated region body
PF: predicated region fallthrough
CT: control target
= control target key end

     0   :  { %s3743_s23 = smov 0   ;;  %s5155_s0 = inlined_call_operand.vmem [shape: bf16[512,256], index: 0, kind: input, shape index: {}]   ;;  %s5156_s1 = inlined_call_operand.vmem [shape: bf16[256,32], index: 1, kind: input, shape index: {}]   ;;  %s5157_s2 = inlined_call_operand.vmem [shape: f32[1,32], index: 2, kind: input, shape index: {}]   ;;  %s5158_s3 = inlined_call_operand.vmem [shape: f32[4,256], index: 3, kind: input, shape index: {}]   ;;  %s5159_s4 = inlined_call_operand.vmem [shape: f32[256,4], index: 4, kind: input, shape index: {}]   ;;  %s5160_s5 = inlined_call_operand.vmem [shape: f32[32,2], index: 5, kind: input, shape index: {}]   ;;  %s5161_s6 = inlined_call_operand.vmem [shape: f32[1,2], index: 6, kind: input, shape index: {}]   ;;  %s5162_s7 = inlined_call_operand.vmem [shape: f32[2,32], index: 7, kind: input, shape index: {}]   ;;  %s5163_s8 = inlined_call_operand.vmem [shape: f32[1,32], index: 8, kind: input, shape index: {}]   ;;  %s5164_s9 = inlined_call_operand.vmem [shape: f32[256,256], index: 9, kind: input, shape index: {}]   ;;  %s5165_s10 = inlined_call_operand.vmem [shape: f32[256,256], index: 10, kind: input, shape index: {}]   ;;  %s5166_s11 = inlined_call_operand.<no memory space> [shape: f32[1,1], index: 11, kind: input, shape index: {}]   ;;  %s5167_s12 = inlined_call_operand.vmem [shape: f32[512,32], index: 12, kind: output, shape index: {}]  }
   0x1   :  { %v17_v0 = vstv %s5166_s11 }
   0x2   :  { %18 = vst [vmem:[#allocation2] sm:$0x1] %v17_v0 }
   0x3 LB: > { %s2899_s24 = sadd.s32 4294967295, %s3669_s23   ;;  %p2903_p0 = scmp.ge.s32.totalorder %s3669_s23, 1  ;;  %s3669_s23 = sphi %s3743_s23, %s24_s23  }
   0x4   : > { %p366_p1 = scmp.lt.s32.totalorder %s3669_s23, 3 }
   0x6   : > { %p367_p2 = pnand %p2903_p0, %p366_p1 }
   0x7   : > { %v3466_v1 = vld [vmem:[%s5156_s1 + $0x40] sm:$0xff] (!%p367_p2)   ;;  %s2904_s11 = sshll.u32 (!%p367_p2), %s2899_s24, 5  ;;  %v3468_v3 = vld [vmem:[%s5156_s1 + $0x48] sm:$0xff] (!%p367_p2)   ;;  %v3470_v5 = vld [vmem:[%s5156_s1 + $0x50] sm:$0xff] (!%p367_p2)   ;;  %v3671_v59 = vmov (!%p367_p2), 0.0|0.0   ;;  %vm3672_vm0 = vmmov (!%p367_p2), 0  }
   0x8   : > { %370 = sbr.rel (%p367_p2) target bundleno = 2031 (0x7ef), region = 68  ;;  %v3467_v2 = vld [vmem:[%s5156_s1] sm:$0xff] (!%p367_p2)   ;;  %3033 = vmatprep.subr.bf16.mxu0 (!%p367_p2), %v3466_v1  ;;  %v3469_v4 = vld [vmem:[%s5156_s1 + $0x8] sm:$0xff] (!%p367_p2)   ;;  %p410_p3 = scmp.lt.s32.totalorder (!%p367_p2), %s2904_s11, 63  ;;  %v3471_v6 = vld [vmem:[%s5156_s1 + $0x10] sm:$0xff] (!%p367_p2)   ;;  %vm1191_vm1 = vcmask (!%p367_p2), 261120  }
   0x9   : > { %3034 = vmatpush3.bf16.msra.mxu0 (!%p367_p2), %v3467_v2  ;;  %v3472_v7 = vld [vmem:[%s5156_s1 + $0x58] sm:$0xff] (!%p367_p2)   ;;  %v3474_v9 = vld [vmem:[%s5156_s1 + $0x60] sm:$0xff] (!%p367_p2)   ;;  %v3476_v11 = vld [vmem:[%s5156_s1 + $0x68] sm:$0xff] (!%p367_p2)   ;;  %vm1276_vm2 = vcmask (!%p367_p2), 1041408   ;;  %vm1272_vm3 = vcmask (!%p367_p2), 15360   ;;  %vm1356_vm4 = vcmask (!%p367_p2), 31744  }
   0xa   : > { %3035 = vmatprep.subr.bf16.mxu0 (!%p367_p2), %v3468_v3  ;;  %v3473_v8 = vld [vmem:[%s5156_s1 + $0x18] sm:$0xff] (!%p367_p2)   ;;  %v3475_v10 = vld [vmem:[%s5156_s1 + $0x20] sm:$0xff] (!%p367_p2)   ;;  %v3477_v13 = vld [vmem:[%s5156_s1 + $0x28] sm:$0xff] (!%p367_p2)   ;;  %vm1453_vm5 = vcmask (!%p367_p2), 1043456  }
   0xb   : > { %v3478_v14 = vld [vmem:[%s5156_s1 + $0x70] sm:$0xff] (!%p367_p2)   ;;  %v3480_v16 = vld [vmem:[%s5156_s1 + $0x78] sm:$0xff] (!%p367_p2)   ;;  %v3844_v55 = vld [vmem:[%s5158_s3] sm:$0xff] (!%p367_p2) }
   0xc   : > { %v3479_v15 = vld [vmem:[%s5156_s1 + $0x30] sm:$0xff] (!%p367_p2)   ;;  %v3481_v17 = vld [vmem:[%s5156_s1 + $0x38] sm:$0xff] (!%p367_p2)   ;;  %v1113_v56 = vcombine.high (!%p367_p2), %v3844_v55, %v3844_v55 }
   0xd   : > { %3036 = vmatpush3.bf16.msra.mxu0 (!%p367_p2), %v3469_v4 }
   0xe   : > { %3037 = vmatprep.subr.bf16.mxu0 (!%p367_p2), %v3470_v5  ;;  %1179 = vmatprep.mubr.f32.mxu1 (!%p367_p2), %v1113_v56 }
   0xf   : > { %s5193_s11 = smov (!%p410_p3, %s2904_s11), 63 }
  0x10   : > { %s3032_s24 = sshll.u32 %s5193_s11, 3 }
  0x11   : > { %3038 = vmatpush3.bf16.msra.mxu0 %v3471_v6  ;;  %s3786_s29 = scalar_lea.vmem %s5155_s0, %s3032_s24  ;;  %s5054_s14 = scalar_lea.vmem %s5167_s12, %s3032_s24 }
  0x12   : > { %3039 = vmatprep.subr.bf16.mxu0 %v3472_v7  ;;  %v3484_v12 = vld [vmem:[%s3786_s29 + $0x4] ss:$8 sps:$4 sm:$0xff]   ;;  %v3482_v18 = vld [vmem:[%s3786_s29] ss:$8 sps:$4 sm:$0xff]   ;;  %v3485_v19 = vld [vmem:[%s3786_s29 + $0x14] ss:$8 sps:$4 sm:$0xff]  }
  0x13   : > { %782 = vmatprep.mubr.bf16.mxu0 %v3484_v12  ;;  %v3487_v20 = vld [vmem:[%s3786_s29 + $0x10] ss:$8 sps:$4 sm:$0xff]   ;;  %v3488_v21 = vld [vmem:[%s3786_s29 + $0x24] ss:$8 sps:$4 sm:$0xff]   ;;  %v3490_v22 = vld [vmem:[%s3786_s29 + $0x20] ss:$8 sps:$4 sm:$0xff]  }
  0x14   : > { %v3491_v23 = vld [vmem:[%s3786_s29 + $0x34] ss:$8 sps:$4 sm:$0xff]   ;;  %v3493_v24 = vld [vmem:[%s3786_s29 + $0x30] ss:$8 sps:$4 sm:$0xff]   ;;  %v3494_v25 = vld [vmem:[%s3786_s29 + $0x44] ss:$8 sps:$4 sm:$0xff]  }
  0x15   : > { %3040 = vmatpush3.bf16.msra.mxu0 %v3473_v8  ;;  %v3496_v26 = vld [vmem:[%s3786_s29 + $0x40] ss:$8 sps:$4 sm:$0xff]   ;;  %v3497_v27 = vld [vmem:[%s3786_s29 + $0x54] ss:$8 sps:$4 sm:$0xff]   ;;  %v3499_v28 = vld [vmem:[%s3786_s29 + $0x50] ss:$8 sps:$4 sm:$0xff]  }
  0x16   : > { %3041 = vmatprep.subr.bf16.mxu0 %v3474_v9  ;;  %v3500_v29 = vld [vmem:[%s3786_s29 + $0x64] ss:$8 sps:$4 sm:$0xff]   ;;  %v3502_v30 = vld [vmem:[%s3786_s29 + $0x60] ss:$8 sps:$4 sm:$0xff]   ;;  %v3503_v31 = vld [vmem:[%s3786_s29 + $0x74] ss:$8 sps:$4 sm:$0xff]  }
  0x17   : > { %v3505_v32 = vld [vmem:[%s3786_s29 + $0x70] ss:$8 sps:$4 sm:$0xff]   ;;  %v3506_v33 = vld [vmem:[%s3786_s29 + $0x84] ss:$8 sps:$4 sm:$0xff]   ;;  %v3508_v34 = vld [vmem:[%s3786_s29 + $0x80] ss:$8 sps:$4 sm:$0xff]  }
  0x18   : > { %v3509_v35 = vld [vmem:[%s3786_s29 + $0x94] ss:$8 sps:$4 sm:$0xff]   ;;  %v3511_v36 = vld [vmem:[%s3786_s29 + $0x90] ss:$8 sps:$4 sm:$0xff]   ;;  %v3512_v37 = vld [vmem:[%s3786_s29 + $0xa4] ss:$8 sps:$4 sm:$0xff]  }
  0x19   : > { %3042 = vmatpush3.bf16.msra.mxu0 %v3475_v10  ;;  %v3514_v38 = vld [vmem:[%s3786_s29 + $0xa0] ss:$8 sps:$4 sm:$0xff]   ;;  %v3515_v39 = vld [vmem:[%s3786_s29 + $0xb4] ss:$8 sps:$4 sm:$0xff]   ;;  %v3517_v40 = vld [vmem:[%s3786_s29 + $0xb0] ss:$8 sps:$4 sm:$0xff]  }
  0x1a   : > { %3043 = vmatprep.subr.bf16.mxu0 %v3476_v11  ;;  %v3518_v41 = vld [vmem:[%s3786_s29 + $0xc4] ss:$8 sps:$4 sm:$0xff]   ;;  %v3520_v42 = vld [vmem:[%s3786_s29 + $0xc0] ss:$8 sps:$4 sm:$0xff]   ;;  %v3521_v43 = vld [vmem:[%s3786_s29 + $0xd4] ss:$8 sps:$4 sm:$0xff]  }
  0x1b   : > { %v3523_v44 = vld [vmem:[%s3786_s29 + $0xd0] ss:$8 sps:$4 sm:$0xff]   ;;  %v3524_v45 = vld [vmem:[%s3786_s29 + $0xe4] ss:$8 sps:$4 sm:$0xff]   ;;  %v3526_v46 = vld [vmem:[%s3786_s29 + $0xe0] ss:$8 sps:$4 sm:$0xff]  }
  0x1c   : > { %v3527_v47 = vld [vmem:[%s3786_s29 + $0xf4] ss:$8 sps:$4 sm:$0xff]   ;;  %v3529_v48 = vld [vmem:[%s3786_s29 + $0xf0] ss:$8 sps:$4 sm:$0xff]  }
  0x1d   : > { %3044 = vmatpush3.bf16.msra.mxu0 %v3477_v13 }
  0x1e   : > { %3045 = vmatprep.subr.bf16.mxu0 %v3478_v14 }
  0x21   : > { %3046 = vmatpush3.bf16.msra.mxu0 %v3479_v15 }
  0x22   : > { %3047 = vmatprep.subr.bf16.mxu0 %v3480_v16 }
  0x25   : > { %3048 = vmatpush3.bf16.msra.mxu0 %v3481_v17 }
  0x26   : > { %3372 = vmatprep.subr.bf16.mxu0 %v3671_v59 }
  0x28   : > { %783 = vmatmul.mubr.bf16.vlgmr.msra.gmra.mrb[0].mxu0 %v3482_v18 }
  0x29   : > { %790 = vmatprep.mubr.bf16.mxu0 %v3485_v19 }
  0x30   : > { %791 = vmatmul.mubr.bf16.gmra.mrb[4].mxu0 %v3487_v20 }
  0x31   : > { %798 = vmatprep.mubr.bf16.mxu0 %v3488_v21 }
  0x38   : > { %799 = vmatmul.mubr.bf16.gmra.mrb[8].mxu0 %v3490_v22 }
  0x39   : > { %806 = vmatprep.mubr.bf16.mxu0 %v3491_v23 }
  0x40   : > { %807 = vmatmul.mubr.bf16.gmra.mrb[12].mxu0 %v3493_v24 }
  0x41   : > { %814 = vmatprep.mubr.bf16.mxu0 %v3494_v25 }
  0x48   : > { %815 = vmatmul.mubr.bf16.gmra.mrb[16].mxu0 %v3496_v26 }
  0x49   : > { %822 = vmatprep.mubr.bf16.mxu0 %v3497_v27 }
  0x50   : > { %823 = vmatmul.mubr.bf16.gmra.mrb[20].mxu0 %v3499_v28 }
  0x51   : > { %830 = vmatprep.mubr.bf16.mxu0 %v3500_v29 }
  0x58   : > { %831 = vmatmul.mubr.bf16.gmra.mrb[24].mxu0 %v3502_v30 }
  0x59   : > { %838 = vmatprep.mubr.bf16.mxu0 %v3503_v31 }
  0x60   : > { %839 = vmatmul.mubr.bf16.gmra.mrb[28].mxu0 %v3505_v32 }
  0x61   : > { %846 = vmatprep.mubr.bf16.mxu0 %v3506_v33 }
  0x68   : > { %847 = vmatmul.mubr.bf16.gmra.mrb[32].mxu0 %v3508_v34 }
  0x69   : > { %854 = vmatprep.mubr.bf16.mxu0 %v3509_v35 }
  0x70   : > { %855 = vmatmul.mubr.bf16.gmra.mrb[36].mxu0 %v3511_v36 }
  0x71   : > { %862 = vmatprep.mubr.bf16.mxu0 %v3512_v37 }
  0x78   : > { %863 = vmatmul.mubr.bf16.gmra.mrb[40].mxu0 %v3514_v38  ;;  %v3878_v38 = vld [vmem:[%s5157_s2] ss:$0 sm:$0xff] }
  0x79   : > { %870 = vmatprep.mubr.bf16.mxu0 %v3515_v39 }
  0x80   : > { %871 = vmatmul.mubr.bf16.gmra.mrb[44].mxu0 %v3517_v40 }
  0x81   : > { %878 = vmatprep.mubr.bf16.mxu0 %v3518_v41 }
  0x88   : > { %879 = vmatmul.mubr.bf16.gmra.mrb[48].mxu0 %v3520_v42 }
  0x89   : > { %886 = vmatprep.mubr.bf16.mxu0 %v3521_v43 }
  0x90   : > { %887 = vmatmul.mubr.bf16.gmra.mrb[52].mxu0 %v3523_v44 }
  0x91   : > { %894 = vmatprep.mubr.bf16.mxu0 %v3524_v45 }
  0x98   : > { %895 = vmatmul.mubr.bf16.gmra.mrb[56].mxu0 %v3526_v46 }
  0x99   : > { %902 = vmatprep.mubr.bf16.mxu0 %v3527_v47 }
  0xa0   : > { %903 = vmatmul.mubr.bf16.gmra.mrb[60].mxu0 %v3529_v48 }
  0xfb   : > { %v3049_v49 = vpop.f32.mrb[0].mxu0 }
  0xfc   : > { %v3050_v50 = vpop.f32.mrb[1].mxu0 }
  0xfd   : > { %v3051_v51 = vadd.f32 %v3050_v50, %v3049_v49  ;;  %v3052_v52 = vpop.f32.mrb[2].mxu0 }
  0xfe   : > { %v3053_v53 = vpop.f32.mrb[3].mxu0 }
  0xff   : > { %v3054_v54 = vadd.f32 %v3053_v53, %v3052_v52  ;;  %v3887_v45 = vadd.f32 %v3051_v51, %v3878_v38 }
 0x101   : > { %v3881_v41 = vadd.f32 %v3054_v54, %v3878_v38  ;;  %v911_v52 = vmax.f32 %v3887_v45, 0.0 }
 0x103   : > { %v3055_v57 = vpop.f32.mrb[4].mxu0  ;;  %v912_v47 = vmax.f32 %v3881_v41, 0.0 }
 0x104   : > { %v3056_v58 = vpop.f32.mrb[5].mxu0 }
 0x105   : > { %v3849_v60 = vadd.f32 %v3056_v58, %v3055_v57  ;;  %v3058_v61 = vpop.f32.mrb[6].mxu0 }
 0x106   : > { %v3059_v62 = vpop.f32.mrb[7].mxu0 }
 0x107   : > { %v3060_v63 = vadd.f32 %v3059_v62, %v3058_v61  ;;  %v3288_v61 = vpack.c.bf16 %v912_v47, %v911_v52 }
 0x109   : > { %v3901_v57 = vadd.f32 %v3060_v63, %v3878_v38 }
 0x10b   : > { %v3061_v0 = vpop.f32.mrb[8].mxu0  ;;  %v914_v63 = vmax.f32 %v3901_v57, 0.0 }
 0x10c   : > { %v3062_v1 = vpop.f32.mrb[9].mxu0 }
 0x10d   : > { %v3851_v2 = vadd.f32 %v3062_v1, %v3061_v0  ;;  %v3064_v3 = vpop.f32.mrb[10].mxu0  ;;  %v3912_v1 = vadd.f32 %v3849_v60, %v3878_v38 }
 0x10e   : > { %v3065_v4 = vpop.f32.mrb[11].mxu0 }
 0x10f   : > { %v3853_v5 = vadd.f32 %v3065_v4, %v3064_v3 }
 0x113   : > { %v3067_v6 = vpop.f32.mrb[12].mxu0 }
 0x114   : > { %v3068_v7 = vpop.f32.mrb[13].mxu0 }
 0x115   : > { %v3855_v8 = vadd.f32 %v3068_v7, %v3067_v6  ;;  %v3070_v9 = vpop.f32.mrb[14].mxu0 }
 0x116   : > { %v3071_v10 = vpop.f32.mrb[15].mxu0 }
 0x117   : > { %v3857_v11 = vadd.f32 %v3071_v10, %v3070_v9  ;;  %v913_v9 = vmax.f32 %v3912_v1, 0.0 }
 0x11b   : > { %v3073_v12 = vpop.f32.mrb[16].mxu0 }
 0x11c   : > { %v3074_v13 = vpop.f32.mrb[17].mxu0 }
 0x11d   : > { %v3859_v14 = vadd.f32 %v3074_v13, %v3073_v12  ;;  %v3076_v15 = vpop.f32.mrb[18].mxu0 }
 0x11e   : > { %v3077_v16 = vpop.f32.mrb[19].mxu0 }
 0x11f   : > { %v3861_v17 = vadd.f32 %v3077_v16, %v3076_v15  ;;  %v3927_v15 = vadd.f32 %v3853_v5, %v3878_v38 }
 0x121   : > { %v916_v5 = vmax.f32 %v3927_v15, 0.0 }
 0x123   : > { %v3079_v18 = vpop.f32.mrb[20].mxu0 }
 0x124   : > { %v3080_v19 = vpop.f32.mrb[21].mxu0 }
 0x125   : > { %v3863_v20 = vadd.f32 %v3080_v19, %v3079_v18  ;;  %v3082_v21 = vpop.f32.mrb[22].mxu0  ;;  %v3292_v18 = vpack.c.bf16 %v914_v63, %v913_v9 }
 0x126   : > { %v3083_v22 = vpop.f32.mrb[23].mxu0 }
 0x127   : > { %v3865_v23 = vadd.f32 %v3083_v22, %v3082_v21  ;;  %v3938_v22 = vadd.f32 %v3851_v2, %v3878_v38 }
 0x12b   : > { %v3085_v24 = vpop.f32.mrb[24].mxu0 }
 0x12c   : > { %v3086_v25 = vpop.f32.mrb[25].mxu0 }
 0x12d   : > { %v3867_v26 = vadd.f32 %v3086_v25, %v3085_v24  ;;  %v3088_v27 = vpop.f32.mrb[26].mxu0 }
 0x12e   : > { %v3089_v28 = vpop.f32.mrb[27].mxu0 }
 0x12f   : > { %v3869_v29 = vadd.f32 %v3089_v28, %v3088_v27 }
 0x133   : > { %v3091_v30 = vpop.f32.mrb[28].mxu0 }
 0x134   : > { %v3092_v31 = vpop.f32.mrb[29].mxu0 }
 0x135   : > { %v3871_v32 = vadd.f32 %v3092_v31, %v3091_v30  ;;  %v3094_v33 = vpop.f32.mrb[30].mxu0  ;;  %v915_v30 = vmax.f32 %v3938_v22, 0.0 }
 0x136   : > { %v3095_v34 = vpop.f32.mrb[31].mxu0 }
 0x137   : > { %v3873_v35 = vadd.f32 %v3095_v34, %v3094_v33 }
 0x13b   : > { %v3097_v36 = vpop.f32.mrb[32].mxu0 }
 0x13c   : > { %v3098_v37 = vpop.f32.mrb[33].mxu0 }
 0x13d   : > { %v3099_v39 = vadd.f32 %v3098_v37, %v3097_v36  ;;  %v3100_v40 = vpop.f32.mrb[34].mxu0  ;;  %v3953_v36 = vadd.f32 %v3857_v11, %v3878_v38 }
 0x13e   : > { %v3101_v42 = vpop.f32.mrb[35].mxu0 }
 0x13f   : > { %v3102_v43 = vadd.f32 %v3101_v42, %v3100_v40  ;;  %v3884_v44 = vadd.f32 %v3099_v39, %v3878_v38  ;;  %v3296_v39 = vpack.c.bf16 %v916_v5, %v915_v30  ;;  %v918_v11 = vmax.f32 %v3953_v36, 0.0 }
 0x141   : > { %v3890_v46 = vadd.f32 %v3102_v43, %v3878_v38  ;;  %v927_v49 = vmax.f32 %v3884_v44, 0.0  ;;  %v3964_v43 = vadd.f32 %v3855_v8, %v3878_v38 }
 0x143   : > { %v3103_v48 = vpop.f32.mrb[36].mxu0  ;;  %v928_v50 = vmax.f32 %v3890_v46, 0.0 }
 0x144   : > { %v3104_v53 = vpop.f32.mrb[37].mxu0 }
 0x145   : > { %v3105_v54 = vadd.f32 %v3104_v53, %v3103_v48  ;;  %v3106_v56 = vpop.f32.mrb[38].mxu0  ;;  %v3286_v51 = vpack.c.bf16 %v928_v50, %v927_v49 }
 0x146   : > { %v3107_v58 = vpop.f32.mrb[39].mxu0 }
 0x147   : > { %v3908_v62 = vadd.f32 %v3105_v54, %v3878_v38  ;;  %v3108_v0 = vadd.f32 %v3107_v58, %v3106_v56  ;;  %3287 = vmatprep.subr.bf16.mxu1 %v3286_v51  ;;  %v917_v51 = vmax.f32 %v3964_v43, 0.0 }
 0x148   : > { %3289 = vmatpush3.bf16.msra.mxu1 %v3288_v61 }
 0x149   : > { %v3915_v3 = vadd.f32 %v3108_v0, %v3878_v38  ;;  %v929_v4 = vmax.f32 %v3908_v62, 0.0 }
 0x14b   : > { %v930_v6 = vmax.f32 %v3915_v3, 0.0  ;;  %v3109_v7 = vpop.f32.mrb[40].mxu0 }
 0x14c   : > { %v3110_v10 = vpop.f32.mrb[41].mxu0 }
 0x14d   : > { %v3111_v12 = vadd.f32 %v3110_v10, %v3109_v7  ;;  %v3112_v13 = vpop.f32.mrb[42].mxu0  ;;  %v3290_v60 = vpack.c.bf16 %v930_v6, %v929_v4  ;;  %v3979_v7 = vadd.f32 %v3861_v17, %v3878_v38 }
 0x14e   : > { %v3113_v16 = vpop.f32.mrb[43].mxu0 }
 0x14f   : > { %v3934_v19 = vadd.f32 %v3111_v12, %v3878_v38  ;;  %v3114_v21 = vadd.f32 %v3113_v16, %v3112_v13  ;;  %3291 = vmatprep.subr.bf16.mxu1 %v3290_v60  ;;  %v3300_v12 = vpack.c.bf16 %v918_v11, %v917_v51  ;;  %v3990_v16 = vadd.f32 %v3859_v14, %v3878_v38 }
 0x150   : > { %3293 = vmatpush3.bf16.msra.mxu1 %v3292_v18  ;;  %v920_v17 = vmax.f32 %v3979_v7, 0.0 }
 0x151   : > { %v3941_v24 = vadd.f32 %v3114_v21, %v3878_v38  ;;  %v5176_v25 = vmax.f32 %v3934_v19, 0.0  ;;  %v5181_v3 = vmax.f32 %v3934_v19, 0.0 }
 0x153   : > { %v5177_v27 = vmax.f32 %v3941_v24, 0.0  ;;  %v3115_v28 = vpop.f32.mrb[44].mxu0 }
 0x154   : > { %v3116_v31 = vpop.f32.mrb[45].mxu0 }
 0x155   : > { %v3117_v33 = vadd.f32 %v3116_v31, %v3115_v28  ;;  %v3118_v34 = vpop.f32.mrb[46].mxu0  ;;  %v3294_v2 = vpack.c.bf16 %v5177_v27, %v5176_v25 }
 0x156   : > { %v3119_v37 = vpop.f32.mrb[47].mxu0 }
 0x157   : > { %v3960_v40 = vadd.f32 %v3117_v33, %v3878_v38  ;;  %v3120_v42 = vadd.f32 %v3119_v37, %v3118_v34  ;;  %3295 = vmatprep.subr.bf16.mxu1 %v3294_v2  ;;  %v919_v33 = vmax.f32 %v3990_v16, 0.0 }
 0x158   : > { %3297 = vmatpush3.bf16.msra.mxu1 %v3296_v39  ;;  %v4005_v39 = vadd.f32 %v3865_v23, %v3878_v38 }
 0x159   : > { %v3967_v48 = vadd.f32 %v3120_v42, %v3878_v38  ;;  %v5172_v53 = vmax.f32 %v3960_v40, 0.0 }
 0x15a   : > { %v922_v23 = vmax.f32 %v4005_v39, 0.0 }
 0x15b   : > { %v5173_v54 = vmax.f32 %v3967_v48, 0.0  ;;  %v3121_v56 = vpop.f32.mrb[48].mxu0 }
 0x15c   : > { %v3122_v58 = vpop.f32.mrb[49].mxu0 }
 0x15d   : > { %v3123_v61 = vadd.f32 %v3122_v58, %v3121_v56  ;;  %v3124_v0 = vpop.f32.mrb[50].mxu0  ;;  %v3298_v8 = vpack.c.bf16 %v5173_v54, %v5172_v53  ;;  %v3304_v56 = vpack.c.bf16 %v920_v17, %v919_v33 }
 0x15e   : > { %v3125_v10 = vpop.f32.mrb[51].mxu0 }
 0x15f   : > { %v3986_v13 = vadd.f32 %v3123_v61, %v3878_v38  ;;  %v3126_v60 = vadd.f32 %v3125_v10, %v3124_v0  ;;  %3299 = vmatprep.subr.bf16.mxu1 %v3298_v8  ;;  %v4016_v0 = vadd.f32 %v3863_v20, %v3878_v38 }
 0x160   : > { %3301 = vmatpush3.bf16.msra.mxu1 %v3300_v12 }
 0x161   : > { %v3993_v18 = vadd.f32 %v3126_v60, %v3878_v38  ;;  %v5170_v21 = vmax.f32 %v3986_v13, 0.0 }
 0x163   : > { %v5171_v28 = vmax.f32 %v3993_v18, 0.0  ;;  %v3127_v31 = vpop.f32.mrb[52].mxu0 }
 0x164   : > { %v3128_v34 = vpop.f32.mrb[53].mxu0 }
 0x165   : > { %v3129_v2 = vadd.f32 %v3128_v34, %v3127_v31  ;;  %v3130_v37 = vpop.f32.mrb[54].mxu0  ;;  %v3302_v14 = vpack.c.bf16 %v5171_v28, %v5170_v21  ;;  %v921_v31 = vmax.f32 %v4016_v0, 0.0 }
 0x166   : > { %v3131_v42 = vpop.f32.mrb[55].mxu0 }
 0x167   : > { %v4012_v58 = vadd.f32 %v3129_v2, %v3878_v38  ;;  %v3132_v61 = vadd.f32 %v3131_v42, %v3130_v37  ;;  %3303 = vmatprep.subr.bf16.mxu1 %v3302_v14  ;;  %v4031_v14 = vadd.f32 %v3869_v29, %v3878_v38 }
 0x168   : > { %3305 = vmatpush3.bf16.msra.mxu1 %v3304_v56  ;;  %v3308_v56 = vpack.c.bf16 %v922_v23, %v921_v31 }
 0x169   : > { %v4019_v8 = vadd.f32 %v3132_v61, %v3878_v38  ;;  %v5168_v10 = vmax.f32 %v4012_v58, 0.0  ;;  %v924_v29 = vmax.f32 %v4031_v14, 0.0 }
 0x16b   : > { %v5169_v12 = vmax.f32 %v4019_v8, 0.0  ;;  %v3133_v60 = vpop.f32.mrb[56].mxu0 }
 0x16c   : > { %v3134_v34 = vpop.f32.mrb[57].mxu0 }
 0x16d   : > { %v3135_v2 = vadd.f32 %v3134_v34, %v3133_v60  ;;  %v3136_v37 = vpop.f32.mrb[58].mxu0  ;;  %v3306_v20 = vpack.c.bf16 %v5169_v12, %v5168_v10  ;;  %v4042_v34 = vadd.f32 %v3867_v26, %v3878_v38 }
 0x16e   : > { %v3137_v42 = vpop.f32.mrb[59].mxu0 }
 0x16f   : > { %v4038_v61 = vadd.f32 %v3135_v2, %v3878_v38  ;;  %v3138_v60 = vadd.f32 %v3137_v42, %v3136_v37  ;;  %3307 = vmatprep.subr.bf16.mxu1 %v3306_v20  ;;  %v923_v2 = vmax.f32 %v4042_v34, 0.0  ;;  %v4057_v42 = vadd.f32 %v3873_v35, %v3878_v38 }
 0x170   : > { %3309 = vmatpush3.bf16.msra.mxu1 %v3308_v56 }
 0x171   : > { %v4045_v10 = vadd.f32 %v3138_v60, %v3878_v38  ;;  %v5174_v12 = vmax.f32 %v4038_v61, 0.0  ;;  %v3312_v60 = vpack.c.bf16 %v924_v29, %v923_v2  ;;  %v926_v35 = vmax.f32 %v4057_v42, 0.0 }
 0x173   : > { %v5175_v21 = vmax.f32 %v4045_v10, 0.0  ;;  %v3139_v28 = vpop.f32.mrb[60].mxu0 }
 0x174   : > { %v3140_v53 = vpop.f32.mrb[61].mxu0 }
 0x175   : > { %v3141_v37 = vadd.f32 %v3140_v53, %v3139_v28  ;;  %v3142_v20 = vpop.f32.mrb[62].mxu0  ;;  %v3310_v26 = vpack.c.bf16 %v5175_v21, %v5174_v12  ;;  %v4068_v28 = vadd.f32 %v3871_v32, %v3878_v38  ;;  %v976_v32 = vld [vmem:[%s5160_s5] sm:$0xff] }
 0x176   : > { %v3143_v56 = vpop.f32.mrb[63].mxu0 }
 0x177   : > { %v4064_v54 = vadd.f32 %v3141_v37, %v3878_v38  ;;  %v3144_v53 = vadd.f32 %v3143_v56, %v3142_v20  ;;  %3311 = vmatprep.subr.bf16.mxu1 %v3310_v26  ;;  %v925_v27 = vmax.f32 %v4068_v28, 0.0  ;;  %v978_v56 = vld [vmem:[%s5160_s5 + $0x10] sm:$0xff] }
 0x178   : > { %3313 = vmatpush3.bf16.msra.mxu1 %v3312_v60  ;;  %v979_v60 = vld [vmem:[%s5160_s5 + $0x18] sm:$0xff] }
 0x179   : > { %v4071_v12 = vadd.f32 %v3144_v53, %v3878_v38  ;;  %v5178_v21 = vmax.f32 %v4064_v54, 0.0  ;;  %v977_v38 = vld [vmem:[%s5160_s5 + $0x8] sm:$0xff]  ;;  %v3316_v20 = vpack.c.bf16 %v926_v35, %v925_v27  ;;  %v3322_v53 = vpack.c.bf16 %v979_v60, %v978_v56 }
 0x17a   : > { %v3319_v26 = vpack.c.bf16 %v977_v38, %v976_v32 }
 0x17b   : > { %v5179_v25 = vmax.f32 %v4071_v12, 0.0 }
 0x17d   : > { %v3314_v37 = vpack.c.bf16 %v5179_v25, %v5178_v21 }
 0x17f   : > { %3315 = vmatprep.subr.bf16.mxu1 %v3314_v37  ;;  %v3673_v37 = vmov 0.0  }
 0x180   : > { %3317 = vmatpush3.bf16.msra.mxu1 %v3316_v20  ;;  %v981_v20 = vld [vmem:[%s5162_s7] sm:$0x3] }
 0x181   : > { %3318 = vmatprep.subr.bf16.mxu1 %v3671_v59 }
 0x183   : > { %1180 = vmatmul.mubr.f32.vlgmr.msra.gmra.mrb[0].mxu1 %v3844_v55 }
 0x184   : > { %3320 = vmatpush3.bf16.msra.mxu1 %v3319_v26  ;;  %3228 = vmatprep.mubr.msk.f32.mxu1 %vm3672_vm0, %v3673_v37  ;;  %v2958_v26 = vld [vmem:[%s5161_s6] ss:$0 sm:$0xff] }
 0x185   : > { %3321 = vmatprep.subr.bf16.mxu1 %v3671_v59 }
 0x188   : > { %3323 = vmatpush3.bf16.msra.mxu1 %v3322_v53 }
 0x189   : > { %3231 = vmatprep.subr.mxu1 %v3673_v37 }
 0x256   : > { %v3177_v32 = vpop.f32.mrb[0].mxu1 }
 0x257   : > { %v3178_v38 = vpop.f32.mrb[1].mxu1 }
 0x258   : > { %v3179_v55 = vadd.f32 %v3178_v38, %v3177_v32  ;;  %v2960_v32 = vld [vmem:[%s5163_s8] ss:$0 sm:$0xff] }
 0x25a   : > { %3229 = vmatmul.mubr.msk.f32.vlgmr.msra.gmra.mrb[2].mxu1 %vm1191_vm1, %v3179_v55 }
 0x25b   : > { %3233 = vmatprep.mubr.msk.f32.mxu1 %vm3672_vm0, %v3673_v37  ;;  %3232 = vmatpush3.msk.msra.mxu1 %vm1276_vm2, %v981_v20  ;;  %v944_v37 = vld [vmem:[%s5159_s4] sm:$0xff] }
 0x32d   : > { %v1261_v56 = vpop.f32.mrb[2].mxu1 }
 0x32e   : > { %v1262_v60 = vadd.f32 %v2958_v26, %v1261_v56  ;;  %v3230_v53 = vpop.f32.mrb[3].mxu1 }
 0x32f   : > { %v946_v53 = vld [vmem:[%s5159_s4 + $0x10] sm:$0xff] }
 0x330   : > { %v1265_v21 = vmax.f32 %v1262_v60, 0.0  ;;  %v945_v60 = vld [vmem:[%s5159_s4 + $0x8] sm:$0xff] }
 0x332   : > { %3234 = vmatmul.mubr.msk.f32.vlgmr.msra.gmra.mrb[4].mxu1 %vm1272_vm3, %v1265_v21 }
 0x333   : > { %3238 = vmatprep.mubr.msk.f32.mxu1 %vm1356_vm4, %v944_v37  ;;  %v948_v37 = vld [vmem:[%s5159_s4 + $0x20] sm:$0xff] }
 0x405   : > { %v1346_v38 = vpop.f32.mrb[4].mxu1 }
 0x406   : > { %v1347_v55 = vadd.f32 %v2960_v32, %v1346_v38  ;;  %v3235_v20 = vpop.f32.mrb[5].mxu1  ;;  %v949_v32 = vld [vmem:[%s5159_s4 + $0x28] sm:$0xff]  ;;  %v950_v38 = vld [vmem:[%s5159_s4 + $0x30] sm:$0xff] }
 0x407   : > { %v952_v20 = vld [vmem:[%s5159_s4 + $0x40] sm:$0xff] }
 0x408   : > { %v2963_v25 = vmul.f32 -1.442695, %v1347_v55  ;;  %v951_v55 = vld [vmem:[%s5159_s4 + $0x38] sm:$0xff] }
 0x40a   : > { %3531 = vpow2.f32 %v2963_v25  ;;  %v947_v25 = vld [vmem:[%s5159_s4 + $0x18] sm:$0xff] }
 0x414   : > { %v3532_v26 = vpop.eup %3531 }
 0x415   : > { %v1353_v56 = vadd.f32 1.0, %v3532_v26  ;;  %v953_v26 = vld [vmem:[%s5159_s4 + $0x48] sm:$0xff] }
 0x417   : > { %3533 = vrcp.f32 %v1353_v56  ;;  %v954_v56 = vld [vmem:[%s5159_s4 + $0x50] sm:$0xff] }
 0x421   : > { %v3534_v21 = vpop.eup %3533 }
 0x422   : > { %3236 = vmatprep.subr.msk.mxu1 %vm1453_vm5, %v3534_v21 }
 0x423   : > { %3237 = vmatpush3.msk.msra.mxu1 %vm1453_vm5, %v3534_v21  ;;  %v955_v21 = vld [vmem:[%s5159_s4 + $0x58] sm:$0xff] }
 0x424   : > { %3239 = vmatmul.mubr.msk.f32.vlgmr.msra.gmra.mrb[6].mxu1 %vm1356_vm4, %v945_v60  ;;  %3324 = vmatprep.subr.bf16.mxu1 %v3671_v59  ;;  %v956_v60 = vld [vmem:[%s5159_s4 + $0x60] sm:$0xff] }
 0x425   : > { %3241 = vmatprep.mubr.msk.f32.mxu1 %vm1356_vm4, %v946_v53  ;;  %v957_v53 = vld [vmem:[%s5159_s4 + $0x68] sm:$0xff] }
 0x428   : > { %3242 = vmatmul.mubr.msk.f32.gmra.mrb[8].mxu1 %vm1356_vm4, %v947_v25  ;;  %v958_v25 = vld [vmem:[%s5159_s4 + $0x70] sm:$0xff] }
 0x429   : > { %3244 = vmatprep.mubr.msk.f32.mxu1 %vm1356_vm4, %v948_v37  ;;  %v959_v37 = vld [vmem:[%s5159_s4 + $0x78] sm:$0xff] }
 0x42c   : > { %3245 = vmatmul.mubr.msk.f32.gmra.mrb[10].mxu1 %vm1356_vm4, %v949_v32  ;;  %v960_v32 = vld [vmem:[%s5159_s4 + $0x80] sm:$0xff] }
 0x42d   : > { %3247 = vmatprep.mubr.msk.f32.mxu1 %vm1356_vm4, %v950_v38  ;;  %v961_v38 = vld [vmem:[%s5159_s4 + $0x88] sm:$0xff] }
 0x430   : > { %3248 = vmatmul.mubr.msk.f32.gmra.mrb[12].mxu1 %vm1356_vm4, %v951_v55  ;;  %v962_v55 = vld [vmem:[%s5159_s4 + $0x90] sm:$0xff] }
 0x431   : > { %3250 = vmatprep.mubr.msk.f32.mxu1 %vm1356_vm4, %v952_v20  ;;  %v963_v20 = vld [vmem:[%s5159_s4 + $0x98] sm:$0xff] }
 0x434   : > { %3251 = vmatmul.mubr.msk.f32.gmra.mrb[14].mxu1 %vm1356_vm4, %v953_v26  ;;  %v964_v26 = vld [vmem:[%s5159_s4 + $0xa0] sm:$0xff] }
 0x435   : > { %3253 = vmatprep.mubr.msk.f32.mxu1 %vm1356_vm4, %v954_v56  ;;  %v965_v56 = vld [vmem:[%s5159_s4 + $0xa8] sm:$0xff] }
 0x438   : > { %3254 = vmatmul.mubr.msk.f32.gmra.mrb[16].mxu1 %vm1356_vm4, %v955_v21  ;;  %v966_v21 = vld [vmem:[%s5159_s4 + $0xb0] sm:$0xff] }
 0x439   : > { %3256 = vmatprep.mubr.msk.f32.mxu1 %vm1356_vm4, %v956_v60  ;;  %v967_v60 = vld [vmem:[%s5159_s4 + $0xb8] sm:$0xff] }
 0x43c   : > { %3257 = vmatmul.mubr.msk.f32.gmra.mrb[18].mxu1 %vm1356_vm4, %v957_v53  ;;  %v968_v53 = vld [vmem:[%s5159_s4 + $0xc0] sm:$0xff] }
 0x43d   : > { %3259 = vmatprep.mubr.msk.f32.mxu1 %vm1356_vm4, %v958_v25  ;;  %v969_v25 = vld [vmem:[%s5159_s4 + $0xc8] sm:$0xff] }
 0x440   : > { %3260 = vmatmul.mubr.msk.f32.gmra.mrb[20].mxu1 %vm1356_vm4, %v959_v37  ;;  %v970_v37 = vld [vmem:[%s5159_s4 + $0xd0] sm:$0xff] }
 0x441   : > { %3262 = vmatprep.mubr.msk.f32.mxu1 %vm1356_vm4, %v960_v32  ;;  %v971_v32 = vld [vmem:[%s5159_s4 + $0xd8] sm:$0xff] }
 0x444   : > { %3263 = vmatmul.mubr.msk.f32.gmra.mrb[22].mxu1 %vm1356_vm4, %v961_v38  ;;  %v972_v38 = vld [vmem:[%s5159_s4 + $0xe0] sm:$0xff] }
 0x445   : > { %3265 = vmatprep.mubr.msk.f32.mxu1 %vm1356_vm4, %v962_v55  ;;  %v973_v55 = vld [vmem:[%s5159_s4 + $0xe8] sm:$0xff] }
 0x448   : > { %3266 = vmatmul.mubr.msk.f32.gmra.mrb[24].mxu1 %vm1356_vm4, %v963_v20  ;;  %v974_v20 = vld [vmem:[%s5159_s4 + $0xf0] sm:$0xff] }
 0x449   : > { %3268 = vmatprep.mubr.msk.f32.mxu1 %vm1356_vm4, %v964_v26  ;;  %v975_v26 = vld [vmem:[%s5159_s4 + $0xf8] sm:$0xff] }
 0x44c   : > { %3269 = vmatmul.mubr.msk.f32.gmra.mrb[26].mxu1 %vm1356_vm4, %v965_v56 }
 0x44d   : > { %3271 = vmatprep.mubr.msk.f32.mxu1 %vm1356_vm4, %v966_v21 }
 0x450   : > { %3272 = vmatmul.mubr.msk.f32.gmra.mrb[28].mxu1 %vm1356_vm4, %v967_v60 }
 0x451   : > { %3274 = vmatprep.mubr.msk.f32.mxu1 %vm1356_vm4, %v968_v53 }
 0x454   : > { %3275 = vmatmul.mubr.msk.f32.gmra.mrb[30].mxu1 %vm1356_vm4, %v969_v25 }
 0x455   : > { %3277 = vmatprep.mubr.msk.f32.mxu1 %vm1356_vm4, %v970_v37 }
 0x458   : > { %3278 = vmatmul.mubr.msk.f32.gmra.mrb[32].mxu1 %vm1356_vm4, %v971_v32 }
 0x459   : > { %3280 = vmatprep.mubr.msk.f32.mxu1 %vm1356_vm4, %v972_v38 }
 0x45c   : > { %3281 = vmatmul.mubr.msk.f32.gmra.mrb[34].mxu1 %vm1356_vm4, %v973_v55 }
 0x45d   : > { %3283 = vmatprep.mubr.msk.f32.mxu1 %vm1356_vm4, %v974_v20 }
 0x460   : > { %3284 = vmatmul.mubr.msk.f32.gmra.mrb[36].mxu1 %vm1356_vm4, %v975_v26 }
 0x4f7   : > { %v3240_v56 = vpop.f32.mrb[6].mxu1 }
 0x4f8   : > { %v4241_v21 = vmul.f32 %v3240_v56, %v912_v47  ;;  %v1523_v60 = vpop.f32.mrb[7].mxu1 }
 0x4f9   : > { %v4245_v53 = vmul.f32 %v1523_v60, %v911_v52 }
 0x4fa   : > { %v1813_v25 = vsel %vm1191_vm1, %v4241_v21, 0.0  ;;  %v1717_v37 = vsel %vm1191_vm1, %v4241_v21, -inf }
 0x4fb   : > { %1814 = vadd.xlane.f32.xlu0 %v1813_v25  ;;  %1718 = vmax.xlane.f32.xlu1 %v1717_v37  ;;  %v3243_v32 = vpop.f32.mrb[8].mxu1  ;;  %v1810_v47 = vsel %vm1191_vm1, %v4245_v53, 0.0  ;;  %v1714_v57 = vsel %vm1191_vm1, %v4245_v53, -inf }
 0x4fc   : > { %v4253_v38 = vmul.f32 %v3243_v32, %v914_v63  ;;  %v1533_v41 = vpop.f32.mrb[9].mxu1 }
 0x4fd   : > { %v4261_v20 = vmul.f32 %v1533_v41, %v913_v9 }
 0x4fe   : > { %v1819_v45 = vsel %vm1191_vm1, %v4253_v38, 0.0  ;;  %v1723_v63 = vsel %vm1191_vm1, %v4253_v38, -inf }
 0x4ff   : > { %1811 = vadd.xlane.f32.xlu0 %v1810_v47  ;;  %1820 = vadd.xlane.f32.xlu1 %v1819_v45  ;;  %v3246_v52 = vpop.f32.mrb[10].mxu1  ;;  %v1816_v1 = vsel %vm1191_vm1, %v4261_v20, 0.0  ;;  %v1720_v9 = vsel %vm1191_vm1, %v4261_v20, -inf }
 0x500   : > { %v1543_v55 = vpop.f32.mrb[11].mxu1  ;;  %v4269_v60 = vmul.f32 %v3246_v52, %v916_v5 }
 0x501   : > { %v4273_v25 = vmul.f32 %v1543_v55, %v915_v30 }
 0x502   : > { %v1825_v41 = vsel %vm1191_vm1, %v4269_v60, 0.0  ;;  %v1729_v45 = vsel %vm1191_vm1, %v4269_v60, -inf }
 0x503   : > { %1715 = vmax.xlane.f32.xlu0 %v1714_v57  ;;  %1724 = vmax.xlane.f32.xlu1 %v1723_v63  ;;  %v3249_v26 = vpop.f32.mrb[12].mxu1  ;;  %v1822_v15 = vsel %vm1191_vm1, %v4273_v25, 0.0  ;;  %v1726_v52 = vsel %vm1191_vm1, %v4273_v25, -inf }
 0x504   : > { %v1553_v56 = vpop.f32.mrb[13].mxu1  ;;  %v4285_v30 = vmul.f32 %v3249_v26, %v918_v11 }
 0x505   : > { %v4289_v47 = vmul.f32 %v1553_v56, %v917_v51 }
 0x506   : > { %v1831_v43 = vsel %vm1191_vm1, %v4285_v30, 0.0 }
 0x507   : > { %1817 = vadd.xlane.f32.xlu1 %v1816_v1  ;;  %1721 = vmax.xlane.f32.xlu0 %v1720_v9  ;;  %v3252_v37 = vpop.f32.mrb[14].mxu1  ;;  %v1828_v11 = vsel %vm1191_vm1, %v4289_v47, 0.0 }
 0x508   : > { %v1563_v32 = vpop.f32.mrb[15].mxu1  ;;  %v4297_v63 = vmul.f32 %v3252_v37, %v920_v17 }
 0x509   : > { %v4301_v36 = vmul.f32 %v1563_v32, %v919_v33 }
 0x50a   : > { %v1837_v16 = vsel %vm1191_vm1, %v4297_v63, 0.0 }
 0x50b   : > { %1826 = vadd.xlane.f32.xlu1 %v1825_v41  ;;  %1823 = vadd.xlane.f32.xlu0 %v1822_v15  ;;  %v3255_v22 = vpop.f32.mrb[16].mxu1  ;;  %v1834_v17 = vsel %vm1191_vm1, %v4301_v36, 0.0 }
 0x50c   : > { %v1573_v5 = vpop.f32.mrb[17].mxu1  ;;  %v4309_v56 = vmul.f32 %v3255_v22, %v922_v23 }
 0x50d   : > { %v4313_v7 = vmul.f32 %v1573_v5, %v921_v31 }
 0x50e   : > { %v1843_v0 = vsel %vm1191_vm1, %v4309_v56, 0.0 }
 0x50f   : > { %1730 = vmax.xlane.f32.xlu1 %v1729_v45  ;;  %1727 = vmax.xlane.f32.xlu0 %v1726_v52  ;;  %v3258_v55 = vpop.f32.mrb[18].mxu1  ;;  %v1840_v23 = vsel %vm1191_vm1, %v4313_v7, 0.0  ;;  %v5180_v52 = vmax.f32 %v3941_v24, 0.0  ;;  %v5183_v24 = vmax.f32 %v3960_v40, 0.0 }
 0x510   : > { %v1583_v57 = vpop.f32.mrb[19].mxu1  ;;  %v4321_v9 = vmul.f32 %v3258_v55, %v924_v29 }
 0x511   : > { %v4325_v39 = vmul.f32 %v1583_v57, %v923_v2 }
 0x512   : > { %v1849_v34 = vsel %vm1191_vm1, %v4321_v9, 0.0 }
 0x513   : > { %1832 = vadd.xlane.f32.xlu1 %v1831_v43  ;;  %1829 = vadd.xlane.f32.xlu0 %v1828_v11  ;;  %v3261_v51 = vpop.f32.mrb[20].mxu1  ;;  %v1846_v29 = vsel %vm1191_vm1, %v4325_v39, 0.0  ;;  %v5182_v11 = vmax.f32 %v3967_v48, 0.0  ;;  %v5185_v48 = vmax.f32 %v3986_v13, 0.0 }
 0x514   : > { %v1593_v26 = vpop.f32.mrb[21].mxu1  ;;  %v4333_v32 = vmul.f32 %v3261_v51, %v926_v35 }
 0x515   : > { %v4337_v14 = vmul.f32 %v1593_v26, %v925_v27 }
 0x516   : > { %v1855_v27 = vsel %vm1191_vm1, %v4333_v32, 0.0 }
 0x517   : > { %1838 = vadd.xlane.f32.xlu1 %v1837_v16  ;;  %1835 = vadd.xlane.f32.xlu0 %v1834_v17  ;;  %v3264_v33 = vpop.f32.mrb[22].mxu1  ;;  %v1852_v28 = vsel %vm1191_vm1, %v4337_v14, 0.0 }
 0x518   : > { %v1603_v1 = vpop.f32.mrb[23].mxu1  ;;  %v4345_v15 = vmul.f32 %v3264_v33, %v928_v50 }
 0x519   : > { %v4349_v42 = vmul.f32 %v1603_v1, %v927_v49  ;;  %v5184_v1 = vmax.f32 %v3993_v18, 0.0  ;;  %v5187_v18 = vmax.f32 %v4012_v58, 0.0 }
 0x51a   : > { %v1861_v44 = vsel %vm1191_vm1, %v4345_v15, 0.0 }
 0x51b   : > { %1844 = vadd.xlane.f32.xlu1 %v1843_v0  ;;  %1841 = vadd.xlane.f32.xlu0 %v1840_v23  ;;  %v3267_v31 = vpop.f32.mrb[24].mxu1  ;;  %v1858_v49 = vsel %vm1191_vm1, %v4349_v42, 0.0 }
 0x51c   : > { %v1613_v37 = vpop.f32.mrb[25].mxu1  ;;  %v4357_v5 = vmul.f32 %v3267_v31, %v930_v6 }
 0x51d   : > { %v4361_v46 = vmul.f32 %v1613_v37, %v929_v4 }
 0x51e   : > { %v1867_v62 = vsel %vm1191_vm1, %v4357_v5, 0.0 }
 0x51f   : > { %1850 = vadd.xlane.f32.xlu1 %v1849_v34  ;;  %1847 = vadd.xlane.f32.xlu0 %v1846_v29  ;;  %v3270_v2 = vpop.f32.mrb[26].mxu1  ;;  %v1864_v4 = vsel %vm1191_vm1, %v4361_v46, 0.0  ;;  %v5186_v29 = vmax.f32 %v4019_v8, 0.0  ;;  %v5189_v8 = vmax.f32 %v4038_v61, 0.0 }
 0x520   : > { %v1623_v41 = vpop.f32.mrb[27].mxu1  ;;  %v4369_v55 = vmul.f32 %v3270_v2, %v5180_v52 }
 0x521   : > { %v4373_v6 = vmul.f32 %v1623_v41, %v5181_v3 }
 0x522   : > { %v1873_v19 = vsel %vm1191_vm1, %v4369_v55, 0.0 }
 0x523   : > { %1856 = vadd.xlane.f32.xlu1 %v1855_v27  ;;  %1853 = vadd.xlane.f32.xlu0 %v1852_v28  ;;  %v3273_v35 = vpop.f32.mrb[28].mxu1  ;;  %v1870_v16 = vsel %vm1191_vm1, %v4373_v6, 0.0  ;;  %v5188_v28 = vmax.f32 %v4045_v10, 0.0  ;;  %v5191_v10 = vmax.f32 %v4064_v54, 0.0  ;;  %v1735_v54 = vsel %vm1191_vm1, %v4285_v30, -inf }
 0x524   : > { %v1633_v22 = vpop.f32.mrb[29].mxu1  ;;  %v4381_v51 = vmul.f32 %v3273_v35, %v5182_v11  ;;  %v1744_v11 = vsel %vm1191_vm1, %v4313_v7, -inf }
 0x525   : > { %v4385_v26 = vmul.f32 %v1633_v22, %v5183_v24  ;;  %v1753_v24 = vsel %vm1191_vm1, %v4321_v9, -inf }
 0x526   : > { %v1879_v40 = vsel %vm1191_vm1, %v4381_v51, 0.0 }
 0x527   : > { %1862 = vadd.xlane.f32.xlu1 %v1861_v44  ;;  %1859 = vadd.xlane.f32.xlu0 %v1858_v49  ;;  %v3276_v50 = vpop.f32.mrb[30].mxu1  ;;  %v1876_v31 = vsel %vm1191_vm1, %v4385_v26, 0.0  ;;  %v5190_v49 = vmax.f32 %v4071_v12, 0.0 }
 0x528   : > { %v1643_v45 = vpop.f32.mrb[31].mxu1  ;;  %v4393_v0 = vmul.f32 %v3276_v50, %v5184_v1  ;;  %v1765_v1 = vsel %vm1191_vm1, %v4345_v15, -inf }
 0x529   : > { %v4397_v23 = vmul.f32 %v1643_v45, %v5185_v48  ;;  %v1762_v48 = vsel %vm1191_vm1, %v4349_v42, -inf }
 0x52a   : > { %v1885_v13 = vsel %vm1191_vm1, %v4393_v0, 0.0 }
 0x52b   : > { %1868 = vadd.xlane.f32.xlu1 %v1867_v62  ;;  %1865 = vadd.xlane.f32.xlu0 %v1864_v4  ;;  %v3279_v57 = vpop.f32.mrb[32].mxu1  ;;  %v1882_v27 = vsel %vm1191_vm1, %v4397_v23, 0.0  ;;  %v1732_v62 = vsel %vm1191_vm1, %v4289_v47, -inf  ;;  %v1741_v4 = vsel %vm1191_vm1, %v4297_v63, -inf }
 0x52c   : > { %v1653_v43 = vpop.f32.mrb[33].mxu1  ;;  %v4405_v2 = vmul.f32 %v3279_v57, %v5186_v29  ;;  %v1738_v57 = vsel %vm1191_vm1, %v4301_v36, -inf  ;;  %v1783_v29 = vsel %vm1191_vm1, %v4381_v51, -inf }
 0x52d   : > { %v4409_v41 = vmul.f32 %v1653_v43, %v5187_v18  ;;  %v1747_v43 = vsel %vm1191_vm1, %v4309_v56, -inf  ;;  %v1780_v18 = vsel %vm1191_vm1, %v4385_v26, -inf }
 0x52e   : > { %v1891_v58 = vsel %vm1191_vm1, %v4405_v2, 0.0 }
 0x52f   : > { %1874 = vadd.xlane.f32.xlu1 %v1873_v19  ;;  %1871 = vadd.xlane.f32.xlu0 %v1870_v16  ;;  %v3282_v17 = vpop.f32.mrb[34].mxu1  ;;  %v1888_v44 = vsel %vm1191_vm1, %v4409_v41, 0.0  ;;  %v1750_v19 = vsel %vm1191_vm1, %v4325_v39, -inf  ;;  %v1759_v16 = vsel %vm1191_vm1, %v4333_v32, -inf }
 0x530   : > { %v1663_v33 = vpop.f32.mrb[35].mxu1  ;;  %v4417_v35 = vmul.f32 %v3282_v17, %v5188_v28  ;;  %v1756_v17 = vsel %vm1191_vm1, %v4337_v14, -inf  ;;  %v1795_v28 = vsel %vm1191_vm1, %v4405_v2, -inf }
 0x531   : > { %v4421_v22 = vmul.f32 %v1663_v33, %v5189_v8  ;;  %v1048_v33 = vld [vmem:[%s5165_s10 + $0x8] sm:$0xff]  ;;  %v1792_v8 = vsel %vm1191_vm1, %v4409_v41, -inf }
 0x532   : > { %v1897_v61 = vsel %vm1191_vm1, %v4417_v35, 0.0  ;;  %2003 = vmatprep.mubr.f32.mxu1 %v1048_v33 }
 0x533   : > { %1880 = vadd.xlane.f32.xlu1 %v1879_v40  ;;  %1877 = vadd.xlane.f32.xlu0 %v1876_v31  ;;  %v3285_v37 = vpop.f32.mrb[36].mxu1  ;;  %v1894_v52 = vsel %vm1191_vm1, %v4421_v22, 0.0  ;;  %v1771_v40 = vsel %vm1191_vm1, %v4357_v5, -inf  ;;  %v1768_v31 = vsel %vm1191_vm1, %v4361_v46, -inf }
 0x534   : > { %v1673_v34 = vpop.f32.mrb[37].mxu1  ;;  %v4429_v50 = vmul.f32 %v3285_v37, %v5190_v49  ;;  %v1777_v37 = vsel %vm1191_vm1, %v4369_v55, -inf }
 0x535   : > { %v4433_v45 = vmul.f32 %v1673_v34, %v5191_v10  ;;  %v1774_v34 = vsel %vm1191_vm1, %v4373_v6, -inf }
 0x536   : > { %v1903_v3 = vsel %vm1191_vm1, %v4429_v50, 0.0  ;;  %v1807_v49 = vsel %vm1191_vm1, %v4429_v50, -inf }
 0x537   : > { %1886 = vadd.xlane.f32.xlu1 %v1885_v13  ;;  %1883 = vadd.xlane.f32.xlu0 %v1882_v27  ;;  %v1900_v12 = vsel %vm1191_vm1, %v4433_v45, 0.0  ;;  %v1789_v13 = vsel %vm1191_vm1, %v4393_v0, -inf  ;;  %v1786_v27 = vsel %vm1191_vm1, %v4397_v23, -inf  ;;  %v1804_v10 = vsel %vm1191_vm1, %v4433_v45, -inf }
 0x53b   : > { %1892 = vadd.xlane.f32.xlu1 %v1891_v58  ;;  %1889 = vadd.xlane.f32.xlu0 %v1888_v44  ;;  %v1801_v58 = vsel %vm1191_vm1, %v4417_v35, -inf  ;;  %v1798_v44 = vsel %vm1191_vm1, %v4421_v22, -inf }
 0x53f   : > { %1898 = vadd.xlane.f32.xlu1 %v1897_v61  ;;  %1895 = vadd.xlane.f32.xlu0 %v1894_v52 }
 0x543   : > { %1904 = vadd.xlane.f32.xlu1 %v1903_v3  ;;  %1901 = vadd.xlane.f32.xlu0 %v1900_v12  ;;  %v984_v3 = vld [vmem:[%s5164_s9 + $0x8] sm:$0xff] }
 0x544   : > { %2228 = vmatprep.mubr.f32.mxu0 %v984_v3 }
 0x547   : > { %1736 = vmax.xlane.f32.xlu1 %v1735_v54  ;;  %1733 = vmax.xlane.f32.xlu0 %v1732_v62 }
 0x54b   : > { %1742 = vmax.xlane.f32.xlu1 %v1741_v4  ;;  %1739 = vmax.xlane.f32.xlu0 %v1738_v57 }
 0x54f   : > { %1748 = vmax.xlane.f32.xlu1 %v1747_v43  ;;  %1745 = vmax.xlane.f32.xlu0 %v1744_v11 }
 0x553   : > { %1754 = vmax.xlane.f32.xlu1 %v1753_v24  ;;  %1751 = vmax.xlane.f32.xlu0 %v1750_v19 }
 0x557   : > { %1760 = vmax.xlane.f32.xlu1 %v1759_v16  ;;  %1757 = vmax.xlane.f32.xlu0 %v1756_v17 }
 0x55b   : > { %1766 = vmax.xlane.f32.xlu1 %v1765_v1  ;;  %1763 = vmax.xlane.f32.xlu0 %v1762_v48 }
 0x55f   : > { %1772 = vmax.xlane.f32.xlu1 %v1771_v40  ;;  %1769 = vmax.xlane.f32.xlu0 %v1768_v31 }
 0x563   : > { %1778 = vmax.xlane.f32.xlu1 %v1777_v37  ;;  %1775 = vmax.xlane.f32.xlu0 %v1774_v34 }
 0x567   : > { %1784 = vmax.xlane.f32.xlu1 %v1783_v29  ;;  %1781 = vmax.xlane.f32.xlu0 %v1780_v18 }
 0x56b   : > { %1790 = vmax.xlane.f32.xlu1 %v1789_v13  ;;  %1787 = vmax.xlane.f32.xlu0 %v1786_v27 }
 0x56f   : > { %1796 = vmax.xlane.f32.xlu1 %v1795_v28  ;;  %1793 = vmax.xlane.f32.xlu0 %v1792_v8 }
 0x573   : > { %1802 = vmax.xlane.f32.xlu1 %v1801_v58  ;;  %1799 = vmax.xlane.f32.xlu0 %v1798_v44 }
 0x577   : > { %1808 = vmax.xlane.f32.xlu1 %v1807_v49  ;;  %1805 = vmax.xlane.f32.xlu0 %v1804_v10 }
 0x588   : > { %v1815_v61 = vpop.xlane.xlu0 %1814  ;;  %v1719_v52 = vpop.xlane.xlu1 %1718 }
 0x589   : > { %v1908_v62 = vmul.f32 0.03125, %v1815_v61 }
 0x58c   : > { %v1812_v12 = vpop.xlane.xlu0 %1811  ;;  %v1821_v54 = vpop.xlane.xlu1 %1820 }
 0x58d   : > { %v1907_v4 = vmul.f32 0.03125, %v1812_v12  ;;  %v1910_v17 = vmul.f32 0.03125, %v1821_v54 }
 0x58f   : > { %v3325_v57 = vpack.c.bf16 %v1908_v62, %v1907_v4 }
 0x590   : > { %v1716_v43 = vpop.xlane.xlu0 %1715  ;;  %v1725_v11 = vpop.xlane.xlu1 %1724 }
 0x591   : > { %v4501_v24 = vpack.c.bf16 %v1719_v52, %v1716_v43  ;;  %3326 = vmatpush1.bf16.msra.mxu1 %v3325_v57 }
 0x592   : > { %3327 = vmatprep.subr.bf16.mxu1 %v3671_v59 }
 0x593   : > { %3374 = vmatpush1.bf16.msra.mxu0 %v4501_v24 }
 0x594   : > { %v1818_v19 = vpop.xlane.xlu1 %1817  ;;  %v1722_v16 = vpop.xlane.xlu0 %1721  ;;  %3375 = vmatprep.subr.bf16.mxu0 %v3671_v59 }
 0x595   : > { %v1909_v33 = vmul.f32 0.03125, %v1818_v19  ;;  %v4506_v1 = vpack.c.bf16 %v1725_v11, %v1722_v16 }
 0x597   : > { %v3328_v48 = vpack.c.bf16 %v1910_v17, %v1909_v33  ;;  %3377 = vmatpush1.bf16.msra.mxu0 %v4506_v1 }
 0x598   : > { %v1827_v40 = vpop.xlane.xlu1 %1826  ;;  %v1824_v31 = vpop.xlane.xlu0 %1823  ;;  %3378 = vmatprep.subr.bf16.mxu0 %v3671_v59 }
 0x599   : > { %v1912_v37 = vmul.f32 0.03125, %v1827_v40  ;;  %v1911_v34 = vmul.f32 0.03125, %v1824_v31  ;;  %3329 = vmatpush1.bf16.msra.mxu1 %v3328_v48 }
 0x59a   : > { %3330 = vmatprep.subr.bf16.mxu1 %v3671_v59 }
 0x59b   : > { %v3331_v29 = vpack.c.bf16 %v1912_v37, %v1911_v34 }
 0x59c   : > { %v1731_v18 = vpop.xlane.xlu1 %1730  ;;  %v1728_v13 = vpop.xlane.xlu0 %1727 }
 0x59d   : > { %v4511_v27 = vpack.c.bf16 %v1731_v18, %v1728_v13  ;;  %3332 = vmatpush1.bf16.msra.mxu1 %v3331_v29 }
 0x59e   : > { %3333 = vmatprep.subr.bf16.mxu1 %v3671_v59 }
 0x59f   : > { %3380 = vmatpush1.bf16.msra.mxu0 %v4511_v27 }
 0x5a0   : > { %v1833_v28 = vpop.xlane.xlu1 %1832  ;;  %v1830_v8 = vpop.xlane.xlu0 %1829  ;;  %3381 = vmatprep.subr.bf16.mxu0 %v3671_v59 }
 0x5a1   : > { %v1914_v58 = vmul.f32 0.03125, %v1833_v28  ;;  %v1913_v44 = vmul.f32 0.03125, %v1830_v8 }
 0x5a3   : > { %v3334_v49 = vpack.c.bf16 %v1914_v58, %v1913_v44 }
 0x5a4   : > { %v1839_v10 = vpop.xlane.xlu1 %1838  ;;  %v1836_v61 = vpop.xlane.xlu0 %1835 }
 0x5a5   : > { %v1916_v52 = vmul.f32 0.03125, %v1839_v10  ;;  %v1915_v3 = vmul.f32 0.03125, %v1836_v61  ;;  %3335 = vmatpush1.bf16.msra.mxu1 %v3334_v49 }
 0x5a6   : > { %3336 = vmatprep.subr.bf16.mxu1 %v3671_v59 }
 0x5a7   : > { %v3337_v12 = vpack.c.bf16 %v1916_v52, %v1915_v3 }
 0x5a8   : > { %v1845_v54 = vpop.xlane.xlu1 %1844  ;;  %v1842_v62 = vpop.xlane.xlu0 %1841 }
 0x5a9   : > { %v1918_v4 = vmul.f32 0.03125, %v1845_v54  ;;  %v1917_v57 = vmul.f32 0.03125, %v1842_v62  ;;  %3338 = vmatpush1.bf16.msra.mxu1 %v3337_v12 }
 0x5aa   : > { %3339 = vmatprep.subr.bf16.mxu1 %v3671_v59 }
 0x5ab   : > { %v3340_v43 = vpack.c.bf16 %v1918_v4, %v1917_v57 }
 0x5ac   : > { %v1851_v11 = vpop.xlane.xlu1 %1850  ;;  %v1848_v19 = vpop.xlane.xlu0 %1847 }
 0x5ad   : > { %v1920_v16 = vmul.f32 0.03125, %v1851_v11  ;;  %v1919_v17 = vmul.f32 0.03125, %v1848_v19  ;;  %3341 = vmatpush1.bf16.msra.mxu1 %v3340_v43 }
 0x5ae   : > { %3342 = vmatprep.subr.bf16.mxu1 %v3671_v59 }
 0x5af   : > { %v3343_v33 = vpack.c.bf16 %v1920_v16, %v1919_v17 }
 0x5b0   : > { %v1857_v48 = vpop.xlane.xlu1 %1856  ;;  %v1854_v40 = vpop.xlane.xlu0 %1853 }
 0x5b1   : > { %v1922_v31 = vmul.f32 0.03125, %v1857_v48  ;;  %v1921_v37 = vmul.f32 0.03125, %v1854_v40  ;;  %3344 = vmatpush1.bf16.msra.mxu1 %v3343_v33 }
 0x5b2   : > { %3345 = vmatprep.subr.bf16.mxu1 %v3671_v59 }
 0x5b3   : > { %v3346_v34 = vpack.c.bf16 %v1922_v31, %v1921_v37 }
 0x5b4   : > { %v1863_v29 = vpop.xlane.xlu1 %1862  ;;  %v1860_v18 = vpop.xlane.xlu0 %1859 }
 0x5b5   : > { %v1924_v13 = vmul.f32 0.03125, %v1863_v29  ;;  %v1923_v28 = vmul.f32 0.03125, %v1860_v18  ;;  %3347 = vmatpush1.bf16.msra.mxu1 %v3346_v34 }
 0x5b6   : > { %3348 = vmatprep.subr.bf16.mxu1 %v3671_v59 }
 0x5b7   : > { %v3349_v8 = vpack.c.bf16 %v1924_v13, %v1923_v28 }
 0x5b8   : > { %v1869_v58 = vpop.xlane.xlu1 %1868  ;;  %v1866_v44 = vpop.xlane.xlu0 %1865 }
 0x5b9   : > { %v1926_v49 = vmul.f32 0.03125, %v1869_v58  ;;  %v1925_v10 = vmul.f32 0.03125, %v1866_v44  ;;  %3350 = vmatpush1.bf16.msra.mxu1 %v3349_v8 }
 0x5ba   : > { %3351 = vmatprep.subr.bf16.mxu1 %v3671_v59 }
 0x5bb   : > { %v3352_v61 = vpack.c.bf16 %v1926_v49, %v1925_v10 }
 0x5bc   : > { %v1875_v52 = vpop.xlane.xlu1 %1874  ;;  %v1872_v3 = vpop.xlane.xlu0 %1871 }
 0x5bd   : > { %v1928_v12 = vmul.f32 0.03125, %v1875_v52  ;;  %v1927_v54 = vmul.f32 0.03125, %v1872_v3  ;;  %3353 = vmatpush1.bf16.msra.mxu1 %v3352_v61 }
 0x5be   : > { %3354 = vmatprep.subr.bf16.mxu1 %v3671_v59 }
 0x5bf   : > { %v3355_v62 = vpack.c.bf16 %v1928_v12, %v1927_v54 }
 0x5c0   : > { %v1881_v4 = vpop.xlane.xlu1 %1880  ;;  %v1878_v57 = vpop.xlane.xlu0 %1877 }
 0x5c1   : > { %v1930_v43 = vmul.f32 0.03125, %v1881_v4  ;;  %v1929_v11 = vmul.f32 0.03125, %v1878_v57  ;;  %3356 = vmatpush1.bf16.msra.mxu1 %v3355_v62  ;;  %v1047_v4 = vld [vmem:[%s5165_s10] sm:$0xff]  ;;  %v1050_v57 = vld [vmem:[%s5165_s10 + $0x18] sm:$0xff] }
 0x5c2   : > { %3357 = vmatprep.subr.bf16.mxu1 %v3671_v59 }
 0x5c3   : > { %v3358_v19 = vpack.c.bf16 %v1930_v43, %v1929_v11 }
 0x5c4   : > { %v1887_v16 = vpop.xlane.xlu1 %1886  ;;  %v1884_v17 = vpop.xlane.xlu0 %1883 }
 0x5c5   : > { %v1932_v33 = vmul.f32 0.03125, %v1887_v16  ;;  %v1931_v48 = vmul.f32 0.03125, %v1884_v17  ;;  %3359 = vmatpush1.bf16.msra.mxu1 %v3358_v19  ;;  %v1049_v16 = vld [vmem:[%s5165_s10 + $0x10] sm:$0xff]  ;;  %v1052_v17 = vld [vmem:[%s5165_s10 + $0x28] sm:$0xff] }
 0x5c6   : > { %3360 = vmatprep.subr.bf16.mxu1 %v3671_v59 }
 0x5c7   : > { %v3361_v40 = vpack.c.bf16 %v1932_v33, %v1931_v48 }
 0x5c8   : > { %v1893_v31 = vpop.xlane.xlu1 %1892  ;;  %v1890_v37 = vpop.xlane.xlu0 %1889 }
 0x5c9   : > { %v1934_v34 = vmul.f32 0.03125, %v1893_v31  ;;  %v1933_v29 = vmul.f32 0.03125, %v1890_v37  ;;  %3362 = vmatpush1.bf16.msra.mxu1 %v3361_v40  ;;  %v1054_v31 = vld [vmem:[%s5165_s10 + $0x38] sm:$0xff] }
 0x5ca   : > { %3363 = vmatprep.subr.bf16.mxu1 %v3671_v59 }
 0x5cb   : > { %v3364_v18 = vpack.c.bf16 %v1934_v34, %v1933_v29 }
 0x5cc   : > { %v1899_v13 = vpop.xlane.xlu1 %1898  ;;  %v1896_v28 = vpop.xlane.xlu0 %1895 }
 0x5cd   : > { %v1936_v8 = vmul.f32 0.03125, %v1899_v13  ;;  %v1935_v58 = vmul.f32 0.03125, %v1896_v28  ;;  %3365 = vmatpush1.bf16.msra.mxu1 %v3364_v18  ;;  %v1056_v18 = vld [vmem:[%s5165_s10 + $0x48] sm:$0xff] }
 0x5ce   : > { %3366 = vmatprep.subr.bf16.mxu1 %v3671_v59 }
 0x5cf   : > { %v3367_v44 = vpack.c.bf16 %v1936_v8, %v1935_v58  ;;  %v1058_v58 = vld [vmem:[%s5165_s10 + $0x58] sm:$0xff] }
 0x5d0   : > { %v1905_v49 = vpop.xlane.xlu1 %1904  ;;  %v1902_v10 = vpop.xlane.xlu0 %1901 }
 0x5d1   : > { %v1938_v61 = vmul.f32 0.03125, %v1905_v49  ;;  %v1937_v52 = vmul.f32 0.03125, %v1902_v10  ;;  %3368 = vmatpush1.bf16.msra.mxu1 %v3367_v44 }
 0x5d2   : > { %3369 = vmatprep.subr.bf16.mxu1 %v3671_v59 }
 0x5d3   : > { %v3370_v3 = vpack.c.bf16 %v1938_v61, %v1937_v52  ;;  %v1057_v61 = vld [vmem:[%s5165_s10 + $0x50] sm:$0xff]  ;;  %v1060_v52 = vld [vmem:[%s5165_s10 + $0x68] sm:$0xff] }
 0x5d4   : > { %v1737_v12 = vpop.xlane.xlu1 %1736  ;;  %v1734_v54 = vpop.xlane.xlu0 %1733 }
 0x5d5   : > { %v3382_v62 = vpack.c.bf16 %v1737_v12, %v1734_v54  ;;  %3371 = vmatpush1.bf16.msra.mxu1 %v3370_v3 }
 0x5d6   : > { %3420 = vmatprep.subr.bf16.mxu1 %v3671_v59 }
 0x5d7   : > { %3383 = vmatpush1.bf16.msra.mxu0 %v3382_v62 }
 0x5d8   : > { %v1743_v43 = vpop.xlane.xlu1 %1742  ;;  %v1740_v11 = vpop.xlane.xlu0 %1739  ;;  %2004 = vmatmul.mubr.f32.vlgmr.msra.gmra.mrb[38].mxu1 %v1047_v4  ;;  %3384 = vmatprep.subr.bf16.mxu0 %v3671_v59  ;;  %v1062_v4 = vld [vmem:[%s5165_s10 + $0x78] sm:$0xff] }
 0x5d9   : > { %v3385_v19 = vpack.c.bf16 %v1743_v43, %v1740_v11  ;;  %3436 = vmatpush1.bf16.msra.mxu1 %v4501_v24  ;;  %2008 = vmatprep.mubr.f32.mxu1 %v1050_v57  ;;  %v1051_v24 = vld [vmem:[%s5165_s10 + $0x20] sm:$0xff] }
 0x5da   : > { %3421 = vmatprep.subr.bf16.mxu1 %v3671_v59 }
 0x5db   : > { %3386 = vmatpush1.bf16.msra.mxu0 %v3385_v19 }
 0x5dc   : > { %v1749_v33 = vpop.xlane.xlu1 %1748  ;;  %v1746_v48 = vpop.xlane.xlu0 %1745  ;;  %3387 = vmatprep.subr.bf16.mxu0 %v3671_v59  ;;  %2009 = vmatmul.mubr.f32.gmra.mrb[40].mxu1 %v1049_v16  ;;  %v1064_v16 = vld [vmem:[%s5165_s10 + $0x88] sm:$0xff] }
 0x5dd   : > { %v3388_v40 = vpack.c.bf16 %v1749_v33, %v1746_v48  ;;  %3437 = vmatpush1.bf16.msra.mxu1 %v4506_v1  ;;  %2013 = vmatprep.mubr.f32.mxu1 %v1052_v17  ;;  %v1053_v1 = vld [vmem:[%s5165_s10 + $0x30] sm:$0xff] }
 0x5de   : > { %3422 = vmatprep.subr.bf16.mxu1 %v3671_v59 }
 0x5df   : > { %3389 = vmatpush1.bf16.msra.mxu0 %v3388_v40 }
 0x5e0   : > { %v1755_v37 = vpop.xlane.xlu1 %1754  ;;  %v1752_v34 = vpop.xlane.xlu0 %1751  ;;  %3390 = vmatprep.subr.bf16.mxu0 %v3671_v59  ;;  %2014 = vmatmul.mubr.f32.gmra.mrb[42].mxu1 %v1051_v24  ;;  %v1066_v24 = vld [vmem:[%s5165_s10 + $0x98] sm:$0xff] }
 0x5e1   : > { %v3391_v29 = vpack.c.bf16 %v1755_v37, %v1752_v34  ;;  %3438 = vmatpush1.bf16.msra.mxu1 %v4511_v27  ;;  %2018 = vmatprep.mubr.f32.mxu1 %v1054_v31  ;;  %v1055_v27 = vld [vmem:[%s5165_s10 + $0x40] sm:$0xff] }
 0x5e2   : > { %3423 = vmatprep.subr.bf16.mxu1 %v3671_v59 }
 0x5e3   : > { %3392 = vmatpush1.bf16.msra.mxu0 %v3391_v29 }
 0x5e4   : > { %v1761_v13 = vpop.xlane.xlu1 %1760  ;;  %v1758_v28 = vpop.xlane.xlu0 %1757  ;;  %3393 = vmatprep.subr.bf16.mxu0 %v3671_v59  ;;  %2019 = vmatmul.mubr.f32.gmra.mrb[44].mxu1 %v1053_v1  ;;  %v1068_v1 = vld [vmem:[%s5165_s10 + $0xa8] sm:$0xff] }
 0x5e5   : > { %v3394_v8 = vpack.c.bf16 %v1761_v13, %v1758_v28  ;;  %3439 = vmatpush1.bf16.msra.mxu1 %v3382_v62  ;;  %2023 = vmatprep.mubr.f32.mxu1 %v1056_v18  ;;  %v1059_v62 = vld [vmem:[%s5165_s10 + $0x60] sm:$0xff] }
 0x5e6   : > { %3424 = vmatprep.subr.bf16.mxu1 %v3671_v59 }
 0x5e7   : > { %3395 = vmatpush1.bf16.msra.mxu0 %v3394_v8 }
 0x5e8   : > { %v1767_v44 = vpop.xlane.xlu1 %1766  ;;  %v1764_v49 = vpop.xlane.xlu0 %1763  ;;  %3396 = vmatprep.subr.bf16.mxu0 %v3671_v59  ;;  %2024 = vmatmul.mubr.f32.gmra.mrb[46].mxu1 %v1055_v27  ;;  %v1070_v27 = vld [vmem:[%s5165_s10 + $0xb8] sm:$0xff] }
 0x5e9   : > { %v3397_v10 = vpack.c.bf16 %v1767_v44, %v1764_v49  ;;  %3440 = vmatpush1.bf16.msra.mxu1 %v3385_v19  ;;  %2028 = vmatprep.mubr.f32.mxu1 %v1058_v58  ;;  %v1061_v19 = vld [vmem:[%s5165_s10 + $0x70] sm:$0xff] }
 0x5ea   : > { %3425 = vmatprep.subr.bf16.mxu1 %v3671_v59 }
 0x5eb   : > { %3398 = vmatpush1.bf16.msra.mxu0 %v3397_v10 }
 0x5ec   : > { %v1773_v3 = vpop.xlane.xlu1 %1772  ;;  %v1770_v12 = vpop.xlane.xlu0 %1769  ;;  %3399 = vmatprep.subr.bf16.mxu0 %v3671_v59  ;;  %2029 = vmatmul.mubr.f32.gmra.mrb[48].mxu1 %v1057_v61  ;;  %v1072_v61 = vld [vmem:[%s5165_s10 + $0xc8] sm:$0xff] }
 0x5ed   : > { %v3400_v54 = vpack.c.bf16 %v1773_v3, %v1770_v12  ;;  %3441 = vmatpush1.bf16.msra.mxu1 %v3388_v40  ;;  %2033 = vmatprep.mubr.f32.mxu1 %v1060_v52  ;;  %v1063_v40 = vld [vmem:[%s5165_s10 + $0x80] sm:$0xff] }
 0x5ee   : > { %3426 = vmatprep.subr.bf16.mxu1 %v3671_v59 }
 0x5ef   : > { %3401 = vmatpush1.bf16.msra.mxu0 %v3400_v54 }
 0x5f0   : > { %v1779_v57 = vpop.xlane.xlu1 %1778  ;;  %v1776_v43 = vpop.xlane.xlu0 %1775  ;;  %3402 = vmatprep.subr.bf16.mxu0 %v3671_v59  ;;  %2034 = vmatmul.mubr.f32.gmra.mrb[50].mxu1 %v1059_v62  ;;  %v1074_v62 = vld [vmem:[%s5165_s10 + $0xd8] sm:$0xff] }
 0x5f1   : > { %v3403_v11 = vpack.c.bf16 %v1779_v57, %v1776_v43  ;;  %3442 = vmatpush1.bf16.msra.mxu1 %v3391_v29  ;;  %2038 = vmatprep.mubr.f32.mxu1 %v1062_v4  ;;  %v1065_v29 = vld [vmem:[%s5165_s10 + $0x90] sm:$0xff]  ;;  %v983_v4 = vld [vmem:[%s5164_s9] sm:$0xff]  ;;  %v986_v57 = vld [vmem:[%s5164_s9 + $0x18] sm:$0xff] }
 0x5f2   : > { %3427 = vmatprep.subr.bf16.mxu1 %v3671_v59  ;;  %v1073_v43 = vld [vmem:[%s5165_s10 + $0xd0] sm:$0xff] }
 0x5f3   : > { %3404 = vmatpush1.bf16.msra.mxu0 %v3403_v11 }
 0x5f4   : > { %v1785_v17 = vpop.xlane.xlu1 %1784  ;;  %v1782_v33 = vpop.xlane.xlu0 %1781  ;;  %3405 = vmatprep.subr.bf16.mxu0 %v3671_v59  ;;  %2039 = vmatmul.mubr.f32.gmra.mrb[52].mxu1 %v1061_v19  ;;  %v985_v19 = vld [vmem:[%s5164_s9 + $0x10] sm:$0xff] }
 0x5f5   : > { %v3406_v48 = vpack.c.bf16 %v1785_v17, %v1782_v33  ;;  %3443 = vmatpush1.bf16.msra.mxu1 %v3394_v8  ;;  %2043 = vmatprep.mubr.f32.mxu1 %v1064_v16  ;;  %v1067_v8 = vld [vmem:[%s5165_s10 + $0xa0] sm:$0xff]  ;;  %v988_v16 = vld [vmem:[%s5164_s9 + $0x28] sm:$0xff]  ;;  %v1078_v33 = vld [vmem:[%s5165_s10 + $0xf8] sm:$0xff] }
 0x5f6   : > { %3428 = vmatprep.subr.bf16.mxu1 %v3671_v59  ;;  %v1075_v17 = vld [vmem:[%s5165_s10 + $0xe0] sm:$0xff] }
 0x5f7   : > { %3407 = vmatpush1.bf16.msra.mxu0 %v3406_v48 }
 0x5f8   : > { %v1791_v31 = vpop.xlane.xlu1 %1790  ;;  %v1788_v37 = vpop.xlane.xlu0 %1787  ;;  %3408 = vmatprep.subr.bf16.mxu0 %v3671_v59  ;;  %2044 = vmatmul.mubr.f32.gmra.mrb[54].mxu1 %v1063_v40  ;;  %v990_v40 = vld [vmem:[%s5164_s9 + $0x38] sm:$0xff] }
 0x5f9   : > { %v3409_v34 = vpack.c.bf16 %v1791_v31, %v1788_v37  ;;  %3444 = vmatpush1.bf16.msra.mxu1 %v3397_v10  ;;  %2048 = vmatprep.mubr.f32.mxu1 %v1066_v24  ;;  %v1069_v10 = vld [vmem:[%s5165_s10 + $0xb0] sm:$0xff]  ;;  %v1080_v31 = vld [vmem:[%s5165_s10 + $0x108] sm:$0xff] }
 0x5fa   : > { %3429 = vmatprep.subr.bf16.mxu1 %v3671_v59  ;;  %v1077_v24 = vld [vmem:[%s5165_s10 + $0xf0] sm:$0xff] }
 0x5fb   : > { %3410 = vmatpush1.bf16.msra.mxu0 %v3409_v34  ;;  %v989_v37 = vld [vmem:[%s5164_s9 + $0x30] sm:$0xff] }
 0x5fc   : > { %v1797_v18 = vpop.xlane.xlu1 %1796  ;;  %v1794_v13 = vpop.xlane.xlu0 %1793  ;;  %3411 = vmatprep.subr.bf16.mxu0 %v3671_v59  ;;  %2049 = vmatmul.mubr.f32.gmra.mrb[56].mxu1 %v1065_v29  ;;  %v1082_v29 = vld [vmem:[%s5165_s10 + $0x118] sm:$0xff] }
 0x5fd   : > { %v3412_v28 = vpack.c.bf16 %v1797_v18, %v1794_v13  ;;  %3445 = vmatpush1.bf16.msra.mxu1 %v3400_v54  ;;  %2053 = vmatprep.mubr.f32.mxu1 %v1068_v1  ;;  %v1071_v54 = vld [vmem:[%s5165_s10 + $0xc0] sm:$0xff]  ;;  %v994_v18 = vld [vmem:[%s5164_s9 + $0x58] sm:$0xff]  ;;  %v1081_v13 = vld [vmem:[%s5165_s10 + $0x110] sm:$0xff] }
 0x5fe   : > { %3430 = vmatprep.subr.bf16.mxu1 %v3671_v59  ;;  %v991_v1 = vld [vmem:[%s5164_s9 + $0x40] sm:$0xff] }
 0x5ff   : > { %3413 = vmatpush1.bf16.msra.mxu0 %v3412_v28 }
 0x600   : > { %v1803_v58 = vpop.xlane.xlu1 %1802  ;;  %v1800_v44 = vpop.xlane.xlu0 %1799  ;;  %3414 = vmatprep.subr.bf16.mxu0 %v3671_v59  ;;  %2054 = vmatmul.mubr.f32.gmra.mrb[58].mxu1 %v1067_v8  ;;  %v993_v8 = vld [vmem:[%s5164_s9 + $0x50] sm:$0xff] }
 0x601   : > { %v3415_v49 = vpack.c.bf16 %v1803_v58, %v1800_v44  ;;  %3446 = vmatpush1.bf16.msra.mxu1 %v3403_v11  ;;  %2058 = vmatprep.mubr.f32.mxu1 %v1070_v27  ;;  %v1076_v11 = vld [vmem:[%s5165_s10 + $0xe8] sm:$0xff]  ;;  %v1083_v58 = vld [vmem:[%s5165_s10 + $0x120] sm:$0xff]  ;;  %v1086_v44 = vld [vmem:[%s5165_s10 + $0x138] sm:$0xff] }
 0x602   : > { %3431 = vmatprep.subr.bf16.mxu1 %v3671_v59  ;;  %v996_v27 = vld [vmem:[%s5164_s9 + $0x68] sm:$0xff] }
 0x603   : > { %3416 = vmatpush1.bf16.msra.mxu0 %v3415_v49 }
 0x604   : > { %v1809_v52 = vpop.xlane.xlu1 %1808  ;;  %v1806_v3 = vpop.xlane.xlu0 %1805  ;;  %3417 = vmatprep.subr.bf16.mxu0 %v3671_v59  ;;  %2059 = vmatmul.mubr.f32.gmra.mrb[60].mxu1 %v1069_v10  ;;  %v998_v10 = vld [vmem:[%s5164_s9 + $0x78] sm:$0xff] }
 0x605   : > { %v3418_v12 = vpack.c.bf16 %v1809_v52, %v1806_v3  ;;  %3447 = vmatpush1.bf16.msra.mxu1 %v3406_v48  ;;  %2063 = vmatprep.mubr.f32.mxu1 %v1072_v61  ;;  %v987_v48 = vld [vmem:[%s5164_s9 + $0x20] sm:$0xff]  ;;  %v1085_v61 = vld [vmem:[%s5165_s10 + $0x130] sm:$0xff]  ;;  %v1088_v52 = vld [vmem:[%s5165_s10 + $0x148] sm:$0xff] }
 0x606   : > { %3432 = vmatprep.subr.bf16.mxu1 %v3671_v59  ;;  %v997_v3 = vld [vmem:[%s5164_s9 + $0x70] sm:$0xff] }
 0x607   : > { %3419 = vmatpush1.bf16.msra.mxu0 %v3418_v12 }
 0x608   : > { %2064 = vmatmul.mubr.f32.gmra.mrb[62].mxu1 %v1071_v54  ;;  %v1087_v54 = vld [vmem:[%s5165_s10 + $0x140] sm:$0xff] }
 0x609   : > { %3448 = vmatpush1.bf16.msra.mxu1 %v3409_v34  ;;  %2068 = vmatprep.mubr.f32.mxu1 %v1074_v62  ;;  %v992_v34 = vld [vmem:[%s5164_s9 + $0x48] sm:$0xff]  ;;  %v1090_v62 = vld [vmem:[%s5165_s10 + $0x158] sm:$0xff] }
 0x60a   : > { %2229 = vmatmul.mubr.f32.vlgmr.msra.gmra.mrb[64].mxu0 %v983_v4  ;;  %3433 = vmatprep.subr.bf16.mxu1 %v3671_v59  ;;  %v999_v4 = vld [vmem:[%s5164_s9 + $0x80] sm:$0xff] }
 0x60b   : > { %2233 = vmatprep.mubr.f32.mxu0 %v986_v57  ;;  %v1002_v57 = vld [vmem:[%s5164_s9 + $0x98] sm:$0xff] }
 0x60c   : > { %2069 = vmatmul.mubr.f32.gmra.mrb[64].mxu1 %v1073_v43  ;;  %v1089_v43 = vld [vmem:[%s5165_s10 + $0x150] sm:$0xff] }
 0x60d   : > { %3449 = vmatpush1.bf16.msra.mxu1 %v3412_v28  ;;  %2073 = vmatprep.mubr.f32.mxu1 %v1076_v11  ;;  %v1084_v28 = vld [vmem:[%s5165_s10 + $0x128] sm:$0xff] }
 0x60e   : > { %2234 = vmatmul.mubr.f32.gmra.mrb[66].mxu0 %v985_v19  ;;  %3434 = vmatprep.subr.bf16.mxu1 %v3671_v59  ;;  %v1092_v11 = vld [vmem:[%s5165_s10 + $0x168] sm:$0xff]  ;;  %v1001_v19 = vld [vmem:[%s5164_s9 + $0x90] sm:$0xff] }
 0x60f   : > { %2238 = vmatprep.mubr.f32.mxu0 %v988_v16  ;;  %v1004_v16 = vld [vmem:[%s5164_s9 + $0xa8] sm:$0xff] }
 0x610   : > { %2074 = vmatmul.mubr.f32.gmra.mrb[66].mxu1 %v1075_v17  ;;  %v1091_v17 = vld [vmem:[%s5165_s10 + $0x160] sm:$0xff] }
 0x611   : > { %3450 = vmatpush1.bf16.msra.mxu1 %v3415_v49  ;;  %2078 = vmatprep.mubr.f32.mxu1 %v1078_v33  ;;  %v995_v49 = vld [vmem:[%s5164_s9 + $0x60] sm:$0xff]  ;;  %v1094_v33 = vld [vmem:[%s5165_s10 + $0x178] sm:$0xff] }
 0x612   : > { %2239 = vmatmul.mubr.f32.gmra.mrb[68].mxu0 %v987_v48  ;;  %3435 = vmatprep.subr.bf16.mxu1 %v3671_v59  ;;  %v1079_v59 = vld [vmem:[%s5165_s10 + $0x100] sm:$0xff] }
 0x613   : > { %2243 = vmatprep.mubr.f32.mxu0 %v990_v40  ;;  %v1003_v48 = vld [vmem:[%s5164_s9 + $0xa0] sm:$0xff]  ;;  %v1006_v40 = vld [vmem:[%s5164_s9 + $0xb8] sm:$0xff] }
 0x614   : > { %2079 = vmatmul.mubr.f32.gmra.mrb[68].mxu1 %v1077_v24  ;;  %v1093_v24 = vld [vmem:[%s5165_s10 + $0x170] sm:$0xff] }
 0x615   : > { %3451 = vmatpush1.bf16.msra.mxu1 %v3418_v12  ;;  %2083 = vmatprep.mubr.f32.mxu1 %v1080_v31  ;;  %v1000_v12 = vld [vmem:[%s5164_s9 + $0x88] sm:$0xff] }
 0x616   : > { %2244 = vmatmul.mubr.f32.gmra.mrb[70].mxu0 %v989_v37  ;;  %v1096_v31 = vld [vmem:[%s5165_s10 + $0x188] sm:$0xff]  ;;  %v1005_v37 = vld [vmem:[%s5164_s9 + $0xb0] sm:$0xff] }
 0x617   : > { %2248 = vmatprep.mubr.f32.mxu0 %v992_v34  ;;  %v1008_v34 = vld [vmem:[%s5164_s9 + $0xc8] sm:$0xff] }
 0x618   : > { %2084 = vmatmul.mubr.f32.gmra.mrb[70].mxu1 %v1079_v59  ;;  %v1095_v59 = vld [vmem:[%s5165_s10 + $0x180] sm:$0xff] }
 0x619   : > { %2088 = vmatprep.mubr.f32.mxu1 %v1082_v29  ;;  %v1098_v29 = vld [vmem:[%s5165_s10 + $0x198] sm:$0xff] }
 0x61a   : > { %2249 = vmatmul.mubr.f32.gmra.mrb[72].mxu0 %v991_v1  ;;  %v1007_v1 = vld [vmem:[%s5164_s9 + $0xc0] sm:$0xff] }
 0x61b   : > { %2253 = vmatprep.mubr.f32.mxu0 %v994_v18  ;;  %v1010_v18 = vld [vmem:[%s5164_s9 + $0xd8] sm:$0xff] }
 0x61c   : > { %2089 = vmatmul.mubr.f32.gmra.mrb[72].mxu1 %v1081_v13  ;;  %v1097_v13 = vld [vmem:[%s5165_s10 + $0x190] sm:$0xff] }
 0x61d   : > { %2093 = vmatprep.mubr.f32.mxu1 %v1084_v28  ;;  %v1100_v28 = vld [vmem:[%s5165_s10 + $0x1a8] sm:$0xff] }
 0x61e   : > { %2254 = vmatmul.mubr.f32.gmra.mrb[74].mxu0 %v993_v8  ;;  %v1009_v8 = vld [vmem:[%s5164_s9 + $0xd0] sm:$0xff] }
 0x61f   : > { %2258 = vmatprep.mubr.f32.mxu0 %v996_v27  ;;  %v1012_v27 = vld [vmem:[%s5164_s9 + $0xe8] sm:$0xff] }
 0x620   : > { %2094 = vmatmul.mubr.f32.gmra.mrb[74].mxu1 %v1083_v58  ;;  %v1099_v58 = vld [vmem:[%s5165_s10 + $0x1a0] sm:$0xff] }
 0x621   : > { %2098 = vmatprep.mubr.f32.mxu1 %v1086_v44  ;;  %v1102_v44 = vld [vmem:[%s5165_s10 + $0x1b8] sm:$0xff] }
 0x622   : > { %2259 = vmatmul.mubr.f32.gmra.mrb[76].mxu0 %v995_v49  ;;  %v1011_v49 = vld [vmem:[%s5164_s9 + $0xe0] sm:$0xff] }
 0x623   : > { %2263 = vmatprep.mubr.f32.mxu0 %v998_v10  ;;  %v1014_v10 = vld [vmem:[%s5164_s9 + $0xf8] sm:$0xff] }
 0x624   : > { %2099 = vmatmul.mubr.f32.gmra.mrb[76].mxu1 %v1085_v61  ;;  %v1101_v61 = vld [vmem:[%s5165_s10 + $0x1b0] sm:$0xff] }
 0x625   : > { %2103 = vmatprep.mubr.f32.mxu1 %v1088_v52  ;;  %v1104_v52 = vld [vmem:[%s5165_s10 + $0x1c8] sm:$0xff] }
 0x626   : > { %2264 = vmatmul.mubr.f32.gmra.mrb[78].mxu0 %v997_v3  ;;  %v1013_v3 = vld [vmem:[%s5164_s9 + $0xf0] sm:$0xff] }
 0x627   : > { %2268 = vmatprep.mubr.f32.mxu0 %v1000_v12  ;;  %v1016_v12 = vld [vmem:[%s5164_s9 + $0x108] sm:$0xff] }
 0x628   : > { %2104 = vmatmul.mubr.f32.gmra.mrb[78].mxu1 %v1087_v54  ;;  %v1103_v54 = vld [vmem:[%s5165_s10 + $0x1c0] sm:$0xff] }
 0x629   : > { %2108 = vmatprep.mubr.f32.mxu1 %v1090_v62  ;;  %v1106_v62 = vld [vmem:[%s5165_s10 + $0x1d8] sm:$0xff] }
 0x62a   : > { %2269 = vmatmul.mubr.f32.gmra.mrb[80].mxu0 %v999_v4  ;;  %v1015_v4 = vld [vmem:[%s5164_s9 + $0x100] sm:$0xff] }
 0x62b   : > { %2273 = vmatprep.mubr.f32.mxu0 %v1002_v57  ;;  %v1018_v57 = vld [vmem:[%s5164_s9 + $0x118] sm:$0xff] }
 0x62c   : > { %2109 = vmatmul.mubr.f32.gmra.mrb[80].mxu1 %v1089_v43  ;;  %v1105_v43 = vld [vmem:[%s5165_s10 + $0x1d0] sm:$0xff] }
 0x62d   : > { %2113 = vmatprep.mubr.f32.mxu1 %v1092_v11  ;;  %v1108_v11 = vld [vmem:[%s5165_s10 + $0x1e8] sm:$0xff] }
 0x62e   : > { %2274 = vmatmul.mubr.f32.gmra.mrb[82].mxu0 %v1001_v19  ;;  %v1017_v19 = vld [vmem:[%s5164_s9 + $0x110] sm:$0xff] }
 0x62f   : > { %2278 = vmatprep.mubr.f32.mxu0 %v1004_v16  ;;  %v1020_v16 = vld [vmem:[%s5164_s9 + $0x128] sm:$0xff] }
 0x630   : > { %2114 = vmatmul.mubr.f32.gmra.mrb[82].mxu1 %v1091_v17  ;;  %v1107_v17 = vld [vmem:[%s5165_s10 + $0x1e0] sm:$0xff] }
 0x631   : > { %2118 = vmatprep.mubr.f32.mxu1 %v1094_v33  ;;  %v1110_v33 = vld [vmem:[%s5165_s10 + $0x1f8] sm:$0xff] }
 0x632   : > { %2279 = vmatmul.mubr.f32.gmra.mrb[84].mxu0 %v1003_v48  ;;  %v1019_v48 = vld [vmem:[%s5164_s9 + $0x120] sm:$0xff] }
 0x633   : > { %2283 = vmatprep.mubr.f32.mxu0 %v1006_v40  ;;  %v1022_v40 = vld [vmem:[%s5164_s9 + $0x138] sm:$0xff] }
 0x634   : > { %2119 = vmatmul.mubr.f32.gmra.mrb[84].mxu1 %v1093_v24  ;;  %v1109_v24 = vld [vmem:[%s5165_s10 + $0x1f0] sm:$0xff] }
 0x635   : > { %2123 = vmatprep.mubr.f32.mxu1 %v1096_v31  ;;  %v1036_v31 = vld [vmem:[%s5164_s9 + $0x1a8] sm:$0xff] }
 0x636   : > { %2284 = vmatmul.mubr.f32.gmra.mrb[86].mxu0 %v1005_v37  ;;  %v1021_v37 = vld [vmem:[%s5164_s9 + $0x130] sm:$0xff] }
 0x637   : > { %2288 = vmatprep.mubr.f32.mxu0 %v1008_v34  ;;  %v1024_v34 = vld [vmem:[%s5164_s9 + $0x148] sm:$0xff] }
 0x638   : > { %2124 = vmatmul.mubr.f32.gmra.mrb[86].mxu1 %v1095_v59  ;;  %v1035_v59 = vld [vmem:[%s5164_s9 + $0x1a0] sm:$0xff] }
 0x639   : > { %2128 = vmatprep.mubr.f32.mxu1 %v1098_v29  ;;  %v1038_v29 = vld [vmem:[%s5164_s9 + $0x1b8] sm:$0xff] }
 0x63a   : > { %2289 = vmatmul.mubr.f32.gmra.mrb[88].mxu0 %v1007_v1  ;;  %v1023_v1 = vld [vmem:[%s5164_s9 + $0x140] sm:$0xff] }
 0x63b   : > { %2293 = vmatprep.mubr.f32.mxu0 %v1010_v18  ;;  %v1026_v18 = vld [vmem:[%s5164_s9 + $0x158] sm:$0xff] }
 0x63c   : > { %2129 = vmatmul.mubr.f32.gmra.mrb[88].mxu1 %v1097_v13  ;;  %v1037_v13 = vld [vmem:[%s5164_s9 + $0x1b0] sm:$0xff] }
 0x63d   : > { %2133 = vmatprep.mubr.f32.mxu1 %v1100_v28  ;;  %v1040_v28 = vld [vmem:[%s5164_s9 + $0x1c8] sm:$0xff] }
 0x63e   : > { %2294 = vmatmul.mubr.f32.gmra.mrb[90].mxu0 %v1009_v8  ;;  %v1025_v8 = vld [vmem:[%s5164_s9 + $0x150] sm:$0xff] }
 0x63f   : > { %2298 = vmatprep.mubr.f32.mxu0 %v1012_v27  ;;  %v1028_v27 = vld [vmem:[%s5164_s9 + $0x168] sm:$0xff] }
 0x640   : > { %2134 = vmatmul.mubr.f32.gmra.mrb[90].mxu1 %v1099_v58  ;;  %v1039_v58 = vld [vmem:[%s5164_s9 + $0x1c0] sm:$0xff] }
 0x641   : > { %2138 = vmatprep.mubr.f32.mxu1 %v1102_v44  ;;  %v1042_v44 = vld [vmem:[%s5164_s9 + $0x1d8] sm:$0xff] }
 0x642   : > { %2299 = vmatmul.mubr.f32.gmra.mrb[92].mxu0 %v1011_v49  ;;  %v1027_v49 = vld [vmem:[%s5164_s9 + $0x160] sm:$0xff] }
 0x643   : > { %2303 = vmatprep.mubr.f32.mxu0 %v1014_v10  ;;  %v1030_v10 = vld [vmem:[%s5164_s9 + $0x178] sm:$0xff] }
 0x644   : > { %2139 = vmatmul.mubr.f32.gmra.mrb[92].mxu1 %v1101_v61  ;;  %v1041_v61 = vld [vmem:[%s5164_s9 + $0x1d0] sm:$0xff] }
 0x645   : > { %2143 = vmatprep.mubr.f32.mxu1 %v1104_v52  ;;  %v1044_v52 = vld [vmem:[%s5164_s9 + $0x1e8] sm:$0xff] }
 0x646   : > { %2304 = vmatmul.mubr.f32.gmra.mrb[94].mxu0 %v1013_v3  ;;  %v1029_v3 = vld [vmem:[%s5164_s9 + $0x170] sm:$0xff] }
 0x647   : > { %2308 = vmatprep.mubr.f32.mxu0 %v1016_v12  ;;  %v1032_v12 = vld [vmem:[%s5164_s9 + $0x188] sm:$0xff] }
 0x648   : > { %2144 = vmatmul.mubr.f32.gmra.mrb[94].mxu1 %v1103_v54  ;;  %v1043_v54 = vld [vmem:[%s5164_s9 + $0x1e0] sm:$0xff] }
 0x649   : > { %2148 = vmatprep.mubr.f32.mxu1 %v1106_v62  ;;  %v1046_v62 = vld [vmem:[%s5164_s9 + $0x1f8] sm:$0xff] }
 0x64a   : > { %2309 = vmatmul.mubr.f32.gmra.mrb[96].mxu0 %v1015_v4  ;;  %v1031_v4 = vld [vmem:[%s5164_s9 + $0x180] sm:$0xff] }
 0x64b   : > { %2313 = vmatprep.mubr.f32.mxu0 %v1018_v57  ;;  %v1034_v57 = vld [vmem:[%s5164_s9 + $0x198] sm:$0xff] }
 0x64c   : > { %2149 = vmatmul.mubr.f32.gmra.mrb[96].mxu1 %v1105_v43  ;;  %v1045_v43 = vld [vmem:[%s5164_s9 + $0x1f0] sm:$0xff] }
 0x64d   : > { %2153 = vmatprep.mubr.f32.mxu1 %v1108_v11  ;;  %v1033_v11 = vld [vmem:[%s5164_s9 + $0x190] sm:$0xff] }
 0x64e   : > { %2314 = vmatmul.mubr.f32.gmra.mrb[98].mxu0 %v1017_v19  ;;  %v3674_v19 = vmov 0  }
 0x64f   : > { %2318 = vmatprep.mubr.f32.mxu0 %v1020_v16  ;;  %3464 = vset.pattern.permute.xlu0 %v3674_v19 }
 0x650   : > { %2154 = vmatmul.mubr.f32.gmra.mrb[98].mxu1 %v1107_v17  ;;  %3465 = vset.pattern.permute.xlu1 %v3674_v19 }
 0x651   : > { %2158 = vmatprep.mubr.f32.mxu1 %v1110_v33 }
 0x652   : > { %2319 = vmatmul.mubr.f32.gmra.mrb[100].mxu0 %v1019_v48 }
 0x653   : > { %2323 = vmatprep.mubr.f32.mxu0 %v1022_v40 }
 0x654   : > { %2159 = vmatmul.mubr.f32.gmra.mrb[100].mxu1 %v1109_v24 }
 0x655   : > { %2358 = vmatprep.mubr.f32.mxu1 %v1036_v31 }
 0x656   : > { %2324 = vmatmul.mubr.f32.gmra.mrb[102].mxu0 %v1021_v37 }
 0x657   : > { %2328 = vmatprep.mubr.f32.mxu0 %v1024_v34 }
 0x658   : > { %2359 = vmatmul.mubr.f32.vlgmr.msra.gmra.mrb[102].mxu1 %v1035_v59 }
 0x659   : > { %2363 = vmatprep.mubr.f32.mxu1 %v1038_v29 }
 0x65a   : > { %2329 = vmatmul.mubr.f32.gmra.mrb[104].mxu0 %v1023_v1 }
 0x65b   : > { %2333 = vmatprep.mubr.f32.mxu0 %v1026_v18 }
 0x65c   : > { %2364 = vmatmul.mubr.f32.gmra.mrb[104].mxu1 %v1037_v13 }
 0x65d   : > { %2368 = vmatprep.mubr.f32.mxu1 %v1040_v28 }
 0x65e   : > { %2334 = vmatmul.mubr.f32.gmra.mrb[106].mxu0 %v1025_v8 }
 0x65f   : > { %2338 = vmatprep.mubr.f32.mxu0 %v1028_v27 }
 0x660   : > { %2369 = vmatmul.mubr.f32.gmra.mrb[106].mxu1 %v1039_v58 }
 0x661   : > { %2373 = vmatprep.mubr.f32.mxu1 %v1042_v44 }
 0x662   : > { %2339 = vmatmul.mubr.f32.gmra.mrb[108].mxu0 %v1027_v49 }
 0x663   : > { %2343 = vmatprep.mubr.f32.mxu0 %v1030_v10 }
 0x664   : > { %2374 = vmatmul.mubr.f32.gmra.mrb[108].mxu1 %v1041_v61 }
 0x665   : > { %2378 = vmatprep.mubr.f32.mxu1 %v1044_v52 }
 0x666   : > { %2344 = vmatmul.mubr.f32.gmra.mrb[110].mxu0 %v1029_v3 }
 0x667   : > { %2348 = vmatprep.mubr.f32.mxu0 %v1032_v12 }
 0x668   : > { %2379 = vmatmul.mubr.f32.gmra.mrb[110].mxu1 %v1043_v54 }
 0x669   : > { %2383 = vmatprep.mubr.f32.mxu1 %v1046_v62  ;;  %v4951_v62 = vld [vmem:[#allocation2] ss:$0 sm:$0xff] }
 0x66a   : > { %2349 = vmatmul.mubr.f32.gmra.mrb[112].mxu0 %v1031_v4 }
 0x66b   : > { %2353 = vmatprep.mubr.f32.mxu0 %v1034_v57 }
 0x66c   : > { %2384 = vmatmul.mubr.f32.gmra.mrb[112].mxu1 %v1045_v43 }
 0x66e   : > { %2354 = vmatmul.mubr.f32.gmra.mrb[114].mxu0 %v1033_v11 }
 0x6ab   : > { %v2005_v16 = vpop.f32.mrb[38].mxu1 }
 0x6ac   : > { %v2007_v17 = vpop.f32.mrb[39].mxu1 }
 0x6af   : > { %v2010_v33 = vpop.f32.mrb[40].mxu1 }
 0x6b0   : > { %v2012_v48 = vpop.f32.mrb[41].mxu1 }
 0x6b3   : > { %v2015_v40 = vpop.f32.mrb[42].mxu1 }
 0x6b4   : > { %v2017_v24 = vpop.f32.mrb[43].mxu1 }
 0x6b7   : > { %v2020_v31 = vpop.f32.mrb[44].mxu1 }
 0x6b8   : > { %v2022_v37 = vpop.f32.mrb[45].mxu1 }
 0x6bb   : > { %v2025_v34 = vpop.f32.mrb[46].mxu1 }
 0x6bc   : > { %v2027_v59 = vpop.f32.mrb[47].mxu1 }
 0x6bf   : > { %v2030_v29 = vpop.f32.mrb[48].mxu1 }
 0x6c0   : > { %v2032_v1 = vpop.f32.mrb[49].mxu1 }
 0x6c3   : > { %v4937_v18 = vpop.f32.mrb[50].mxu1 }
 0x6c4   : > { %v2037_v13 = vpop.f32.mrb[51].mxu1 }
 0x6c7   : > { %v4939_v28 = vpop.f32.mrb[52].mxu1 }
 0x6c8   : > { %v2042_v8 = vpop.f32.mrb[53].mxu1 }
 0x6cb   : > { %v4941_v27 = vpop.f32.mrb[54].mxu1 }
 0x6cc   : > { %v2047_v58 = vpop.f32.mrb[55].mxu1 }
 0x6cf   : > { %v4943_v44 = vpop.f32.mrb[56].mxu1 }
 0x6d0   : > { %v2052_v49 = vpop.f32.mrb[57].mxu1 }
 0x6d3   : > { %v4945_v10 = vpop.f32.mrb[58].mxu1 }
 0x6d4   : > { %v2057_v61 = vpop.f32.mrb[59].mxu1 }
 0x6d7   : > { %v4947_v52 = vpop.f32.mrb[60].mxu1 }
 0x6d8   : > { %v2062_v3 = vpop.f32.mrb[61].mxu1 }
 0x6db   : > { %v4949_v12 = vpop.f32.mrb[62].mxu1 }
 0x6dc   : > { %v2067_v54 = vpop.f32.mrb[63].mxu1 }
 0x6dd   : > { %v2230_v4 = vpop.f32.mrb[64].mxu0 }
 0x6de   : > { %v2231_v57 = vadd.f32 %v2230_v4, %v2005_v16  ;;  %v2232_v43 = vpop.f32.mrb[65].mxu0 }
 0x6df   : > { %v4953_v11 = vpop.f32.mrb[64].mxu1 }
 0x6e0   : > { %v2395_v19 = vadd.f32 %v4951_v62, %v2231_v57  ;;  %v2072_v17 = vpop.f32.mrb[65].mxu1 }
 0x6e1   : > { %v2235_v48 = vpop.f32.mrb[66].mxu0 }
 0x6e2   : > { %v2998_v24 = vmul.f32 -1.442695, %v2395_v19  ;;  %v2236_v37 = vadd.f32 %v2235_v48, %v2010_v33  ;;  %v2237_v59 = vpop.f32.mrb[67].mxu0 }
 0x6e3   : > { %v4956_v1 = vpop.f32.mrb[66].mxu1 }
 0x6e4   : > { %3535 = vpow2.f32 %v2998_v24  ;;  %v2396_v13 = vadd.f32 %v4951_v62, %v2236_v37  ;;  %v2077_v8 = vpop.f32.mrb[67].mxu1 }
 0x6e5   : > { %v2240_v58 = vpop.f32.mrb[68].mxu0 }
 0x6e6   : > { %v2999_v49 = vmul.f32 -1.442695, %v2396_v13  ;;  %v2241_v61 = vadd.f32 %v2240_v58, %v2015_v40  ;;  %v2242_v16 = vpop.f32.mrb[69].mxu0 }
 0x6e7   : > { %v4959_v3 = vpop.f32.mrb[68].mxu1 }
 0x6e8   : > { %3537 = vpow2.f32 %v2999_v49  ;;  %v2397_v54 = vadd.f32 %v4951_v62, %v2241_v61  ;;  %v2082_v4 = vpop.f32.mrb[69].mxu1 }
 0x6e9   : > { %v2245_v57 = vpop.f32.mrb[70].mxu0 }
 0x6ea   : > { %v3000_v43 = vmul.f32 -1.442695, %v2397_v54  ;;  %v2246_v33 = vadd.f32 %v2245_v57, %v2020_v31  ;;  %v2247_v19 = vpop.f32.mrb[71].mxu0 }
 0x6eb   : > { %v4962_v17 = vpop.f32.mrb[70].mxu1 }
 0x6ec   : > { %3539 = vpow2.f32 %v3000_v43  ;;  %v2398_v48 = vadd.f32 %v4951_v62, %v2246_v33  ;;  %v2087_v24 = vpop.f32.mrb[71].mxu1 }
 0x6ed   : > { %v2250_v37 = vpop.f32.mrb[72].mxu0 }
 0x6ee   : > { %v3536_v59 = vpop.eup %3535  ;;  %v3001_v40 = vmul.f32 -1.442695, %v2398_v48  ;;  %v2251_v13 = vadd.f32 %v2250_v37, %v2025_v34  ;;  %v2252_v8 = vpop.f32.mrb[73].mxu0 }
 0x6ef   : > { %v2523_v58 = vadd.f32 1.0, %v3536_v59  ;;  %v4965_v49 = vpop.f32.mrb[72].mxu1 }
 0x6f0   : > { %3541 = vpow2.f32 %v3001_v40  ;;  %v2399_v61 = vadd.f32 %v4951_v62, %v2251_v13  ;;  %v2092_v16 = vpop.f32.mrb[73].mxu1 }
 0x6f1   : > { %3543 = vrcp.f32 %v2523_v58  ;;  %v2255_v31 = vpop.f32.mrb[74].mxu0 }
 0x6f2   : > { %v3538_v54 = vpop.eup %3537  ;;  %v3002_v4 = vmul.f32 -1.442695, %v2399_v61  ;;  %v2256_v57 = vadd.f32 %v2255_v31, %v2030_v29  ;;  %v2257_v43 = vpop.f32.mrb[75].mxu0 }
 0x6f3   : > { %v2524_v33 = vadd.f32 1.0, %v3538_v54  ;;  %v4968_v19 = vpop.f32.mrb[74].mxu1 }
 0x6f4   : > { %3545 = vpow2.f32 %v3002_v4  ;;  %v2400_v34 = vadd.f32 %v4951_v62, %v2256_v57  ;;  %v2097_v48 = vpop.f32.mrb[75].mxu1 }
 0x6f5   : > { %3547 = vrcp.f32 %v2524_v33  ;;  %v2260_v24 = vpop.f32.mrb[76].mxu0 }
 0x6f6   : > { %v3540_v37 = vpop.eup %3539  ;;  %v3003_v59 = vmul.f32 -1.442695, %v2400_v34  ;;  %v2261_v40 = vadd.f32 %v2260_v24, %v4937_v18  ;;  %v2262_v13 = vpop.f32.mrb[77].mxu0 }
 0x6f7   : > { %v2525_v8 = vadd.f32 1.0, %v3540_v37  ;;  %v4972_v58 = vpop.f32.mrb[76].mxu1 }
 0x6f8   : > { %3549 = vpow2.f32 %v3003_v59  ;;  %v2401_v29 = vadd.f32 %v4951_v62, %v2261_v40  ;;  %v2102_v61 = vpop.f32.mrb[77].mxu1 }
 0x6f9   : > { %3551 = vrcp.f32 %v2525_v8  ;;  %v2265_v16 = vpop.f32.mrb[78].mxu0 }
 0x6fa   : > { %v3542_v31 = vpop.eup %3541  ;;  %v3004_v54 = vmul.f32 -1.442695, %v2401_v29  ;;  %v2266_v4 = vadd.f32 %v2265_v16, %v4939_v28  ;;  %v2267_v57 = vpop.f32.mrb[79].mxu0 }
 0x6fb   : > { %v3544_v43 = vpop.eup %3543  ;;  %v2526_v33 = vadd.f32 1.0, %v3542_v31  ;;  %v4976_v34 = vpop.f32.mrb[78].mxu1 }
 0x6fc   : > { %3553 = vpow2.f32 %v3004_v54  ;;  %v2402_v18 = vadd.f32 %v4951_v62, %v2266_v4  ;;  %2621 = vperm.xlu0 %3464, %v3544_v43   ;;  %v2107_v48 = vpop.f32.mrb[79].mxu1 }
 0x6fd   : > { %3555 = vrcp.f32 %v2526_v33  ;;  %v2270_v24 = vpop.f32.mrb[80].mxu0 }
 0x6fe   : > { %v3546_v37 = vpop.eup %3545  ;;  %v3005_v59 = vmul.f32 -1.442695, %v2402_v18  ;;  %v2271_v40 = vadd.f32 %v2270_v24, %v4941_v27  ;;  %v2272_v13 = vpop.f32.mrb[81].mxu0 }
 0x6ff   : > { %v3548_v8 = vpop.eup %3547  ;;  %v2527_v29 = vadd.f32 1.0, %v3546_v37  ;;  %v4980_v28 = vpop.f32.mrb[80].mxu1 }
 0x700   : > { %3557 = vpow2.f32 %v3005_v59  ;;  %v2403_v61 = vadd.f32 %v4951_v62, %v2271_v40  ;;  %2626 = vperm.xlu1 %3465, %v3548_v8   ;;  %v2112_v16 = vpop.f32.mrb[81].mxu1 }
 0x701   : > { %3559 = vrcp.f32 %v2527_v29  ;;  %v2275_v31 = vpop.f32.mrb[82].mxu0 }
 0x702   : > { %v3550_v54 = vpop.eup %3549  ;;  %v3006_v4 = vmul.f32 -1.442695, %v2403_v61  ;;  %v2276_v57 = vadd.f32 %v2275_v31, %v4943_v44  ;;  %v2277_v43 = vpop.f32.mrb[83].mxu0 }
 0x703   : > { %v3552_v33 = vpop.eup %3551  ;;  %v2528_v18 = vadd.f32 1.0, %v3550_v54  ;;  %v4984_v27 = vpop.f32.mrb[82].mxu1 }
 0x704   : > { %3561 = vpow2.f32 %v3006_v4  ;;  %v2404_v48 = vadd.f32 %v4951_v62, %v2276_v57  ;;  %2631 = vperm.xlu1 %3465, %v3552_v33   ;;  %v2117_v24 = vpop.f32.mrb[83].mxu1 }
 0x705   : > { %3563 = vrcp.f32 %v2528_v18  ;;  %v2280_v37 = vpop.f32.mrb[84].mxu0 }
 0x706   : > { %v3554_v59 = vpop.eup %3553  ;;  %v3007_v40 = vmul.f32 -1.442695, %v2404_v48  ;;  %v2281_v13 = vadd.f32 %v2280_v37, %v4945_v10  ;;  %v2282_v8 = vpop.f32.mrb[85].mxu0 }
 0x707   : > { %v3556_v29 = vpop.eup %3555  ;;  %v2529_v61 = vadd.f32 1.0, %v3554_v59  ;;  %v4988_v44 = vpop.f32.mrb[84].mxu1 }
 0x708   : > { %3565 = vpow2.f32 %v3007_v40  ;;  %v2405_v16 = vadd.f32 %v4951_v62, %v2281_v13  ;;  %2636 = vperm.xlu1 %3465, %v3556_v29   ;;  %v2122_v31 = vpop.f32.mrb[85].mxu1 }
 0x709   : > { %3567 = vrcp.f32 %v2529_v61  ;;  %v2285_v54 = vpop.f32.mrb[86].mxu0 }
 0x70a   : > { %v3558_v4 = vpop.eup %3557  ;;  %v3008_v57 = vmul.f32 -1.442695, %v2405_v16  ;;  %v2286_v43 = vadd.f32 %v2285_v54, %v4947_v52  ;;  %v2287_v33 = vpop.f32.mrb[87].mxu0 }
 0x70b   : > { %v3560_v18 = vpop.eup %3559  ;;  %v2530_v48 = vadd.f32 1.0, %v3558_v4  ;;  %v4992_v10 = vpop.f32.mrb[86].mxu1 }
 0x70c   : > { %3569 = vpow2.f32 %v3008_v57  ;;  %v2406_v24 = vadd.f32 %v4951_v62, %v2286_v43  ;;  %2641 = vperm.xlu1 %3465, %v3560_v18   ;;  %v2127_v37 = vpop.f32.mrb[87].mxu1 }
 0x70d   : > { %3571 = vrcp.f32 %v2530_v48  ;;  %v2290_v59 = vpop.f32.mrb[88].mxu0 }
 0x70e   : > { %v3562_v40 = vpop.eup %3561  ;;  %v3009_v13 = vmul.f32 -1.442695, %v2406_v24  ;;  %v2291_v8 = vadd.f32 %v2290_v59, %v4949_v12  ;;  %v2292_v29 = vpop.f32.mrb[89].mxu0 }
 0x70f   : > { %v3564_v61 = vpop.eup %3563  ;;  %v2531_v16 = vadd.f32 1.0, %v3562_v40  ;;  %v4996_v52 = vpop.f32.mrb[88].mxu1 }
 0x710   : > { %3573 = vpow2.f32 %v3009_v13  ;;  %v2407_v31 = vadd.f32 %v4951_v62, %v2291_v8  ;;  %2646 = vperm.xlu1 %3465, %v3564_v61   ;;  %v2132_v54 = vpop.f32.mrb[89].mxu1 }
 0x711   : > { %3575 = vrcp.f32 %v2531_v16  ;;  %v2295_v4 = vpop.f32.mrb[90].mxu0 }
 0x712   : > { %v3566_v57 = vpop.eup %3565  ;;  %v3010_v43 = vmul.f32 -1.442695, %v2407_v31  ;;  %v2296_v33 = vadd.f32 %v2295_v4, %v4953_v11  ;;  %v2297_v18 = vpop.f32.mrb[91].mxu0 }
 0x713   : > { %v3568_v48 = vpop.eup %3567  ;;  %v2532_v24 = vadd.f32 1.0, %v3566_v57  ;;  %v5000_v12 = vpop.f32.mrb[90].mxu1 }
 0x714   : > { %3577 = vpow2.f32 %v3010_v43  ;;  %v2408_v37 = vadd.f32 %v4951_v62, %v2296_v33  ;;  %2651 = vperm.xlu1 %3465, %v3568_v48   ;;  %v2137_v59 = vpop.f32.mrb[91].mxu1 }
 0x715   : > { %3579 = vrcp.f32 %v2532_v24  ;;  %v2300_v40 = vpop.f32.mrb[92].mxu0 }
 0x716   : > { %v3570_v13 = vpop.eup %3569  ;;  %v3011_v8 = vmul.f32 -1.442695, %v2408_v37  ;;  %v2301_v29 = vadd.f32 %v2300_v40, %v4956_v1  ;;  %v2302_v61 = vpop.f32.mrb[93].mxu0 }
 0x717   : > { %v3572_v16 = vpop.eup %3571  ;;  %v2533_v31 = vadd.f32 1.0, %v3570_v13  ;;  %v5004_v11 = vpop.f32.mrb[92].mxu1 }
 0x718   : > { %3581 = vpow2.f32 %v3011_v8  ;;  %v2409_v54 = vadd.f32 %v4951_v62, %v2301_v29  ;;  %2656 = vperm.xlu1 %3465, %v3572_v16   ;;  %v2142_v4 = vpop.f32.mrb[93].mxu1 }
 0x719   : > { %3583 = vrcp.f32 %v2533_v31  ;;  %v2305_v57 = vpop.f32.mrb[94].mxu0 }
 0x71a   : > { %v3574_v43 = vpop.eup %3573  ;;  %v3012_v33 = vmul.f32 -1.442695, %v2409_v54  ;;  %v2306_v18 = vadd.f32 %v2305_v57, %v4959_v3  ;;  %v2307_v48 = vpop.f32.mrb[95].mxu0 }
 0x71b   : > { %v3576_v24 = vpop.eup %3575  ;;  %v2534_v37 = vadd.f32 1.0, %v3574_v43  ;;  %v5008_v1 = vpop.f32.mrb[94].mxu1 }
 0x71c   : > { %3585 = vpow2.f32 %v3012_v33  ;;  %v2410_v59 = vadd.f32 %v4951_v62, %v2306_v18  ;;  %2661 = vperm.xlu1 %3465, %v3576_v24   ;;  %v2147_v40 = vpop.f32.mrb[95].mxu1 }
 0x71d   : > { %3587 = vrcp.f32 %v2534_v37  ;;  %v2310_v13 = vpop.f32.mrb[96].mxu0 }
 0x71e   : > { %v3578_v8 = vpop.eup %3577  ;;  %v3013_v29 = vmul.f32 -1.442695, %v2410_v59  ;;  %v2311_v61 = vadd.f32 %v2310_v13, %v4962_v17  ;;  %v2312_v16 = vpop.f32.mrb[97].mxu0 }
 0x71f   : > { %v3580_v31 = vpop.eup %3579  ;;  %v2535_v54 = vadd.f32 1.0, %v3578_v8  ;;  %v5012_v3 = vpop.f32.mrb[96].mxu1 }
 0x720   : > { %3589 = vpow2.f32 %v3013_v29  ;;  %v2411_v4 = vadd.f32 %v4951_v62, %v2311_v61  ;;  %2666 = vperm.xlu0 %3464, %v3580_v31   ;;  %v2152_v57 = vpop.f32.mrb[97].mxu1 }
 0x721   : > { %3591 = vrcp.f32 %v2535_v54  ;;  %v2315_v43 = vpop.f32.mrb[98].mxu0 }
 0x722   : > { %v3582_v33 = vpop.eup %3581  ;;  %v3014_v18 = vmul.f32 -1.442695, %v2411_v4  ;;  %v2316_v48 = vadd.f32 %v2315_v43, %v4965_v49  ;;  %v2317_v24 = vpop.f32.mrb[99].mxu0 }
 0x723   : > { %v3584_v37 = vpop.eup %3583  ;;  %v2536_v59 = vadd.f32 1.0, %v3582_v33  ;;  %v5016_v17 = vpop.f32.mrb[98].mxu1 }
 0x724   : > { %3593 = vpow2.f32 %v3014_v18  ;;  %v2412_v40 = vadd.f32 %v4951_v62, %v2316_v48  ;;  %2671 = vperm.xlu1 %3465, %v3584_v37   ;;  %v2157_v13 = vpop.f32.mrb[99].mxu1 }
 0x725   : > { %3595 = vrcp.f32 %v2536_v59  ;;  %v2320_v8 = vpop.f32.mrb[100].mxu0 }
 0x726   : > { %v3586_v29 = vpop.eup %3585  ;;  %v3015_v61 = vmul.f32 -1.442695, %v2412_v40  ;;  %v2321_v16 = vadd.f32 %v2320_v8, %v4968_v19  ;;  %v2322_v31 = vpop.f32.mrb[101].mxu0 }
 0x727   : > { %v3588_v54 = vpop.eup %3587  ;;  %v2537_v4 = vadd.f32 1.0, %v3586_v29  ;;  %v5020_v49 = vpop.f32.mrb[100].mxu1 }
 0x728   : > { %3597 = vpow2.f32 %v3015_v61  ;;  %v2413_v57 = vadd.f32 %v4951_v62, %v2321_v16  ;;  %2676 = vperm.xlu0 %3464, %v3588_v54   ;;  %v2162_v43 = vpop.f32.mrb[101].mxu1 }
 0x729   : > { %3599 = vrcp.f32 %v2537_v4  ;;  %v2325_v33 = vpop.f32.mrb[102].mxu0 }
 0x72a   : > { %v3590_v18 = vpop.eup %3589  ;;  %v3016_v48 = vmul.f32 -1.442695, %v2413_v57  ;;  %v2326_v24 = vadd.f32 %v2325_v33, %v4972_v58  ;;  %v2327_v37 = vpop.f32.mrb[103].mxu0 }
 0x72b   : > { %v3592_v59 = vpop.eup %3591  ;;  %v2538_v40 = vadd.f32 1.0, %v3590_v18  ;;  %v2360_v19 = vpop.f32.mrb[102].mxu1 }
 0x72c   : > { %3601 = vpow2.f32 %v3016_v48  ;;  %v2414_v13 = vadd.f32 %v4951_v62, %v2326_v24  ;;  %2681 = vperm.xlu1 %3465, %v3592_v59   ;;  %v2361_v8 = vadd.f32 %v2360_v19, %v5000_v12  ;;  %v2362_v29 = vpop.f32.mrb[103].mxu1 }
 0x72d   : > { %3603 = vrcp.f32 %v2538_v40  ;;  %v2330_v61 = vpop.f32.mrb[104].mxu0 }
 0x72e   : > { %v3594_v16 = vpop.eup %3593  ;;  %v3017_v31 = vmul.f32 -1.442695, %v2414_v13  ;;  %v2331_v54 = vadd.f32 %v2330_v61, %v4976_v34  ;;  %v2332_v4 = vpop.f32.mrb[105].mxu0 }
 0x72f   : > { %v3596_v57 = vpop.eup %3595  ;;  %v2539_v58 = vadd.f32 1.0, %v3594_v16  ;;  %v2365_v43 = vpop.f32.mrb[104].mxu1 }
 0x730   : > { %3605 = vpow2.f32 %v3017_v31  ;;  %v2415_v33 = vadd.f32 %v4951_v62, %v2331_v54  ;;  %2686 = vperm.xlu0 %3464, %v3596_v57   ;;  %v2366_v18 = vadd.f32 %v2365_v43, %v5004_v11  ;;  %v2367_v48 = vpop.f32.mrb[105].mxu1 }
 0x731   : > { %3607 = vrcp.f32 %v2539_v58  ;;  %v2335_v12 = vpop.f32.mrb[106].mxu0 }
 0x732   : > { %v3598_v24 = vpop.eup %3597  ;;  %v3018_v37 = vmul.f32 -1.442695, %v2415_v33  ;;  %v2336_v59 = vadd.f32 %v2335_v12, %v4980_v28  ;;  %v2337_v40 = vpop.f32.mrb[107].mxu0 }
 0x733   : > { %v3600_v19 = vpop.eup %3599  ;;  %v2540_v34 = vadd.f32 1.0, %v3598_v24  ;;  %v2370_v13 = vpop.f32.mrb[106].mxu1 }
 0x734   : > { %3609 = vpow2.f32 %v3018_v37  ;;  %v2416_v29 = vadd.f32 %v4951_v62, %v2336_v59  ;;  %2691 = vperm.xlu1 %3465, %v3600_v19   ;;  %v2371_v61 = vadd.f32 %v2370_v13, %v5008_v1  ;;  %v2372_v16 = vpop.f32.mrb[107].mxu1 }
 0x735   : > { %3611 = vrcp.f32 %v2540_v34  ;;  %v2340_v11 = vpop.f32.mrb[108].mxu0  ;;  %v2421_v34 = vadd.f32 %v4951_v62, %v2361_v8 }
 0x736   : > { %v3602_v31 = vpop.eup %3601  ;;  %v3019_v54 = vmul.f32 -1.442695, %v2416_v29  ;;  %v2341_v4 = vadd.f32 %v2340_v11, %v4984_v27  ;;  %v2342_v57 = vpop.f32.mrb[109].mxu0 }
 0x737   : > { %v3604_v58 = vpop.eup %3603  ;;  %v2541_v28 = vadd.f32 1.0, %v3602_v31  ;;  %v2375_v43 = vpop.f32.mrb[108].mxu1  ;;  %v2422_v57 = vadd.f32 %v4951_v62, %v2366_v18  ;;  %v3024_v8 = vmul.f32 -1.442695, %v2421_v34 }
 0x738   : > { %3613 = vpow2.f32 %v3019_v54  ;;  %v2417_v33 = vadd.f32 %v4951_v62, %v2341_v4  ;;  %2696 = vperm.xlu0 %3464, %v3604_v58   ;;  %v2376_v48 = vadd.f32 %v2375_v43, %v5012_v3  ;;  %v2377_v12 = vpop.f32.mrb[109].mxu1  ;;  %v2423_v43 = vadd.f32 %v4951_v62, %v2371_v61 }
 0x739   : > { %3615 = vrcp.f32 %v2541_v28  ;;  %v2345_v1 = vpop.f32.mrb[110].mxu0  ;;  %v3025_v18 = vmul.f32 -1.442695, %v2422_v57 }
 0x73a   : > { %v3606_v24 = vpop.eup %3605  ;;  %v3020_v37 = vmul.f32 -1.442695, %v2417_v33  ;;  %v2346_v59 = vadd.f32 %v2345_v1, %v4988_v44  ;;  %v2347_v40 = vpop.f32.mrb[111].mxu0  ;;  %v3026_v61 = vmul.f32 -1.442695, %v2423_v43  ;;  %v2424_v34 = vadd.f32 %v4951_v62, %v2376_v48 }
 0x73b   : > { %v3608_v19 = vpop.eup %3607  ;;  %v2542_v27 = vadd.f32 1.0, %v3606_v24  ;;  %v2380_v13 = vpop.f32.mrb[110].mxu1 }
 0x73c   : > { %3617 = vpow2.f32 %v3020_v37  ;;  %v2418_v29 = vadd.f32 %v4951_v62, %v2346_v59  ;;  %2701 = vperm.xlu1 %3465, %v3608_v19   ;;  %v2381_v16 = vadd.f32 %v2380_v13, %v5016_v17  ;;  %v2382_v3 = vpop.f32.mrb[111].mxu1 }
 0x73d   : > { %3619 = vrcp.f32 %v2542_v27  ;;  %v2350_v11 = vpop.f32.mrb[112].mxu0 }
 0x73e   : > { %v3610_v31 = vpop.eup %3609  ;;  %v3021_v54 = vmul.f32 -1.442695, %v2418_v29  ;;  %v2351_v4 = vadd.f32 %v2350_v11, %v4992_v10  ;;  %v2352_v44 = vpop.f32.mrb[113].mxu0 }
 0x73f   : > { %v3612_v58 = vpop.eup %3611  ;;  %v2543_v28 = vadd.f32 1.0, %v3610_v31  ;;  %v2385_v33 = vpop.f32.mrb[112].mxu1  ;;  %v3027_v31 = vmul.f32 -1.442695, %v2424_v34 }
 0x740   : > { %3621 = vpow2.f32 %v3021_v54  ;;  %v2419_v12 = vadd.f32 %v4951_v62, %v2351_v4  ;;  %2706 = vperm.xlu0 %3464, %v3612_v58   ;;  %v2386_v17 = vadd.f32 %v2385_v33, %v5020_v49  ;;  %v2387_v1 = vpop.f32.mrb[113].mxu1  ;;  %v2425_v49 = vadd.f32 %v4951_v62, %v2381_v16 }
 0x741   : > { %3623 = vrcp.f32 %v2543_v28  ;;  %v2355_v24 = vpop.f32.mrb[114].mxu0 }
 0x742   : > { %v3614_v37 = vpop.eup %3613  ;;  %v3022_v10 = vmul.f32 -1.442695, %v2419_v12  ;;  %v2356_v59 = vadd.f32 %v2355_v24, %v4996_v52  ;;  %v2357_v40 = vpop.f32.mrb[115].mxu0  ;;  %3625 = vpow2.f32 %v3024_v8  ;;  %v3028_v54 = vmul.f32 -1.442695, %v2425_v49 }
 0x743   : > { %v3616_v19 = vpop.eup %3615  ;;  %v2544_v27 = vadd.f32 1.0, %v3614_v37  ;;  %v2426_v4 = vadd.f32 %v4951_v62, %v2386_v17 }
 0x744   : > { %3627 = vpow2.f32 %v3022_v10  ;;  %v2420_v13 = vadd.f32 %v4951_v62, %v2356_v59  ;;  %2711 = vperm.xlu1 %3465, %v3616_v19  }
 0x745   : > { %3629 = vrcp.f32 %v2544_v27  ;;  %v3029_v16 = vmul.f32 -1.442695, %v2426_v4 }
 0x746   : > { %v3618_v29 = vpop.eup %3617  ;;  %v3023_v3 = vmul.f32 -1.442695, %v2420_v13  ;;  %3631 = vpow2.f32 %v3025_v18 }
 0x747   : > { %v3620_v11 = vpop.eup %3619  ;;  %v2545_v52 = vadd.f32 1.0, %v3618_v29  ;;  %3633 = vpow2.f32 %v3026_v61 }
 0x748   : > { %3635 = vpow2.f32 %v3023_v3  ;;  %2716 = vperm.xlu0 %3464, %v3620_v11  }
 0x749   : > { %3637 = vrcp.f32 %v2545_v52 }
 0x74a   : > { %v3622_v48 = vpop.eup %3621  ;;  %3639 = vpow2.f32 %v3027_v31 }
 0x74b   : > { %v3624_v44 = vpop.eup %3623  ;;  %v2546_v57 = vadd.f32 1.0, %v3622_v48  ;;  %3641 = vpow2.f32 %v3028_v54 }
 0x74c   : > { %2721 = vperm.xlu1 %3465, %v3624_v44   ;;  %v3626_v58 = vpop.eup %3625 }
 0x74d   : > { %3643 = vrcp.f32 %v2546_v57  ;;  %v2549_v12 = vadd.f32 1.0, %v3626_v58 }
 0x74e   : > { %v3628_v28 = vpop.eup %3627  ;;  %3645 = vpow2.f32 %v3029_v16 }
 0x74f   : > { %v3630_v8 = vpop.eup %3629  ;;  %v2547_v43 = vadd.f32 1.0, %v3628_v28 }
 0x750   : > { %v3632_v33 = vpop.eup %3631  ;;  %2726 = vperm.xlu0 %3464, %v3630_v8  }
 0x751   : > { %v3634_v1 = vpop.eup %3633  ;;  %3647 = vrcp.f32 %v2547_v43  ;;  %v2550_v37 = vadd.f32 1.0, %v3632_v33 }
 0x752   : > { %v3636_v62 = vpop.eup %3635  ;;  %3649 = vrcp.f32 %v2549_v12  ;;  %v2551_v59 = vadd.f32 1.0, %v3634_v1 }
 0x753   : > { %v3638_v17 = vpop.eup %3637  ;;  %v2548_v24 = vadd.f32 1.0, %v3636_v62 }
 0x754   : > { %2731 = vperm.xlu1 %3465, %v3638_v17   ;;  %v3640_v10 = vpop.eup %3639 }
 0x755   : > { %3651 = vrcp.f32 %v2548_v24  ;;  %v3642_v18 = vpop.eup %3641  ;;  %v2552_v19 = vadd.f32 1.0, %v3640_v10 }
 0x756   : > { %3653 = vrcp.f32 %v2550_v37  ;;  %v2553_v27 = vadd.f32 1.0, %v3642_v18 }
 0x757   : > { %v3644_v40 = vpop.eup %3643  ;;  %3655 = vrcp.f32 %v2551_v59 }
 0x758   : > { %2736 = vperm.xlu0 %3464, %v3644_v40   ;;  %v3646_v61 = vpop.eup %3645  ;;  %3657 = vrcp.f32 %v2552_v19 }
 0x759   : > { %3659 = vrcp.f32 %v2553_v27  ;;  %v2554_v13 = vadd.f32 1.0, %v3646_v61 }
 0x75b   : > { %v3648_v34 = vpop.eup %3647  ;;  %3661 = vrcp.f32 %v2554_v13 }
 0x75c   : > { %2741 = vperm.xlu1 %3465, %v3648_v34   ;;  %v3650_v49 = vpop.eup %3649 }
 0x75f   : > { %v3652_v29 = vpop.eup %3651 }
 0x760   : > { %2751 = vperm.xlu1 %3465, %v3650_v49   ;;  %2746 = vperm.xlu0 %3464, %v3652_v29   ;;  %v3654_v3 = vpop.eup %3653 }
 0x761   : > { %v3656_v11 = vpop.eup %3655 }
 0x762   : > { %v3658_v52 = vpop.eup %3657 }
 0x763   : > { %v3660_v31 = vpop.eup %3659 }
 0x764   : > { %2761 = vperm.xlu1 %3465, %v3656_v11   ;;  %2756 = vperm.xlu0 %3464, %v3654_v3  }
 0x765   : > { %v3662_v54 = vpop.eup %3661 }
 0x768   : > { %2771 = vperm.xlu1 %3465, %v3660_v31   ;;  %2766 = vperm.xlu0 %3464, %v3658_v52  }
 0x76c   : > { %2776 = vperm.xlu0 %3464, %v3662_v54  }
 0x77b   : > { %v2622_v4 = vpop.permute.xlu0 %2621 }
 0x77c   : > { %v2779_v48 = vmul.f32 %v2622_v4, %v4245_v53 }
 0x77e   : > { %2811 = vst.msk [vmem:[%s5054_s14] sm:$0xff] %vm1191_vm1, %v2779_v48 }
 0x77f   : > { %v2627_v44 = vpop.permute.xlu1 %2626 }
 0x780   : > { %v2780_v57 = vmul.f32 %v2627_v44, %v4241_v21 }
 0x782   : > { %2812 = vst.msk [vmem:[%s5054_s14 + $0x8] sm:$0xff] %vm1191_vm1, %v2780_v57 }
 0x783   : > { %v2632_v16 = vpop.permute.xlu1 %2631 }
 0x784   : > { %v2781_v58 = vmul.f32 %v2632_v16, %v4261_v20 }
 0x786   : > { %2813 = vst.msk [vmem:[%s5054_s14 + $0x10] sm:$0xff] %vm1191_vm1, %v2781_v58 }
 0x787   : > { %v2637_v28 = vpop.permute.xlu1 %2636 }
 0x788   : > { %v2782_v8 = vmul.f32 %v2637_v28, %v4253_v38 }
 0x78a   : > { %2814 = vst.msk [vmem:[%s5054_s14 + $0x18] sm:$0xff] %vm1191_vm1, %v2782_v8 }
 0x78b   : > { %v2642_v53 = vpop.permute.xlu1 %2641 }
 0x78c   : > { %v2783_v43 = vmul.f32 %v2642_v53, %v4273_v25 }
 0x78e   : > { %2815 = vst.msk [vmem:[%s5054_s14 + $0x20] sm:$0xff] %vm1191_vm1, %v2783_v43 }
 0x78f   : > { %v2647_v21 = vpop.permute.xlu1 %2646 }
 0x790   : > { %v2784_v33 = vmul.f32 %v2647_v21, %v4269_v60 }
 0x792   : > { %2816 = vst.msk [vmem:[%s5054_s14 + $0x28] sm:$0xff] %vm1191_vm1, %v2784_v33 }
 0x793   : > { %v2652_v20 = vpop.permute.xlu1 %2651 }
 0x794   : > { %v2785_v12 = vmul.f32 %v2652_v20, %v4289_v47 }
 0x796   : > { %2817 = vst.msk [vmem:[%s5054_s14 + $0x30] sm:$0xff] %vm1191_vm1, %v2785_v12 }
 0x797   : > { %v2657_v38 = vpop.permute.xlu1 %2656 }
 0x798   : > { %v2786_v1 = vmul.f32 %v2657_v38, %v4285_v30 }
 0x79a   : > { %2818 = vst.msk [vmem:[%s5054_s14 + $0x38] sm:$0xff] %vm1191_vm1, %v2786_v1 }
 0x79b   : > { %v2662_v25 = vpop.permute.xlu1 %2661 }
 0x79c   : > { %v2787_v62 = vmul.f32 %v2662_v25, %v4301_v36 }
 0x79e   : > { %2819 = vst.msk [vmem:[%s5054_s14 + $0x40] sm:$0xff] %vm1191_vm1, %v2787_v62 }
 0x79f   : > { %v2667_v60 = vpop.permute.xlu0 %2666 }
 0x7a0   : > { %v2788_v17 = vmul.f32 %v2667_v60, %v4297_v63 }
 0x7a2   : > { %2820 = vst.msk [vmem:[%s5054_s14 + $0x48] sm:$0xff] %vm1191_vm1, %v2788_v17 }
 0x7a3   : > { %v2672_v47 = vpop.permute.xlu1 %2671 }
 0x7a4   : > { %v2789_v24 = vmul.f32 %v2672_v47, %v4313_v7 }
 0x7a6   : > { %2821 = vst.msk [vmem:[%s5054_s14 + $0x50] sm:$0xff] %vm1191_vm1, %v2789_v24 }
 0x7a7   : > { %v2677_v30 = vpop.permute.xlu0 %2676 }
 0x7a8   : > { %v2790_v37 = vmul.f32 %v2677_v30, %v4309_v56 }
 0x7aa   : > { %2822 = vst.msk [vmem:[%s5054_s14 + $0x58] sm:$0xff] %vm1191_vm1, %v2790_v37 }
 0x7ab   : > { %v2682_v36 = vpop.permute.xlu1 %2681 }
 0x7ac   : > { %v2791_v10 = vmul.f32 %v2682_v36, %v4325_v39 }
 0x7ae   : > { %2823 = vst.msk [vmem:[%s5054_s14 + $0x60] sm:$0xff] %vm1191_vm1, %v2791_v10 }
 0x7af   : > { %v2687_v63 = vpop.permute.xlu0 %2686 }
 0x7b0   : > { %v2792_v59 = vmul.f32 %v2687_v63, %v4321_v9 }
 0x7b2   : > { %2824 = vst.msk [vmem:[%s5054_s14 + $0x68] sm:$0xff] %vm1191_vm1, %v2792_v59 }
 0x7b3   : > { %v2692_v7 = vpop.permute.xlu1 %2691 }
 0x7b4   : > { %v2793_v18 = vmul.f32 %v2692_v7, %v4337_v14 }
 0x7b6   : > { %2825 = vst.msk [vmem:[%s5054_s14 + $0x70] sm:$0xff] %vm1191_vm1, %v2793_v18 }
 0x7b7   : > { %v2697_v56 = vpop.permute.xlu0 %2696 }
 0x7b8   : > { %v2794_v40 = vmul.f32 %v2697_v56, %v4333_v32 }
 0x7ba   : > { %2826 = vst.msk [vmem:[%s5054_s14 + $0x78] sm:$0xff] %vm1191_vm1, %v2794_v40 }
 0x7bb   : > { %v2702_v39 = vpop.permute.xlu1 %2701 }
 0x7bc   : > { %v2795_v19 = vmul.f32 %v2702_v39, %v4349_v42 }
 0x7be   : > { %2827 = vst.msk [vmem:[%s5054_s14 + $0x80] sm:$0xff] %vm1191_vm1, %v2795_v19 }
 0x7bf   : > { %v2707_v9 = vpop.permute.xlu0 %2706 }
 0x7c0   : > { %v2796_v27 = vmul.f32 %v2707_v9, %v4345_v15 }
 0x7c2   : > { %2828 = vst.msk [vmem:[%s5054_s14 + $0x88] sm:$0xff] %vm1191_vm1, %v2796_v27 }
 0x7c3   : > { %v2712_v14 = vpop.permute.xlu1 %2711 }
 0x7c4   : > { %v2797_v61 = vmul.f32 %v2712_v14, %v4361_v46 }
 0x7c6   : > { %2829 = vst.msk [vmem:[%s5054_s14 + $0x90] sm:$0xff] %vm1191_vm1, %v2797_v61 }
 0x7c7   : > { %v2717_v32 = vpop.permute.xlu0 %2716 }
 0x7c8   : > { %v2798_v34 = vmul.f32 %v2717_v32, %v4357_v5 }
 0x7ca   : > { %2830 = vst.msk [vmem:[%s5054_s14 + $0x98] sm:$0xff] %vm1191_vm1, %v2798_v34 }
 0x7cb   : > { %v2722_v42 = vpop.permute.xlu1 %2721 }
 0x7cc   : > { %v2799_v13 = vmul.f32 %v2722_v42, %v4373_v6 }
 0x7ce   : > { %2831 = vst.msk [vmem:[%s5054_s14 + $0xa0] sm:$0xff] %vm1191_vm1, %v2799_v13 }
 0x7cf   : > { %v2727_v15 = vpop.permute.xlu0 %2726 }
 0x7d0   : > { %v2800_v49 = vmul.f32 %v2727_v15, %v4369_v55 }
 0x7d2   : > { %2832 = vst.msk [vmem:[%s5054_s14 + $0xa8] sm:$0xff] %vm1191_vm1, %v2800_v49 }
 0x7d3   : > { %v2732_v46 = vpop.permute.xlu1 %2731 }
 0x7d4   : > { %v2801_v29 = vmul.f32 %v2732_v46, %v4385_v26 }
 0x7d6   : > { %2833 = vst.msk [vmem:[%s5054_s14 + $0xb0] sm:$0xff] %vm1191_vm1, %v2801_v29 }
 0x7d7   : > { %v2737_v5 = vpop.permute.xlu0 %2736 }
 0x7d8   : > { %v2802_v3 = vmul.f32 %v2737_v5, %v4381_v51 }
 0x7da   : > { %2834 = vst.msk [vmem:[%s5054_s14 + $0xb8] sm:$0xff] %vm1191_vm1, %v2802_v3 }
 0x7db   : > { %v2742_v6 = vpop.permute.xlu1 %2741 }
 0x7dc   : > { %v2803_v11 = vmul.f32 %v2742_v6, %v4397_v23 }
 0x7de   : > { %2835 = vst.msk [vmem:[%s5054_s14 + $0xc0] sm:$0xff] %vm1191_vm1, %v2803_v11 }
 0x7df   : > { %v2752_v55 = vpop.permute.xlu1 %2751  ;;  %v2747_v52 = vpop.permute.xlu0 %2746 }
 0x7e0   : > { %v2805_v26 = vmul.f32 %v2752_v55, %v4409_v41  ;;  %v2804_v31 = vmul.f32 %v2747_v52, %v4393_v0 }
 0x7e2   : > { %2837 = vst.msk [vmem:[%s5054_s14 + $0xd0] sm:$0xff] %vm1191_vm1, %v2805_v26  ;;  %2836 = vst.msk [vmem:[%s5054_s14 + $0xc8] sm:$0xff] %vm1191_vm1, %v2804_v31 }
 0x7e3   : > { %v2762_v51 = vpop.permute.xlu1 %2761  ;;  %v2757_v54 = vpop.permute.xlu0 %2756 }
 0x7e4   : > { %v2807_v4 = vmul.f32 %v2762_v51, %v4421_v22  ;;  %v2806_v23 = vmul.f32 %v2757_v54, %v4405_v2 }
 0x7e6   : > { %2839 = vst.msk [vmem:[%s5054_s14 + $0xe0] sm:$0xff] %vm1191_vm1, %v2807_v4  ;;  %2838 = vst.msk [vmem:[%s5054_s14 + $0xd8] sm:$0xff] %vm1191_vm1, %v2806_v23 }
 0x7e7   : > { %v2772_v48 = vpop.permute.xlu1 %2771  ;;  %v2767_v44 = vpop.permute.xlu0 %2766 }
 0x7e8   : > { %v2809_v41 = vmul.f32 %v2772_v48, %v4433_v45  ;;  %v2808_v0 = vmul.f32 %v2767_v44, %v4417_v35 }
 0x7ea   : > { %2841 = vst.msk [vmem:[%s5054_s14 + $0xf0] sm:$0xff] %vm1191_vm1, %v2809_v41  ;;  %2840 = vst.msk [vmem:[%s5054_s14 + $0xe8] sm:$0xff] %vm1191_vm1, %v2808_v0 }
 0x7eb   : > { %v2777_v57 = vpop.permute.xlu0 %2776 }
 0x7ec   : > { %v2810_v16 = vmul.f32 %v2777_v57, %v4429_v50 }
 0x7ee   : > { %2842 = vst.msk [vmem:[%s5054_s14 + $0xf8] sm:$0xff] %vm1191_vm1, %v2810_v16 }
 0x7ef PF: > { %s24_s23 = sadd.s32 1, %s3669_s23  }
 0x7f0   : > { %p21_p4 = scmp.ge.s32.totalorder %s24_s23, 4  }
 0x7f2   :  { %23 = sbr.rel (!%p21_p4) target bundleno = 3 (0x3), region = 98 }

// kernel: agentnn_forward.3
= control target key start
LH: loop header
LB: loop body
LE: loop exit
PB: predicated region body
PF: predicated region fallthrough
CT: control target
= control target key end

     0   :  { %s6501_s0 = inlined_call_operand.vmem [shape: bf16[2,36,512], index: 0, kind: input, shape index: {}]   ;;  %s6502_s1 = inlined_call_operand.vmem [shape: bf16[512,64], index: 1, kind: input, shape index: {}]   ;;  %s6503_s2 = inlined_call_operand.vmem [shape: f32[1,64], index: 2, kind: input, shape index: {}]   ;;  %s6504_s3 = inlined_call_operand.vmem [shape: f32[4,36], index: 3, kind: input, shape index: {}]   ;;  %s6505_s4 = inlined_call_operand.vmem [shape: f32[36,4], index: 4, kind: input, shape index: {}]   ;;  %s6506_s5 = inlined_call_operand.vmem [shape: f32[64,4], index: 5, kind: input, shape index: {}]   ;;  %s6507_s6 = inlined_call_operand.vmem [shape: f32[1,4], index: 6, kind: input, shape index: {}]   ;;  %s6508_s7 = inlined_call_operand.vmem [shape: f32[4,64], index: 7, kind: input, shape index: {}]   ;;  %s6509_s8 = inlined_call_operand.vmem [shape: f32[1,64], index: 8, kind: input, shape index: {}]   ;;  %s6510_s9 = inlined_call_operand.vmem [shape: f32[36,36], index: 9, kind: input, shape index: {}]   ;;  %s6511_s10 = inlined_call_operand.vmem [shape: f32[36,36], index: 10, kind: input, shape index: {}]   ;;  %s6512_s11 = inlined_call_operand.<no memory space> [shape: f32[1,1], index: 11, kind: input, shape index: {}]   ;;  %s6513_s12 = inlined_call_operand.vmem [shape: f32[36,36], index: 12, kind: input, shape index: {}]   ;;  %s6514_s13 = inlined_call_operand.vmem [shape: bf16[576,64], index: 13, kind: input, shape index: {}]   ;;  %s6515_s14 = inlined_call_operand.vmem [shape: f32[1,64], index: 14, kind: input, shape index: {}]   ;;  %s6516_s15 = inlined_call_operand.vmem [shape: f32[64,4], index: 15, kind: input, shape index: {}]   ;;  %s6517_s16 = inlined_call_operand.vmem [shape: f32[1,4], index: 16, kind: input, shape index: {}]   ;;  %s6518_s17 = inlined_call_operand.vmem [shape: f32[4,64], index: 17, kind: input, shape index: {}]   ;;  %s6519_s18 = inlined_call_operand.vmem [shape: f32[1,64], index: 18, kind: input, shape index: {}]   ;;  %s6520_s22 = inlined_call_operand.vmem [shape: bf16[64,512], index: 22, kind: input, shape index: {}]   ;;  %s6521_s23 = inlined_call_operand.vmem [shape: f32[1,512], index: 23, kind: input, shape index: {}]   ;;  %s6522_s24 = inlined_call_operand.vmem [shape: bf16[512,6], index: 24, kind: input, shape index: {}]   ;;  %s6523_s25 = inlined_call_operand.vmem [shape: f32[1,6], index: 25, kind: input, shape index: {}]   ;;  %s6524_s26 = inlined_call_operand.hbm [shape: f32[2,4,6], index: 26, kind: output, shape index: {}]   ;;  %s6525_s19 = inlined_call_operand.<no memory space> [shape: f32[1,1], index: 19, kind: input, shape index: {}]   ;;  %s6526_s20 = inlined_call_operand.<no memory space> [shape: f32[1,1], index: 20, kind: input, shape index: {}]   ;;  %s6527_s21 = inlined_call_operand.<no memory space> [shape: f32[1,1], index: 21, kind: input, shape index: {}]  }
   0x1   :  { %6539 = sst [smem:[#allocation13_spill]] %s6501_s0  ;;  %v31_v0 = vstv %s6512_s11  ;;  %v33_v1 = vstv %s6525_s19  ;;  %v35_v2 = vstv %s6526_s20  ;;  %v37_v3 = vstv %s6527_s21 }
   0x2   :  { %6540 = sst [smem:[#allocation14_spill]] %s6502_s1  ;;  %32 = vst [vmem:[#allocation2] sm:$0x1] %v31_v0  ;;  %34 = vst [vmem:[#allocation3] sm:$0x1] %v33_v1 }
   0x3   :  { %6541 = sst [smem:[#allocation15_spill]] %s6503_s2  ;;  %36 = vst [vmem:[#allocation4] sm:$0x1] %v35_v2  ;;  %38 = vst [vmem:[#allocation5] sm:$0x1] %v37_v3 }
   0x4   :  { %6542 = sst [smem:[#allocation16_spill]] %s6504_s3 }
   0x5   :  { %6543 = sst [smem:[#allocation17_spill]] %s6505_s4 }
   0x6   :  { %6544 = sst [smem:[#allocation18_spill]] %s6506_s5 }
   0x7   :  { %6545 = sst [smem:[#allocation19_spill]] %s6507_s6 }
   0x8   :  { %6546 = sst [smem:[#allocation20_spill]] %s6508_s7 }
   0x9   :  { %6547 = sst [smem:[#allocation21_spill]] %s6509_s8 }
   0xa   :  { %6548 = sst [smem:[#allocation22_spill]] %s6510_s9 }
   0xb   :  { %6549 = sst [smem:[#allocation23_spill]] %s6511_s10 }
   0xc   :  { %39 = vsyncpa [#allocation7], 0 }
   0xd   :  { %41 = vsyncpa [#allocation7 + $0x1], 0  ;;  %s5575_s9 = smov 0   ;;  %s5577_s11 = smov 0  }
   0xe   :  { %s5579_s30 = smov 0   ;;  %s5581_s19 = smov 0  }
   0xf LB: > { %6550 = sst [smem:[#allocation9_spill]] %s5417_s30  ;;  %s5596_s20 = sadd.s32 4294967295, %s5421_s19   ;;  %s5421_s19 = sphi %s5581_s19, %s6569_s19   ;;  %s5417_s30 = sphi %s5579_s30, %s6571_s30   ;;  %s5413_s11 = sphi %s5577_s11, %s6573_s11   ;;  %s5409_s9 = sphi %s5575_s9, %s6572_s9  }
  0x10   : > { %s4180_s21 = sadd.s32 4294967294, %s5421_s19   ;;  %s5600_s2 = sadd.s32 1, %s5421_s19  }
  0x11   : > { %6551 = sst [smem:[#allocation10_spill]] %s5600_s2  ;;  %s605_s5 = sadd.s32 1, %s5417_s30 }
  0x12   : > { %s602_s10 = ssub.s32 %s5421_s19, %s5600_s2  ;;  %p615_p0 = scmp.ne.s32.totalorder %s5417_s30, %s5413_s11 }
  0x13   : > { %p603_p1 = scmp.eq.s32.totalorder %s602_s10, 0  ;;  %p616_p2 = scmp.eq.s32.totalorder %s5596_s20, 1 }
  0x14   : > { %p621_p3 = scmp.ne.s32.totalorder %s5413_s11, %s5409_s9  ;;  %p622_p4 = scmp.eq.s32.totalorder %s4180_s21, 1 }
  0x15   : > { %s5611_s6 = scalar_select %p603_p1, %s5417_s30, %s605_s5  }
  0x16   : > { %p5613_p5 = por %p616_p2, %p615_p0  ;;  %p5617_p6 = por %p622_p4, %p621_p3 }
  0x17   : > { %6552 = sst [smem:[#allocation11_spill]] %s5611_s6  ;;  %p4183_p7 = scmp.ge.s32.totalorder %s5421_s19, 1 }
  0x18   : > { %s6554_s27 = scalar_select %p5617_p6, 1, 0 }
  0x19   : > { %p723_p8 = scmp.lt.s32.totalorder %s5421_s19, 3 }
  0x1a   : > { %6555 = sst [smem:[#allocation12_spill]] %s6554_s27 }
  0x1b   : > { %p724_p9 = pnand %p4183_p7, %p723_p8 }
  0x1c   : > { %s6556_s28 = sld [smem:[#allocation14_spill]] (!%p724_p9)  ;;  %p793_p10 = scmp.lt.s32.totalorder (!%p724_p9), %s5596_s20, 1  ;;  %v5423_v50 = vmov (!%p724_p9), 0.0|0.0   ;;  %vm5424_vm0 = vmmov (!%p724_p9), 0   ;;  %v5425_v51 = vmov (!%p724_p9), 0.0   ;;  %vm1275_vm1 = vcmask (!%p724_p9), 1043456  }
  0x1d   : > { %727 = sbr.rel (%p724_p9) target bundleno = 3534 (0xdce), region = 124  ;;  %s6557_s2 = sld [smem:[#allocation13_spill]] (!%p724_p9)  ;;  %vm1271_vm2 = vcmask (!%p724_p9), 293888   ;;  %vm1355_vm3 = vcmask (!%p724_p9), 523264   ;;  %vm1436_vm4 = vcmask (!%p724_p9), 31744   ;;  %vm1644_vm5 = vcmask (!%p724_p9), 519168  }
  0x1e   : > { %s6560_s0 = sld [smem:[#allocation16_spill]] (!%p724_p9)  ;;  %s6562_s10 = sld [smem:[#allocation19_spill]] (!%p724_p9)  ;;  %vm4105_vm6 = vcmask (!%p724_p9), 44032  }
  0x1f   : > { %s6567_s27 = sld [smem:[#allocation22_spill]] (!%p724_p9)  ;;  %s790_s3 = sand.u32 (!%p724_p9), 1, %s5413_s11  }
  0x20   : > { %s4184_s7 = sshll.u32 (!%p724_p9), %s790_s3, 2 }
  0x21   : > { %s792_s5 = scalar_lea.vmem (!%p724_p9), [#allocation6], %s4184_s7 }
  0x22   : > { %v5187_v4 = vld [vmem:[%s6556_s28 + $0x40] sm:$0xff] (!%p724_p9)   ;;  %v5191_v8 = vld [vmem:[%s6556_s28 + $0x48] sm:$0xff] (!%p724_p9)   ;;  %v5195_v12 = vld [vmem:[%s6556_s28 + $0x50] sm:$0xff] (!%p724_p9)  }
  0x23   : > { %v5188_v5 = vld [vmem:[%s6556_s28 + $0xc0] sm:$0xff] (!%p724_p9)   ;;  %4392 = vmatprep.subr.bf16.mxu0 (!%p724_p9), %v5187_v4  ;;  %v5192_v9 = vld [vmem:[%s6556_s28 + $0xc8] sm:$0xff] (!%p724_p9)   ;;  %v5196_v13 = vld [vmem:[%s6556_s28 + $0xd0] sm:$0xff] (!%p724_p9)  }
  0x24   : > { %v5189_v6 = vld [vmem:[%s6556_s28] sm:$0xff]   ;;  %4426 = vmatprep.subr.bf16.mxu1 %v5188_v5  ;;  %v5193_v10 = vld [vmem:[%s6556_s28 + $0x8] sm:$0xff]   ;;  %v5197_v14 = vld [vmem:[%s6556_s28 + $0x10] sm:$0xff]   ;;  %s794_s29 = scalar_select %p793_p10, %s5596_s20, 1 }
  0x25   : > { %v5190_v7 = vld [vmem:[%s6556_s28 + $0x80] sm:$0xff]   ;;  %4393 = vmatpush3.bf16.msra.mxu0 %v5189_v6  ;;  %v5194_v11 = vld [vmem:[%s6556_s28 + $0x88] sm:$0xff]   ;;  %v5198_v15 = vld [vmem:[%s6556_s28 + $0x90] sm:$0xff]  }
  0x26   : > { %4427 = vmatpush3.bf16.msra.mxu1 %v5190_v7  ;;  %4394 = vmatprep.subr.bf16.mxu0 %v5191_v8  ;;  %v5199_v16 = vld [vmem:[%s6556_s28 + $0x58] sm:$0xff]   ;;  %v5203_v20 = vld [vmem:[%s6556_s28 + $0x60] sm:$0xff]   ;;  %v5207_v24 = vld [vmem:[%s6556_s28 + $0x68] sm:$0xff]   ;;  %s5141_s4 = smul.u32 80, %s794_s29  ;;  %s6559_s29 = sld [smem:[#allocation15_spill]] }
  0x27   : > { %4428 = vmatprep.subr.bf16.mxu1 %v5192_v9  ;;  %v5200_v17 = vld [vmem:[%s6556_s28 + $0xd8] sm:$0xff]   ;;  %v5204_v21 = vld [vmem:[%s6556_s28 + $0xe0] sm:$0xff]   ;;  %v5208_v25 = vld [vmem:[%s6556_s28 + $0xe8] sm:$0xff]  }
  0x28   : > { %v5201_v18 = vld [vmem:[%s6556_s28 + $0x18] sm:$0xff]   ;;  %v5205_v22 = vld [vmem:[%s6556_s28 + $0x20] sm:$0xff]   ;;  %v5209_v26 = vld [vmem:[%s6556_s28 + $0x28] sm:$0xff]   ;;  %s797_s30 = scalar_lea.vmem %s6557_s2, %s5141_s4  ;;  %s6558_s4 = sld [smem:[#allocation18_spill]] }
  0x29   : > { %4395 = vmatpush3.bf16.msra.mxu0 %v5193_v10  ;;  %v5202_v19 = vld [vmem:[%s6556_s28 + $0x98] sm:$0xff]   ;;  %v5206_v23 = vld [vmem:[%s6556_s28 + $0xa0] sm:$0xff]   ;;  %v5210_v27 = vld [vmem:[%s6556_s28 + $0xa8] sm:$0xff]   ;;  %s6561_s2 = sld [smem:[#allocation20_spill]] }
  0x2a   : > { %4429 = vmatpush3.bf16.msra.mxu1 %v5194_v11  ;;  %4396 = vmatprep.subr.bf16.mxu0 %v5195_v12  ;;  %v5211_v28 = vld [vmem:[%s6556_s28 + $0x70] sm:$0xff]   ;;  %v5215_v32 = vld [vmem:[%s6556_s28 + $0x78] sm:$0xff]   ;;  %v807_v42 = vld [vmem:[%s797_s30 + $0x40] sm:$0x33] }
  0x2b   : > { %4430 = vmatprep.subr.bf16.mxu1 %v5196_v13  ;;  %v5212_v29 = vld [vmem:[%s6556_s28 + $0xf0] sm:$0xff]   ;;  %v5216_v33 = vld [vmem:[%s6556_s28 + $0xf8] sm:$0xff]   ;;  %v808_v43 = vld [vmem:[%s797_s30 + $0x48] sm:$0x33]  ;;  %v4196_v46 = vcombine.high %v807_v42, %v807_v42  ;;  %v4195_v48 = vcombine.low %v807_v42, %v807_v42 }
  0x2c   : > { %v5213_v30 = vld [vmem:[%s6556_s28 + $0x30] sm:$0xff]   ;;  %v5217_v34 = vld [vmem:[%s6556_s28 + $0x38] sm:$0xff]   ;;  %v4198_v47 = vcombine.high %v808_v43, %v808_v43  ;;  %v4197_v49 = vcombine.low %v808_v43, %v808_v43  ;;  %v4186_v2 = vld [vmem:[%s6559_s29] ss:$0 sm:$0xff]  ;;  %s6563_s29 = sld [smem:[#allocation21_spill]] }
  0x2d   : > { %4397 = vmatpush3.bf16.msra.mxu0 %v5197_v14  ;;  %v5214_v31 = vld [vmem:[%s6556_s28 + $0xb0] sm:$0xff]   ;;  %v5218_v35 = vld [vmem:[%s6556_s28 + $0xb8] sm:$0xff]  }
  0x2e   : > { %4431 = vmatpush3.bf16.msra.mxu1 %v5198_v15  ;;  %4398 = vmatprep.subr.bf16.mxu0 %v5199_v16  ;;  %v5219_v36 = vld [vmem:[%s797_s30] ss:$16 sps:$4 sm:$0xff]   ;;  %v5221_v37 = vld [vmem:[%s797_s30 + $0x4] ss:$16 sps:$4 sm:$0xff]   ;;  %v5222_v38 = vld [vmem:[%s797_s30 + $0x8] ss:$16 sps:$4 sm:$0xff]  }
  0x2f   : > { %4432 = vmatprep.subr.bf16.mxu1 %v5200_v17  ;;  %v5224_v39 = vld [vmem:[%s797_s30 + $0xc] ss:$16 sps:$4 sm:$0xff]   ;;  %1158 = vmatprep.mubr.bf16.mxu0 %v5221_v37  ;;  %v5225_v40 = vld [vmem:[%s797_s30 + $0x24] ss:$16 sps:$4 sm:$0xff]   ;;  %v5229_v44 = vld [vmem:[%s797_s30 + $0x20] ss:$16 sps:$4 sm:$0xff]  }
  0x30   : > { %1214 = vmatprep.mubr.bf16.mxu1 %v5224_v39  ;;  %v5227_v41 = vld [vmem:[%s797_s30 + $0x2c] ss:$16 sps:$4 sm:$0xff]   ;;  %v5230_v45 = vld [vmem:[%s797_s30 + $0x28] ss:$16 sps:$4 sm:$0xff]   ;;  %v1249_v52 = vld [vmem:[%s6558_s4] sm:$0xff]  ;;  %s6565_s30 = sld [smem:[#allocation23_spill]] }
  0x31   : > { %4399 = vmatpush3.bf16.msra.mxu0 %v5201_v18  ;;  %v1250_v53 = vld [vmem:[%s6558_s4 + $0x8] sm:$0xff]  ;;  %v1251_v54 = vld [vmem:[%s6558_s4 + $0x10] sm:$0xff]  ;;  %v1252_v56 = vld [vmem:[%s6558_s4 + $0x18] sm:$0xff] }
  0x32   : > { %4433 = vmatpush3.bf16.msra.mxu1 %v5202_v19  ;;  %4400 = vmatprep.subr.bf16.mxu0 %v5203_v20  ;;  %v5017_v55 = vpack.c.bf16 %v1250_v53, %v1249_v52  ;;  %v5020_v57 = vpack.c.bf16 %v1252_v56, %v1251_v54  ;;  %v1253_v58 = vld [vmem:[%s6558_s4 + $0x20] sm:$0xff]  ;;  %v1254_v59 = vld [vmem:[%s6558_s4 + $0x28] sm:$0xff]  ;;  %v1255_v61 = vld [vmem:[%s6558_s4 + $0x30] sm:$0xff] }
  0x33   : > { %4434 = vmatprep.subr.bf16.mxu1 %v5204_v21  ;;  %v5023_v60 = vpack.c.bf16 %v1254_v59, %v1253_v58  ;;  %v1256_v62 = vld [vmem:[%s6558_s4 + $0x38] sm:$0xff]  ;;  %v1243_v54 = vld [vmem:[%s6560_s0] sm:$0xf]  ;;  %s6564_s0 = sld [smem:[#allocation17_spill]] }
  0x34   : > { %v5026_v63 = vpack.c.bf16 %v1256_v62, %v1255_v61  ;;  %v4233_v58 = vld [vmem:[%s6562_s10] ss:$0 sm:$0xff] }
  0x35   : > { %4401 = vmatpush3.bf16.msra.mxu0 %v5205_v22 }
  0x36   : > { %4435 = vmatpush3.bf16.msra.mxu1 %v5206_v23  ;;  %4402 = vmatprep.subr.bf16.mxu0 %v5207_v24  ;;  %s6566_s21 = smov %s6565_s30 }
  0x37   : > { %4436 = vmatprep.subr.bf16.mxu1 %v5208_v25 }
  0x39   : > { %4403 = vmatpush3.bf16.msra.mxu0 %v5209_v26 }
  0x3a   : > { %4437 = vmatpush3.bf16.msra.mxu1 %v5210_v27  ;;  %4404 = vmatprep.subr.bf16.mxu0 %v5211_v28 }
  0x3b   : > { %4438 = vmatprep.subr.bf16.mxu1 %v5212_v29 }
  0x3d   : > { %4405 = vmatpush3.bf16.msra.mxu0 %v5213_v30 }
  0x3e   : > { %4439 = vmatpush3.bf16.msra.mxu1 %v5214_v31  ;;  %4406 = vmatprep.subr.bf16.mxu0 %v5215_v32 }
  0x3f   : > { %4440 = vmatprep.subr.bf16.mxu1 %v5216_v33 }
  0x41   : > { %4407 = vmatpush3.bf16.msra.mxu0 %v5217_v34 }
  0x42   : > { %4441 = vmatpush3.bf16.msra.mxu1 %v5218_v35  ;;  %5010 = vmatprep.subr.bf16.mxu0 %v5423_v50 }
  0x43   : > { %5016 = vmatprep.subr.bf16.mxu1 %v5423_v50 }
  0x44   : > { %1159 = vmatmul.mubr.bf16.vlgmr.msra.gmra.mrb[0].mxu0 %v5219_v36 }
  0x45   : > { %1215 = vmatmul.mubr.bf16.vlgmr.msra.gmra.mrb[0].mxu1 %v5222_v38  ;;  %1166 = vmatprep.mubr.bf16.mxu0 %v5225_v40 }
  0x46   : > { %1222 = vmatprep.mubr.bf16.mxu1 %v5227_v41  ;;  %5018 = vmatpush3.bf16.msra.mxu1 %v5017_v55 }
  0x47   : > { %5019 = vmatprep.subr.bf16.mxu1 %v5423_v50 }
  0x4a   : > { %5021 = vmatpush3.bf16.msra.mxu1 %v5020_v57  ;;  %v1258_v57 = vld [vmem:[%s6561_s2] sm:$0xf]  ;;  %s4121_s2 = sshll.u32 %s792_s5, 4  ;;  %s6461_s2 = int_to_ptr.vmem [resolvable:$true] %s4121_s2 }
  0x4b   : > { %5022 = vmatprep.subr.bf16.mxu1 %v5423_v50  ;;  %s5359_s7 = scalar_lea.vmem %s6461_s2, 64 }
  0x4c   : > { %1167 = vmatmul.mubr.bf16.gmra.mrb[4].mxu0 %v5229_v44  ;;  %p5360_p11 = scmp.ne.s32.totalorder %s6461_s2, %s5359_s7 }
  0x4d   : > { %1223 = vmatmul.mubr.bf16.gmra.mrb[4].mxu1 %v5230_v45  ;;  %1174 = vmatprep.mubr.bf16.mxu0 %v4196_v46 }
  0x4e   : > { %1230 = vmatprep.mubr.bf16.mxu1 %v4198_v47  ;;  %5024 = vmatpush3.bf16.msra.mxu1 %v5023_v60  ;;  %p5361_p12 = pnand %p5360_p11, %p5613_p5 }
  0x4f   : > { %5025 = vmatprep.subr.bf16.mxu1 %v5423_v50 }
  0x50   : > { %p5362_p13 = pneg %p5361_p12 }
  0x52   : > { %5027 = vmatpush3.bf16.msra.mxu1 %v5026_v63  ;;  %v4235_v63 = vld [vmem:[%s6563_s29] ss:$0 sm:$0xff]  ;;  %s5427_s29 = smov [#allocation6]  }
  0x53   : > { %4689 = vmatprep.subr.mxu1 %v5425_v51  ;;  %s5363_s8 = sshll.u32 %s5427_s29, 4  ;;  %s5364_s8 = int_to_ptr.vmem [resolvable:$false] %s5363_s8 }
  0x54   : > { %1175 = vmatmul.mubr.bf16.gmra.mrb[8].mxu0 %v4195_v48  ;;  %s5365_s4 = scalar_lea.vmem %s5364_s8, 128  ;;  %p5366_p0 = scmp.lt.s32.totalorder %s6461_s2, %s5364_s8 }
  0x55   : > { %1231 = vmatmul.mubr.bf16.gmra.mrb[8].mxu1 %v4197_v49  ;;  %4667 = vmatprep.mubr.msk.f32.mxu0 %vm5424_vm0, %v5425_v51  ;;  %p5367_p1 = scmp.lt.s32.totalorder %s5365_s4, %s5359_s7 }
  0x56   : > { %4686 = vmatprep.mubr.msk.f32.mxu1 %vm5424_vm0, %v5425_v51 }
  0x57   : > { %p5368_p2 = por %p5367_p1, %p5366_p0 }
  0x59   : > { %p5369_p3 = pnand %p5368_p2, %p5362_p13 }
 0x117   : > { %v4408_v0 = vpop.f32.mrb[0].mxu0 }
 0x118   : > { %v4442_v1 = vpop.f32.mrb[0].mxu1  ;;  %v4409_v3 = vpop.f32.mrb[1].mxu0 }
 0x119   : > { %v4410_v4 = vadd.f32 %v4409_v3, %v4408_v0  ;;  %v4443_v5 = vpop.f32.mrb[1].mxu1  ;;  %v4411_v6 = vpop.f32.mrb[2].mxu0 }
 0x11a   : > { %v4444_v7 = vadd.f32 %v4443_v5, %v4442_v1  ;;  %v4445_v8 = vpop.f32.mrb[2].mxu1  ;;  %v4412_v9 = vpop.f32.mrb[3].mxu0 }
 0x11b   : > { %v1161_v10 = vadd.f32 %v4410_v4, %v4186_v2  ;;  %v4413_v11 = vadd.f32 %v4412_v9, %v4411_v6  ;;  %v4446_v12 = vpop.f32.mrb[3].mxu1  ;;  %v1244_v6 = vld [vmem:[%s6564_s0] sm:$0xff]  ;;  %v1245_v9 = vld [vmem:[%s6564_s0 + $0x8] sm:$0xff] }
 0x11c   : > { %v4447_v13 = vadd.f32 %v4446_v12, %v4445_v8 }
 0x11d   : > { %v5761_v14 = vadd.f32 %v4444_v7, %v1161_v10  ;;  %v1164_v15 = vadd.f32 %v4413_v11, %v4186_v2  ;;  %v1246_v7 = vld [vmem:[%s6564_s0 + $0x10] sm:$0xff]  ;;  %v1247_v10 = vld [vmem:[%s6564_s0 + $0x18] sm:$0xff]  ;;  %v1248_v11 = vld [vmem:[%s6564_s0 + $0x20] sm:$0xf] }
 0x11f   : > { %v5763_v16 = vadd.f32 %v4447_v13, %v1164_v15  ;;  %v4414_v17 = vpop.f32.mrb[4].mxu0  ;;  %v1238_v20 = vmax.f32 %v5761_v14, 0.0 }
 0x120   : > { %v4448_v18 = vpop.f32.mrb[4].mxu1  ;;  %v4415_v19 = vpop.f32.mrb[5].mxu0 }
 0x121   : > { %v1239_v21 = vmax.f32 %v5763_v16, 0.0  ;;  %v4416_v22 = vadd.f32 %v4415_v19, %v4414_v17  ;;  %v4449_v23 = vpop.f32.mrb[5].mxu1  ;;  %v4417_v24 = vpop.f32.mrb[6].mxu0 }
 0x122   : > { %v4450_v25 = vadd.f32 %v4449_v23, %v4448_v18  ;;  %v4451_v26 = vpop.f32.mrb[6].mxu1  ;;  %v4418_v27 = vpop.f32.mrb[7].mxu0 }
 0x123   : > { %v5011_v28 = vpack.c.bf16 %v1239_v21, %v1238_v20  ;;  %v1169_v29 = vadd.f32 %v4416_v22, %v4186_v2  ;;  %v4419_v30 = vadd.f32 %v4418_v27, %v4417_v24  ;;  %v4452_v31 = vpop.f32.mrb[7].mxu1 }
 0x124   : > { %v4453_v32 = vadd.f32 %v4452_v31, %v4451_v26 }
 0x125   : > { %v5771_v33 = vadd.f32 %v4450_v25, %v1169_v29  ;;  %v1172_v34 = vadd.f32 %v4419_v30, %v4186_v2  ;;  %5012 = vmatpush3.bf16.msra.mxu0 %v5011_v28 }
 0x126   : > { %5013 = vmatprep.subr.bf16.mxu0 %v5423_v50 }
 0x127   : > { %v5774_v35 = vadd.f32 %v4453_v32, %v1172_v34  ;;  %v4420_v36 = vpop.f32.mrb[8].mxu0  ;;  %v1240_v39 = vmax.f32 %v5771_v33, 0.0 }
 0x128   : > { %v4421_v37 = vpop.f32.mrb[9].mxu0  ;;  %v4454_v38 = vpop.f32.mrb[8].mxu1 }
 0x129   : > { %v1241_v40 = vmax.f32 %v5774_v35, 0.0  ;;  %v4422_v41 = vadd.f32 %v4421_v37, %v4420_v36  ;;  %v4423_v42 = vpop.f32.mrb[10].mxu0  ;;  %v4455_v43 = vpop.f32.mrb[9].mxu1 }
 0x12a   : > { %v4424_v44 = vpop.f32.mrb[11].mxu0  ;;  %v4456_v45 = vadd.f32 %v4455_v43, %v4454_v38  ;;  %v4457_v46 = vpop.f32.mrb[10].mxu1 }
 0x12b   : > { %v5014_v47 = vpack.c.bf16 %v1241_v40, %v1240_v39  ;;  %v1177_v48 = vadd.f32 %v4422_v41, %v4186_v2  ;;  %v4458_v49 = vpop.f32.mrb[11].mxu1 }
 0x12d   : > { %v5782_v52 = vadd.f32 %v4456_v45, %v1177_v48  ;;  %5015 = vmatpush3.bf16.msra.mxu0 %v5014_v47 }
 0x12e   : > { %4665 = vmatprep.subr.mxu0 %v5425_v51 }
 0x12f   : > { %v1242_v53 = vmax.f32 %v5782_v52, 0.0 }
 0x131   : > { %4666 = vmatpush3.msk.msra.mxu0 %vm1275_vm1, %v1242_v53 }
 0x132   : > { %4668 = vmatmul.mubr.msk.f32.vlgmr.msra.gmra.mrb[12].mxu0 %vm1271_vm2, %v1243_v54  ;;  %4694 = vmatprep.subr.mxu0 %v5425_v51 }
 0x133   : > { %4696 = vmatprep.mubr.msk.f32.mxu0 %vm5424_vm0, %v5425_v51 }
 0x205   : > { %v1345_v55 = vpop.f32.mrb[12].mxu0 }
 0x206   : > { %4687 = vmatmul.mubr.msk.f32.vlgmr.msra.gmra.mrb[12].mxu1 %vm1355_vm3, %v1345_v55  ;;  %v4669_v56 = vpop.f32.mrb[13].mxu0 }
 0x207   : > { %4691 = vmatprep.mubr.msk.f32.mxu1 %vm5424_vm0, %v5425_v51  ;;  %4690 = vmatpush3.msk.msra.mxu1 %vm1275_vm1, %v1258_v57  ;;  %v1265_v57 = vld [vmem:[%s6565_s30] sm:$0xff]  ;;  %s4389_s30 = sshll.u32 %s5596_s20, 6  ;;  %s4108_s20 = scalar_lea.sflag [#allocation7], %s790_s3 }
 0x208   : > { %5106 = vmatprep.subr.mxu1 %v5425_v51  ;;  %s6459_s10 = scalar_lea.hbm %s6524_s26, %s4389_s30 }
 0x2d9   : > { %v1425_v59 = vpop.f32.mrb[12].mxu1 }
 0x2da   : > { %v1426_v60 = vadd.f32 %v4233_v58, %v1425_v59  ;;  %v4688_v61 = vpop.f32.mrb[13].mxu1  ;;  %v1260_v58 = vld [vmem:[%s6567_s27] sm:$0xff] }
 0x2db   : > { %v1261_v61 = vld [vmem:[%s6567_s27 + $0x8] sm:$0xff] }
 0x2dc   : > { %v1429_v62 = vmax.f32 %v1426_v60, 0.0  ;;  %v1266_v60 = vld [vmem:[%s6566_s21 + $0x8] sm:$0xff] }
 0x2de   : > { %4692 = vmatmul.mubr.msk.f32.vlgmr.msra.gmra.mrb[14].mxu1 %vm1436_vm4, %v1429_v62  ;;  %v1267_v62 = vld [vmem:[%s6566_s21 + $0x10] sm:$0xff] }
 0x2df   : > { %4702 = vmatprep.mubr.msk.f32.mxu1 %vm5424_vm0, %v5425_v51 }
 0x3b1   : > { %v1509_v0 = vpop.f32.mrb[14].mxu1 }
 0x3b2   : > { %v1510_v1 = vadd.f32 %v4235_v63, %v1509_v0  ;;  %v4693_v2 = vpop.f32.mrb[15].mxu1  ;;  %v1262_v63 = vld [vmem:[%s6567_s27 + $0x10] sm:$0xff]  ;;  %v1268_v0 = vld [vmem:[%s6566_s21 + $0x18] sm:$0xff] }
 0x3b3   : > { %v1269_v2 = vld [vmem:[%s6566_s21 + $0x20] sm:$0xf] }
 0x3b4   : > { %v4238_v3 = vmul.f32 -1.442695, %v1510_v1  ;;  %v1263_v1 = vld [vmem:[%s6567_s27 + $0x18] sm:$0xff] }
 0x3b6   : > { %5327 = vpow2.f32 %v4238_v3  ;;  %v1264_v3 = vld [vmem:[%s6567_s27 + $0x20] sm:$0xf] }
 0x3c0   : > { %v5328_v4 = vpop.eup %5327 }
 0x3c1   : > { %v1516_v5 = vadd.f32 1.0, %v5328_v4  ;;  %v5426_v4 = vmov 0  }
 0x3c2   : > { %5185 = vset.pattern.permute.xlu0 %v5426_v4  ;;  %5186 = vset.pattern.permute.xlu1 %v5426_v4 }
 0x3c3   : > { %5329 = vrcp.f32 %v1516_v5 }
 0x3cd   : > { %v5330_v8 = vpop.eup %5329 }
 0x3ce   : > { %4695 = vmatpush3.msk.msra.mxu0 %vm1275_vm1, %v5330_v8  ;;  %5107 = vmatpush3.msk.msra.mxu1 %vm1275_vm1, %v5330_v8 }
 0x3cf   : > { %4697 = vmatmul.mubr.msk.f32.vlgmr.msra.gmra.mrb[14].mxu0 %vm1436_vm4, %v1244_v6  ;;  %4703 = vmatmul.mubr.msk.f32.vlgmr.msra.gmra.mrb[16].mxu1 %vm1436_vm4, %v1246_v7  ;;  %v4257_v6 = vld [vmem:[#allocation2] ss:$0 sm:$0xff] }
 0x3d0   : > { %4699 = vmatprep.mubr.msk.f32.mxu0 %vm5424_vm0, %v5425_v51  ;;  %4705 = vmatprep.mubr.msk.f32.mxu1 %vm5424_vm0, %v5425_v51 }
 0x3d1   : > { %5034 = vmatprep.subr.bf16.mxu1 %v5423_v50  ;;  %5028 = vmatprep.subr.bf16.mxu0 %v5423_v50 }
 0x3d3   : > { %4700 = vmatmul.mubr.msk.f32.gmra.mrb[16].mxu0 %vm1436_vm4, %v1245_v9  ;;  %4706 = vmatmul.mubr.msk.f32.gmra.mrb[18].mxu1 %vm1436_vm4, %v1247_v10 }
 0x3d4   : > { %4708 = vmatprep.mubr.msk.f32.mxu1 %vm5424_vm0, %v5425_v51  ;;  %4721 = vmatprep.mubr.msk.f32.mxu0 %vm5424_vm0, %v5425_v51 }
 0x3d7   : > { %4709 = vmatmul.mubr.msk.f32.gmra.mrb[20].mxu1 %vm1436_vm4, %v1248_v11 }
 0x3d8   : > { %4746 = vmatprep.mubr.msk.f32.mxu1 %vm5424_vm0, %v5425_v51 }
 0x4a2   : > { %v1603_v12 = vpop.f32.mrb[14].mxu0  ;;  %v1613_v13 = vpop.f32.mrb[16].mxu1 }
 0x4a3   : > { %v5849_v15 = vmul.f32 %v1603_v12, %v1238_v20  ;;  %v4698_v17 = vpop.f32.mrb[15].mxu0  ;;  %v4704_v18 = vpop.f32.mrb[17].mxu1  ;;  %v5861_v20 = vmul.f32 %v1613_v13, %v1240_v39 }
 0x4a5   : > { %v1648_v19 = vsel %vm1355_vm3, %v5849_v15, 0.0  ;;  %v1632_v22 = vsel %vm1355_vm3, %v5849_v15, -inf  ;;  %v1638_v33 = vsel %vm1355_vm3, %v5861_v20, -inf }
 0x4a6   : > { %v1618_v23 = vpop.f32.mrb[18].mxu1  ;;  %1649 = vadd.xlane.f32.xlu0 %v1648_v19  ;;  %1633 = vmax.xlane.f32.xlu1 %v1632_v22  ;;  %v1608_v24 = vpop.f32.mrb[16].mxu0 }
 0x4a7   : > { %v5857_v25 = vmul.f32 %v1608_v24, %v1239_v21  ;;  %v4701_v26 = vpop.f32.mrb[17].mxu0  ;;  %v4707_v14 = vpop.f32.mrb[19].mxu1  ;;  %v5865_v27 = vmul.f32 %v1618_v23, %v1241_v40  ;;  %v1654_v21 = vsel %vm1355_vm3, %v5861_v20, 0.0 }
 0x4a9   : > { %v1651_v28 = vsel %vm1355_vm3, %v5857_v25, 0.0  ;;  %v1635_v29 = vsel %vm1355_vm3, %v5857_v25, -inf  ;;  %v1657_v31 = vsel %vm1355_vm3, %v5865_v27, 0.0  ;;  %v1641_v34 = vsel %vm1355_vm3, %v5865_v27, -inf }
 0x4aa   : > { %v1623_v30 = vpop.f32.mrb[20].mxu1  ;;  %1652 = vadd.xlane.f32.xlu0 %v1651_v28  ;;  %1636 = vmax.xlane.f32.xlu1 %v1635_v29 }
 0x4ab   : > { %v4710_v16 = vpop.f32.mrb[21].mxu1  ;;  %v5877_v32 = vmul.f32 %v1623_v30, %v1242_v53 }
 0x4ad   : > { %v1660_v35 = vsel %vm1644_vm5, %v5877_v32, 0.0  ;;  %v1645_v36 = vsel %vm1644_vm5, %v5877_v32, -inf }
 0x4ae   : > { %1655 = vadd.xlane.f32.xlu0 %v1654_v21  ;;  %1658 = vadd.xlane.f32.xlu1 %v1657_v31 }
 0x4b2   : > { %1639 = vmax.xlane.f32.xlu0 %v1638_v33  ;;  %1642 = vmax.xlane.f32.xlu1 %v1641_v34 }
 0x4b6   : > { %1661 = vadd.xlane.f32.xlu0 %v1660_v35  ;;  %1646 = vmax.xlane.f32.xlu1 %v1645_v36 }
 0x533   : > { %v1650_v37 = vpop.xlane.xlu0 %1649  ;;  %v1634_v38 = vpop.xlane.xlu1 %1633 }
 0x534   : > { %v1664_v41 = vmul.f32 0.015625, %v1650_v37 }
 0x537   : > { %v1653_v39 = vpop.xlane.xlu0 %1652  ;;  %v1637_v40 = vpop.xlane.xlu1 %1636 }
 0x538   : > { %v1665_v42 = vmul.f32 0.015625, %v1653_v39  ;;  %v5035_v43 = vpack.c.bf16 %v1637_v40, %v1634_v38 }
 0x53a   : > { %v5029_v44 = vpack.c.bf16 %v1665_v42, %v1664_v41  ;;  %5036 = vmatpush3.bf16.msra.mxu1 %v5035_v43 }
 0x53b   : > { %v1656_v45 = vpop.xlane.xlu0 %1655  ;;  %v1659_v46 = vpop.xlane.xlu1 %1658  ;;  %5037 = vmatprep.subr.bf16.mxu1 %v5423_v50 }
 0x53c   : > { %v1666_v47 = vmul.f32 0.015625, %v1656_v45  ;;  %v1667_v48 = vmul.f32 0.015625, %v1659_v46  ;;  %5030 = vmatpush3.bf16.msra.mxu0 %v5029_v44 }
 0x53d   : > { %5031 = vmatprep.subr.bf16.mxu0 %v5423_v50 }
 0x53e   : > { %v5032_v49 = vpack.c.bf16 %v1667_v48, %v1666_v47 }
 0x53f   : > { %v1640_v52 = vpop.xlane.xlu0 %1639  ;;  %v1643_v53 = vpop.xlane.xlu1 %1642 }
 0x540   : > { %v5038_v54 = vpack.c.bf16 %v1643_v53, %v1640_v52  ;;  %5033 = vmatpush3.bf16.msra.mxu0 %v5032_v49 }
 0x541   : > { %4719 = vmatprep.subr.mxu0 %v5425_v51 }
 0x542   : > { %5039 = vmatpush3.bf16.msra.mxu1 %v5038_v54 }
 0x543   : > { %v1662_v55 = vpop.xlane.xlu0 %1661  ;;  %4744 = vmatprep.subr.mxu1 %v5425_v51  ;;  %v1647_v59 = vpop.xlane.xlu1 %1646 }
 0x544   : > { %v1668_v56 = vmul.f32 0.015625, %v1662_v55 }
 0x546   : > { %4720 = vmatpush3.msk.msra.mxu0 %vm1275_vm1, %v1668_v56  ;;  %4745 = vmatpush3.msk.msra.mxu1 %vm1275_vm1, %v1647_v59 }
 0x547   : > { %4722 = vmatmul.mubr.msk.f32.vlgmr.msra.gmra.mrb[18].mxu0 %vm1271_vm2, %v1265_v57  ;;  %4747 = vmatmul.mubr.msk.f32.vlgmr.msra.gmra.mrb[22].mxu1 %vm1271_vm2, %v1260_v58 }
 0x548   : > { %4724 = vmatprep.mubr.msk.f32.mxu0 %vm5424_vm0, %v5425_v51  ;;  %4749 = vmatprep.mubr.msk.f32.mxu1 %vm5424_vm0, %v5425_v51 }
 0x549   : > { %5040 = vmatprep.subr.bf16.mxu0 %v5423_v50  ;;  %4774 = vmatprep.subr.bf16.mxu1 %v5425_v51 }
 0x54b   : > { %4725 = vmatmul.mubr.msk.f32.gmra.mrb[20].mxu0 %vm1271_vm2, %v1266_v60  ;;  %4750 = vmatmul.mubr.msk.f32.gmra.mrb[24].mxu1 %vm1271_vm2, %v1261_v61 }
 0x54c   : > { %4727 = vmatprep.mubr.msk.f32.mxu0 %vm5424_vm0, %v5425_v51  ;;  %4752 = vmatprep.mubr.msk.f32.mxu1 %vm5424_vm0, %v5425_v51 }
 0x54f   : > { %4728 = vmatmul.mubr.msk.f32.gmra.mrb[22].mxu0 %vm1271_vm2, %v1267_v62  ;;  %4753 = vmatmul.mubr.msk.f32.gmra.mrb[26].mxu1 %vm1271_vm2, %v1262_v63  ;;  %v5235_v63 = vld [vmem:[%s6514_s13] sm:$0xff]  }
 0x550   : > { %4730 = vmatprep.mubr.msk.f32.mxu0 %vm5424_vm0, %v5425_v51  ;;  %4755 = vmatprep.mubr.msk.f32.mxu1 %vm5424_vm0, %v5425_v51 }
 0x551   : > { %4775 = vmatpush3.bf16.msra.mxu1 %v5235_v63 }
 0x552   : > { %4776 = vmatprep.subr.bf16.mxu1 %v5425_v51 }
 0x553   : > { %4731 = vmatmul.mubr.msk.f32.gmra.mrb[24].mxu0 %vm1271_vm2, %v1268_v0  ;;  %4756 = vmatmul.mubr.msk.f32.gmra.mrb[28].mxu1 %vm1271_vm2, %v1263_v1  ;;  %v5236_v0 = vld [vmem:[%s6514_s13 + $0x8] sm:$0xff]   ;;  %v5237_v1 = vld [vmem:[%s6514_s13 + $0x10] sm:$0xff]  }
 0x554   : > { %4733 = vmatprep.mubr.msk.f32.mxu0 %vm5424_vm0, %v5425_v51  ;;  %4758 = vmatprep.mubr.msk.f32.mxu1 %vm5424_vm0, %v5425_v51 }
 0x555   : > { %4777 = vmatpush3.bf16.msra.mxu1 %v5236_v0  ;;  %v5252_v0 = vld [vmem:[%s6514_s13 + $0x88] sm:$0xff]  }
 0x556   : > { %4778 = vmatprep.subr.bf16.mxu1 %v5425_v51 }
 0x557   : > { %4734 = vmatmul.mubr.msk.f32.gmra.mrb[26].mxu0 %vm1271_vm2, %v1269_v2  ;;  %4759 = vmatmul.mubr.msk.f32.gmra.mrb[30].mxu1 %vm1271_vm2, %v1264_v3  ;;  %v5238_v2 = vld [vmem:[%s6514_s13 + $0x18] sm:$0xff]  }
 0x558   : > { %4771 = vmatprep.mubr.msk.f32.mxu0 %vm5424_vm0, %v5425_v51  ;;  %4782 = vmatprep.mubr.msk.bf16.mxu1 %vm5424_vm0, %v5425_v51 }
 0x559   : > { %4779 = vmatpush3.bf16.msra.mxu1 %v5237_v1  ;;  %v5253_v1 = vld [vmem:[%s6514_s13 + $0x90] sm:$0xff]  }
 0x55a   : > { %4780 = vmatprep.subr.bf16.mxu1 %v5425_v51 }
 0x55d   : > { %4781 = vmatpush3.bf16.msra.mxu1 %v5238_v2  ;;  %v5254_v2 = vld [vmem:[%s6514_s13 + $0x98] sm:$0xff]  }
 0x55e   : > { %4799 = vmatprep.subr.bf16.mxu1 %v5425_v51 }
 0x61a   : > { %v1753_v5 = vpop.f32.mrb[18].mxu0  ;;  %v1861_v7 = vpop.f32.mrb[22].mxu1 }
 0x61b   : > { %v1862_v8 = vadd.f32 %v1861_v7, %v1753_v5  ;;  %v4723_v9 = vpop.f32.mrb[19].mxu0  ;;  %v4748_v10 = vpop.f32.mrb[23].mxu1 }
 0x61d   : > { %v1891_v11 = vadd.f32 %v4257_v6, %v1862_v8 }
 0x61e   : > { %v1758_v12 = vpop.f32.mrb[20].mxu0  ;;  %v1866_v13 = vpop.f32.mrb[24].mxu1 }
 0x61f   : > { %v4258_v17 = vmul.f32 -1.442695, %v1891_v11  ;;  %v1867_v18 = vadd.f32 %v1866_v13, %v1758_v12  ;;  %v4726_v19 = vpop.f32.mrb[21].mxu0  ;;  %v4751_v22 = vpop.f32.mrb[25].mxu1 }
 0x620   : > { %v2721_v19 = vld [vmem:[%s6513_s12 + $0x14] sm:$0xf]  ;;  %v2872_v22 = vld [vmem:[%s6513_s12 + $0x18] sm:$0xf] }
 0x621   : > { %5331 = vpow2.f32 %v4258_v17  ;;  %v1892_v23 = vadd.f32 %v4257_v6, %v1867_v18  ;;  %v2570_v18 = vld [vmem:[%s6513_s12 + $0x10] sm:$0xf] }
 0x622   : > { %v1763_v24 = vpop.f32.mrb[22].mxu0  ;;  %v1871_v26 = vpop.f32.mrb[26].mxu1 }
 0x623   : > { %v4259_v14 = vmul.f32 -1.442695, %v1892_v23  ;;  %v1872_v28 = vadd.f32 %v1871_v26, %v1763_v24  ;;  %v4729_v29 = vpop.f32.mrb[23].mxu0  ;;  %v4754_v30 = vpop.f32.mrb[27].mxu1  ;;  %v3023_v23 = vld [vmem:[%s6513_s12 + $0x1c] sm:$0xf] }
 0x624   : > { %v3174_v24 = vld [vmem:[%s6513_s12 + $0x20] sm:$0xf] }
 0x625   : > { %5333 = vpow2.f32 %v4259_v14  ;;  %v1893_v16 = vadd.f32 %v4257_v6, %v1872_v28  ;;  %v5239_v14 = vld [vmem:[%s6514_s13 + $0x20] sm:$0xff]  }
 0x626   : > { %v1768_v21 = vpop.f32.mrb[24].mxu0  ;;  %v1876_v31 = vpop.f32.mrb[28].mxu1  ;;  %v3326_v30 = vld [vmem:[%s6516_s15] sm:$0xff] }
 0x627   : > { %v4260_v33 = vmul.f32 -1.442695, %v1893_v16  ;;  %v1877_v34 = vadd.f32 %v1876_v31, %v1768_v21  ;;  %v4732_v35 = vpop.f32.mrb[25].mxu0  ;;  %v4757_v36 = vpop.f32.mrb[29].mxu1  ;;  %v3327_v16 = vld [vmem:[%s6516_s15 + $0x8] sm:$0xff]  ;;  %v3328_v21 = vld [vmem:[%s6516_s15 + $0x10] sm:$0xff] }
 0x628   : > { %v5240_v31 = vld [vmem:[%s6514_s13 + $0x28] sm:$0xff]   ;;  %v3330_v36 = vld [vmem:[%s6516_s15 + $0x20] sm:$0xff] }
 0x629   : > { %5335 = vpow2.f32 %v4260_v33  ;;  %v1894_v37 = vadd.f32 %v4257_v6, %v1877_v34  ;;  %v5095_v33 = vpack.c.bf16 %v3327_v16, %v3326_v30  ;;  %v3329_v34 = vld [vmem:[%s6516_s15 + $0x18] sm:$0xff] }
 0x62a   : > { %v1773_v38 = vpop.f32.mrb[26].mxu0  ;;  %v1881_v39 = vpop.f32.mrb[30].mxu1  ;;  %v5098_v35 = vpack.c.bf16 %v3329_v34, %v3328_v21  ;;  %v5270_v30 = vld [vmem:[%s6514_s13 + $0x118] sm:$0xff]   ;;  %v3332_v21 = vld [vmem:[%s6516_s15 + $0x30] sm:$0xff]  ;;  %v4270_v34 = vld [vmem:[%s6515_s14] ss:$0 sm:$0xff] }
 0x62b   : > { %v5332_v40 = vpop.eup %5331  ;;  %v4261_v41 = vmul.f32 -1.442695, %v1894_v37  ;;  %v1882_v42 = vadd.f32 %v1881_v39, %v1773_v38  ;;  %v4735_v43 = vpop.f32.mrb[27].mxu0  ;;  %v3331_v37 = vld [vmem:[%s6516_s15 + $0x28] sm:$0xff]  ;;  %v5241_v38 = vld [vmem:[%s6514_s13 + $0x30] sm:$0xff]  }
 0x62c   : > { %v4760_v44 = vpop.f32.mrb[31].mxu1  ;;  %v1911_v45 = vadd.f32 1.0, %v5332_v40  ;;  %v5101_v40 = vpack.c.bf16 %v3331_v37, %v3330_v36 }
 0x62d   : > { %5337 = vpow2.f32 %v4261_v41  ;;  %v1895_v46 = vadd.f32 %v4257_v6, %v1882_v42  ;;  %v5242_v42 = vld [vmem:[%s6514_s13 + $0x38] sm:$0xff]   ;;  %v5243_v44 = vld [vmem:[%s6514_s13 + $0x40] sm:$0xff]  }
 0x62e   : > { %5339 = vrcp.f32 %v1911_v45  ;;  %v5244_v45 = vld [vmem:[%s6514_s13 + $0x48] sm:$0xff]  }
 0x62f   : > { %v5334_v47 = vpop.eup %5333  ;;  %v4262_v48 = vmul.f32 -1.442695, %v1895_v46 }
 0x630   : > { %v1912_v49 = vadd.f32 1.0, %v5334_v47  ;;  %v5245_v47 = vld [vmem:[%s6514_s13 + $0x50] sm:$0xff]  }
 0x631   : > { %5341 = vpow2.f32 %v4262_v48  ;;  %v5246_v48 = vld [vmem:[%s6514_s13 + $0x58] sm:$0xff]  }
 0x632   : > { %5343 = vrcp.f32 %v1912_v49 }
 0x633   : > { %v5336_v52 = vpop.eup %5335 }
 0x634   : > { %v1913_v53 = vadd.f32 1.0, %v5336_v52 }
 0x636   : > { %5345 = vrcp.f32 %v1913_v53 }
 0x637   : > { %v5338_v54 = vpop.eup %5337 }
 0x638   : > { %v5340_v55 = vpop.eup %5339  ;;  %v1914_v56 = vadd.f32 1.0, %v5338_v54  ;;  %v5247_v54 = vld [vmem:[%s6514_s13 + $0x60] sm:$0xff]  }
 0x639   : > { %1928 = vperm.xlu0 %5185, %v5340_v55   ;;  %v5248_v55 = vld [vmem:[%s6514_s13 + $0x68] sm:$0xff]  }
 0x63a   : > { %5347 = vrcp.f32 %v1914_v56  ;;  %v5249_v56 = vld [vmem:[%s6514_s13 + $0x70] sm:$0xff]  }
 0x63b   : > { %v5342_v57 = vpop.eup %5341 }
 0x63c   : > { %v5344_v58 = vpop.eup %5343  ;;  %v1915_v59 = vadd.f32 1.0, %v5342_v57 }
 0x63d   : > { %1933 = vperm.xlu1 %5186, %v5344_v58  }
 0x63e   : > { %5349 = vrcp.f32 %v1915_v59  ;;  %v5250_v59 = vld [vmem:[%s6514_s13 + $0x78] sm:$0xff]  }
 0x640   : > { %v5346_v60 = vpop.eup %5345 }
 0x641   : > { %1938 = vperm.xlu1 %5186, %v5346_v60  }
 0x644   : > { %v5348_v61 = vpop.eup %5347 }
 0x645   : > { %1943 = vperm.xlu1 %5186, %v5348_v61   ;;  %v5251_v61 = vld [vmem:[%s6514_s13 + $0x80] sm:$0xff]  }
 0x648   : > { %v5350_v62 = vpop.eup %5349 }
 0x649   : > { %1948 = vperm.xlu1 %5186, %v5350_v62  }
 0x6b8   : > { %v1929_v3 = vpop.permute.xlu0 %1928 }
 0x6b9   : > { %v1951_v6 = vmul.f32 %v1929_v3, %v5849_v15 }
 0x6bc   : > { %v1934_v5 = vpop.permute.xlu1 %1933 }
 0x6bd   : > { %v1952_v7 = vmul.f32 %v1934_v5, %v5857_v25  ;;  %v1957_v25 = vld [vmem:[%s6513_s12] sm:$0xf] }
 0x6bf   : > { %v5975_v8 = vpack.c.bf16 %v1952_v7, %v1951_v6  ;;  %v5255_v7 = vld [vmem:[%s6514_s13 + $0xa0] sm:$0xff]  }
 0x6c0   : > { %v1939_v9 = vpop.permute.xlu1 %1938 }
 0x6c1   : > { %5042 = vmatpush3.bf16.msra.mxu0 %v5975_v8  ;;  %v1953_v11 = vmul.f32 %v1939_v9, %v5861_v20  ;;  %v2117_v20 = vld [vmem:[%s6513_s12 + $0x4] sm:$0xf] }
 0x6c2   : > { %5043 = vmatprep.subr.bf16.mxu0 %v5423_v50 }
 0x6c4   : > { %v1944_v10 = vpop.permute.xlu1 %1943 }
 0x6c5   : > { %v1954_v12 = vmul.f32 %v1944_v10, %v5865_v27  ;;  %v2268_v27 = vld [vmem:[%s6513_s12 + $0x8] sm:$0xf] }
 0x6c7   : > { %v5981_v13 = vpack.c.bf16 %v1954_v12, %v1953_v11  ;;  %v5257_v11 = vld [vmem:[%s6514_s13 + $0xb0] sm:$0xff]   ;;  %v5258_v12 = vld [vmem:[%s6514_s13 + $0xb8] sm:$0xff]  }
 0x6c8   : > { %v1949_v17 = vpop.permute.xlu1 %1948 }
 0x6c9   : > { %5045 = vmatpush3.bf16.msra.mxu0 %v5981_v13  ;;  %v5986_v15 = vmul.f32 %v1949_v17, %v5877_v32  ;;  %v2419_v32 = vld [vmem:[%s6513_s12 + $0xc] sm:$0xf]  ;;  %v5259_v17 = vld [vmem:[%s6514_s13 + $0xc0] sm:$0xff]  }
 0x6ca   : > { %4769 = vmatprep.subr.mxu0 %v5425_v51 }
 0x6cd   : > { %4770 = vmatpush3.msk.msra.mxu0 %vm1275_vm1, %v5986_v15 }
 0x6ce   : > { %4772 = vmatmul.mubr.msk.f32.vlgmr.msra.gmra.mrb[28].mxu0 %vm1271_vm2, %v1957_v25  ;;  %5046 = vmatprep.subr.bf16.mxu0 %v5423_v50 }
 0x6cf   : > { %5048 = vmatpush3.bf16.msra.mxu0 %v5975_v8  ;;  %4796 = vmatprep.mubr.msk.f32.mxu0 %vm5424_vm0, %v5425_v51 }
 0x6d0   : > { %5049 = vmatprep.subr.bf16.mxu0 %v5423_v50 }
 0x6d3   : > { %5051 = vmatpush3.bf16.msra.mxu0 %v5981_v13 }
 0x6d4   : > { %4794 = vmatprep.subr.mxu0 %v5425_v51 }
 0x6d7   : > { %4795 = vmatpush3.msk.msra.mxu0 %vm1275_vm1, %v5986_v15 }
 0x6d8   : > { %5052 = vmatprep.subr.bf16.mxu0 %v5423_v50  ;;  %4797 = vmatmul.mubr.msk.f32.vlgmr.msra.gmra.mrb[30].mxu0 %vm1271_vm2, %v2117_v20  ;;  %v5260_v20 = vld [vmem:[%s6514_s13 + $0xc8] sm:$0xff]  }
 0x6d9   : > { %5054 = vmatpush3.bf16.msra.mxu0 %v5975_v8  ;;  %4821 = vmatprep.mubr.msk.f32.mxu0 %vm5424_vm0, %v5425_v51 }
 0x6da   : > { %5055 = vmatprep.subr.bf16.mxu0 %v5423_v50 }
 0x6dd   : > { %5057 = vmatpush3.bf16.msra.mxu0 %v5981_v13 }
 0x6de   : > { %4819 = vmatprep.subr.mxu0 %v5425_v51 }
 0x6e1   : > { %4820 = vmatpush3.msk.msra.mxu0 %vm1275_vm1, %v5986_v15 }
 0x6e2   : > { %5058 = vmatprep.subr.bf16.mxu0 %v5423_v50  ;;  %4822 = vmatmul.mubr.msk.f32.vlgmr.msra.gmra.mrb[32].mxu0 %vm1271_vm2, %v2268_v27  ;;  %v5261_v27 = vld [vmem:[%s6514_s13 + $0xd0] sm:$0xff]  }
 0x6e3   : > { %5060 = vmatpush3.bf16.msra.mxu0 %v5975_v8  ;;  %4846 = vmatprep.mubr.msk.f32.mxu0 %vm5424_vm0, %v5425_v51 }
 0x6e4   : > { %5061 = vmatprep.subr.bf16.mxu0 %v5423_v50 }
 0x6e7   : > { %5063 = vmatpush3.bf16.msra.mxu0 %v5981_v13 }
 0x6e8   : > { %4844 = vmatprep.subr.mxu0 %v5425_v51 }
 0x6eb   : > { %4845 = vmatpush3.msk.msra.mxu0 %vm1275_vm1, %v5986_v15 }
 0x6ec   : > { %5064 = vmatprep.subr.bf16.mxu0 %v5423_v50  ;;  %4847 = vmatmul.mubr.msk.f32.vlgmr.msra.gmra.mrb[34].mxu0 %vm1271_vm2, %v2419_v32  ;;  %v5262_v32 = vld [vmem:[%s6514_s13 + $0xd8] sm:$0xff]  }
 0x6ed   : > { %5066 = vmatpush3.bf16.msra.mxu0 %v5975_v8  ;;  %4871 = vmatprep.mubr.msk.f32.mxu0 %vm5424_vm0, %v5425_v51 }
 0x6ee   : > { %5067 = vmatprep.subr.bf16.mxu0 %v5423_v50 }
 0x6f1   : > { %5069 = vmatpush3.bf16.msra.mxu0 %v5981_v13 }
 0x6f2   : > { %4869 = vmatprep.subr.mxu0 %v5425_v51 }
 0x6f5   : > { %4870 = vmatpush3.msk.msra.mxu0 %vm1275_vm1, %v5986_v15 }
 0x6f6   : > { %5070 = vmatprep.subr.bf16.mxu0 %v5423_v50  ;;  %4872 = vmatmul.mubr.msk.f32.vlgmr.msra.gmra.mrb[36].mxu0 %vm1271_vm2, %v2570_v18 }
 0x6f7   : > { %5072 = vmatpush3.bf16.msra.mxu0 %v5975_v8  ;;  %4896 = vmatprep.mubr.msk.f32.mxu0 %vm5424_vm0, %v5425_v51 }
 0x6f8   : > { %5073 = vmatprep.subr.bf16.mxu0 %v5423_v50 }
 0x6fb   : > { %5075 = vmatpush3.bf16.msra.mxu0 %v5981_v13 }
 0x6fc   : > { %4894 = vmatprep.subr.mxu0 %v5425_v51 }
 0x6ff   : > { %4895 = vmatpush3.msk.msra.mxu0 %vm1275_vm1, %v5986_v15 }
 0x700   : > { %5076 = vmatprep.subr.bf16.mxu0 %v5423_v50  ;;  %4897 = vmatmul.mubr.msk.f32.vlgmr.msra.gmra.mrb[38].mxu0 %vm1271_vm2, %v2721_v19  ;;  %v5263_v19 = vld [vmem:[%s6514_s13 + $0xe0] sm:$0xff]  }
 0x701   : > { %5078 = vmatpush3.bf16.msra.mxu0 %v5975_v8  ;;  %4921 = vmatprep.mubr.msk.f32.mxu0 %vm5424_vm0, %v5425_v51 }
 0x702   : > { %5079 = vmatprep.subr.bf16.mxu0 %v5423_v50 }
 0x705   : > { %5081 = vmatpush3.bf16.msra.mxu0 %v5981_v13 }
 0x706   : > { %4919 = vmatprep.subr.mxu0 %v5425_v51 }
 0x709   : > { %4920 = vmatpush3.msk.msra.mxu0 %vm1275_vm1, %v5986_v15 }
 0x70a   : > { %5082 = vmatprep.subr.bf16.mxu0 %v5423_v50  ;;  %4922 = vmatmul.mubr.msk.f32.vlgmr.msra.gmra.mrb[40].mxu0 %vm1271_vm2, %v2872_v22  ;;  %v5264_v22 = vld [vmem:[%s6514_s13 + $0xe8] sm:$0xff]  }
 0x70b   : > { %5084 = vmatpush3.bf16.msra.mxu0 %v5975_v8  ;;  %4946 = vmatprep.mubr.msk.f32.mxu0 %vm5424_vm0, %v5425_v51 }
 0x70c   : > { %5085 = vmatprep.subr.bf16.mxu0 %v5423_v50 }
 0x70f   : > { %5087 = vmatpush3.bf16.msra.mxu0 %v5981_v13 }
 0x710   : > { %4944 = vmatprep.subr.mxu0 %v5425_v51 }
 0x713   : > { %4945 = vmatpush3.msk.msra.mxu0 %vm1275_vm1, %v5986_v15 }
 0x714   : > { %5088 = vmatprep.subr.bf16.mxu0 %v5423_v50  ;;  %4947 = vmatmul.mubr.msk.f32.vlgmr.msra.gmra.mrb[42].mxu0 %vm1271_vm2, %v3023_v23  ;;  %v5265_v23 = vld [vmem:[%s6514_s13 + $0xf0] sm:$0xff]  }
 0x715   : > { %5090 = vmatpush3.bf16.msra.mxu0 %v5975_v8  ;;  %4971 = vmatprep.mubr.msk.f32.mxu0 %vm5424_vm0, %v5425_v51  ;;  %v5256_v8 = vld [vmem:[%s6514_s13 + $0xa8] sm:$0xff]  }
 0x716   : > { %5091 = vmatprep.subr.bf16.mxu0 %v5423_v50 }
 0x719   : > { %5093 = vmatpush3.bf16.msra.mxu0 %v5981_v13 }
 0x71a   : > { %4969 = vmatprep.subr.mxu0 %v5425_v51 }
 0x71d   : > { %4970 = vmatpush3.msk.msra.mxu0 %vm1275_vm1, %v5986_v15 }
 0x71e   : > { %4972 = vmatmul.mubr.msk.f32.vlgmr.msra.gmra.mrb[44].mxu0 %vm1271_vm2, %v3174_v24  ;;  %5094 = vmatprep.subr.bf16.mxu0 %v5423_v50  ;;  %v5266_v24 = vld [vmem:[%s6514_s13 + $0xf8] sm:$0xff]  }
 0x71f   : > { %5002 = vmatprep.mubr.msk.f32.mxu0 %vm5424_vm0, %v5425_v51  ;;  %5096 = vmatpush3.bf16.msra.mxu0 %v5095_v33 }
 0x720   : > { %5097 = vmatprep.subr.bf16.mxu0 %v5423_v50 }
 0x723   : > { %5099 = vmatpush3.bf16.msra.mxu0 %v5098_v35 }
 0x724   : > { %5100 = vmatprep.subr.bf16.mxu0 %v5423_v50 }
 0x727   : > { %5102 = vmatpush3.bf16.msra.mxu0 %v5101_v40 }
 0x728   : > { %5103 = vmatprep.subr.bf16.mxu0 %v5423_v50 }
 0x7a1   : > { %v2030_v26 = vpop.f32.mrb[28].mxu0 }
 0x7a2   : > { %v2034_v28 = vpack.c.bf16 %v2030_v26, %v2030_v26  ;;  %v4773_v29 = vpop.f32.mrb[29].mxu0 }
 0x7a3   : > { %v5269_v29 = vld [vmem:[%s6514_s13 + $0x110] sm:$0xff]  }
 0x7a4   : > { %4783 = vmatmul.mubr.msk.bf16.vlgmr.msra.gmra.mrb[32].mxu1 %vm1355_vm3, %v2034_v28  ;;  %v5268_v28 = vld [vmem:[%s6514_s13 + $0x108] sm:$0xff]  }
 0x7a5   : > { %4800 = vmatpush3.bf16.msra.mxu1 %v5239_v14  ;;  %4807 = vmatprep.mubr.msk.bf16.mxu1 %vm5424_vm0, %v5425_v51  ;;  %v5267_v14 = vld [vmem:[%s6514_s13 + $0x100] sm:$0xff]  }
 0x7a6   : > { %4801 = vmatprep.subr.bf16.mxu1 %v5425_v51 }
 0x7a9   : > { %4802 = vmatpush3.bf16.msra.mxu1 %v5240_v31  ;;  %v3333_v31 = vld [vmem:[%s6516_s15 + $0x38] sm:$0xff] }
 0x7aa   : > { %4803 = vmatprep.subr.bf16.mxu1 %v5425_v51  ;;  %v5104_v33 = vpack.c.bf16 %v3333_v31, %v3332_v21  ;;  %v5295_v21 = vld [vmem:[%s6522_s24 + $0x40] sm:$0xff]  }
 0x7ab   : > { %v2187_v39 = vpop.f32.mrb[30].mxu0  ;;  %v5296_v31 = vld [vmem:[%s6522_s24] sm:$0xff]  }
 0x7ac   : > { %v4798_v41 = vpop.f32.mrb[31].mxu0  ;;  %v2191_v43 = vpack.c.bf16 %v2187_v39, %v2187_v39  ;;  %5105 = vmatpush3.bf16.msra.mxu0 %v5104_v33  ;;  %v5297_v33 = vld [vmem:[%s6522_s24 + $0x48] sm:$0xff]  }
 0x7ad   : > { %4804 = vmatpush3.bf16.msra.mxu1 %v5241_v38  ;;  %5005 = vmatprep.subr.mxu0 %v5425_v51  ;;  %v3335_v41 = vld [vmem:[%s6518_s17] sm:$0xf] }
 0x7ae   : > { %4805 = vmatprep.subr.bf16.mxu1 %v5425_v51 }
 0x7b1   : > { %4806 = vmatpush3.bf16.msra.mxu1 %v5242_v42  ;;  %v4327_v42 = vld [vmem:[%s6517_s16] ss:$0 sm:$0xff] }
 0x7b2   : > { %4824 = vmatprep.subr.bf16.mxu1 %v5425_v51 }
 0x7b4   : > { %4808 = vmatmul.mubr.msk.bf16.vlgmr.msra.gmra.mrb[32].mxu1 %vm1355_vm3, %v2191_v43 }
 0x7b5   : > { %4825 = vmatpush3.bf16.msra.mxu1 %v5243_v44  ;;  %v2338_v46 = vpop.f32.mrb[32].mxu0  ;;  %4832 = vmatprep.mubr.msk.bf16.mxu1 %vm5424_vm0, %v5425_v51 }
 0x7b6   : > { %4826 = vmatprep.subr.bf16.mxu1 %v5425_v51  ;;  %v4823_v50 = vpop.f32.mrb[33].mxu0  ;;  %v2342_v52 = vpack.c.bf16 %v2338_v46, %v2338_v46 }
 0x7b9   : > { %4827 = vmatpush3.bf16.msra.mxu1 %v5244_v45 }
 0x7ba   : > { %4828 = vmatprep.subr.bf16.mxu1 %v5425_v51 }
 0x7bd   : > { %4829 = vmatpush3.bf16.msra.mxu1 %v5245_v47 }
 0x7be   : > { %4830 = vmatprep.subr.bf16.mxu1 %v5425_v51 }
 0x7bf   : > { %v2489_v49 = vpop.f32.mrb[34].mxu0 }
 0x7c0   : > { %v4848_v53 = vpop.f32.mrb[35].mxu0  ;;  %v2493_v60 = vpack.c.bf16 %v2489_v49, %v2489_v49 }
 0x7c1   : > { %4831 = vmatpush3.bf16.msra.mxu1 %v5246_v48 }
 0x7c2   : > { %4849 = vmatprep.subr.bf16.mxu1 %v5425_v51 }
 0x7c4   : > { %4833 = vmatmul.mubr.msk.bf16.vlgmr.msra.gmra.mrb[32].mxu1 %vm1355_vm3, %v2342_v52 }
 0x7c5   : > { %4850 = vmatpush3.bf16.msra.mxu1 %v5247_v54  ;;  %4857 = vmatprep.mubr.msk.bf16.mxu1 %vm5424_vm0, %v5425_v51 }
 0x7c6   : > { %4851 = vmatprep.subr.bf16.mxu1 %v5425_v51 }
 0x7c9   : > { %4852 = vmatpush3.bf16.msra.mxu1 %v5248_v55  ;;  %v2640_v57 = vpop.f32.mrb[36].mxu0 }
 0x7ca   : > { %4853 = vmatprep.subr.bf16.mxu1 %v5425_v51  ;;  %v4873_v58 = vpop.f32.mrb[37].mxu0  ;;  %v2644_v6 = vpack.c.bf16 %v2640_v57, %v2640_v57 }
 0x7cb   : > { %v5271_v58 = vld [vmem:[%s6520_s22] ss:$16 sps:$4 sm:$0xff]  }
 0x7cd   : > { %4854 = vmatpush3.bf16.msra.mxu1 %v5249_v56 }
 0x7ce   : > { %4855 = vmatprep.subr.bf16.mxu1 %v5425_v51 }
 0x7d1   : > { %4856 = vmatpush3.bf16.msra.mxu1 %v5250_v59  ;;  %v5273_v59 = vld [vmem:[%s6520_s22 + $0x4] ss:$16 sps:$4 sm:$0xff]  }
 0x7d2   : > { %4874 = vmatprep.subr.bf16.mxu1 %v5425_v51 }
 0x7d3   : > { %v2791_v62 = vpop.f32.mrb[38].mxu0 }
 0x7d4   : > { %4858 = vmatmul.mubr.msk.bf16.vlgmr.msra.gmra.mrb[32].mxu1 %vm1355_vm3, %v2493_v60  ;;  %v4898_v63 = vpop.f32.mrb[39].mxu0  ;;  %v2795_v13 = vpack.c.bf16 %v2791_v62, %v2791_v62  ;;  %v5276_v60 = vld [vmem:[%s6520_s22 + $0x24] ss:$16 sps:$4 sm:$0xff]  }
 0x7d5   : > { %4875 = vmatpush3.bf16.msra.mxu1 %v5251_v61  ;;  %4882 = vmatprep.mubr.msk.bf16.mxu1 %vm5424_vm0, %v5425_v51  ;;  %v5274_v61 = vld [vmem:[%s6520_s22 + $0x20] ss:$16 sps:$4 sm:$0xff]   ;;  %v5279_v62 = vld [vmem:[%s6520_s22 + $0x44] ss:$16 sps:$4 sm:$0xff]  }
 0x7d6   : > { %4876 = vmatprep.subr.bf16.mxu1 %v5425_v51  ;;  %v5277_v63 = vld [vmem:[%s6520_s22 + $0x40] ss:$16 sps:$4 sm:$0xff]  }
 0x7d9   : > { %4877 = vmatpush3.bf16.msra.mxu1 %v5252_v0  ;;  %v5282_v0 = vld [vmem:[%s6520_s22 + $0x64] ss:$16 sps:$4 sm:$0xff]  }
 0x7da   : > { %4878 = vmatprep.subr.bf16.mxu1 %v5425_v51 }
 0x7dd   : > { %4879 = vmatpush3.bf16.msra.mxu1 %v5253_v1  ;;  %v2942_v3 = vpop.f32.mrb[40].mxu0  ;;  %v5280_v1 = vld [vmem:[%s6520_s22 + $0x60] ss:$16 sps:$4 sm:$0xff]  }
 0x7de   : > { %4880 = vmatprep.subr.bf16.mxu1 %v5425_v51  ;;  %v4923_v5 = vpop.f32.mrb[41].mxu0  ;;  %v2946_v18 = vpack.c.bf16 %v2942_v3, %v2942_v3 }
 0x7df   : > { %v4333_v5 = vld [vmem:[#allocation3] ss:$0 sm:$0xff] }
 0x7e1   : > { %4881 = vmatpush3.bf16.msra.mxu1 %v5254_v2  ;;  %v4334_v2 = vld [vmem:[#allocation4] ss:$0 sm:$0xff] }
 0x7e2   : > { %4899 = vmatprep.subr.bf16.mxu1 %v5425_v51 }
 0x7e4   : > { %4883 = vmatmul.mubr.msk.bf16.vlgmr.msra.gmra.mrb[32].mxu1 %vm1355_vm3, %v2644_v6 }
 0x7e5   : > { %4900 = vmatpush3.bf16.msra.mxu1 %v5255_v7  ;;  %4907 = vmatprep.mubr.msk.bf16.mxu1 %vm5424_vm0, %v5425_v51 }
 0x7e6   : > { %4901 = vmatprep.subr.bf16.mxu1 %v5425_v51 }
 0x7e7   : > { %v3093_v9 = vpop.f32.mrb[42].mxu0 }
 0x7e8   : > { %v4948_v10 = vpop.f32.mrb[43].mxu0  ;;  %v3097_v26 = vpack.c.bf16 %v3093_v9, %v3093_v9 }
 0x7e9   : > { %4902 = vmatpush3.bf16.msra.mxu1 %v5256_v8  ;;  %v4335_v10 = vld [vmem:[#allocation5] ss:$0 sm:$0xff] }
 0x7ea   : > { %4903 = vmatprep.subr.bf16.mxu1 %v5425_v51 }
 0x7ed   : > { %4904 = vmatpush3.bf16.msra.mxu1 %v5257_v11 }
 0x7ee   : > { %4905 = vmatprep.subr.bf16.mxu1 %v5425_v51 }
 0x7f1   : > { %4906 = vmatpush3.bf16.msra.mxu1 %v5258_v12  ;;  %v3244_v15 = vpop.f32.mrb[44].mxu0 }
 0x7f2   : > { %4924 = vmatprep.subr.bf16.mxu1 %v5425_v51  ;;  %v4973_v25 = vpop.f32.mrb[45].mxu0  ;;  %v3248_v16 = vpack.c.bf16 %v3244_v15, %v3244_v15 }
 0x7f4   : > { %4908 = vmatmul.mubr.msk.bf16.vlgmr.msra.gmra.mrb[32].mxu1 %vm1355_vm3, %v2795_v13 }
 0x7f5   : > { %4925 = vmatpush3.bf16.msra.mxu1 %v5259_v17  ;;  %4932 = vmatprep.mubr.msk.bf16.mxu1 %vm5424_vm0, %v5425_v51 }
 0x7f6   : > { %4926 = vmatprep.subr.bf16.mxu1 %v5425_v51 }
 0x7f9   : > { %4927 = vmatpush3.bf16.msra.mxu1 %v5260_v20  ;;  %v5285_v20 = vld [vmem:[%s6520_s22 + $0xc] ss:$16 sps:$4 sm:$0xff]  }
 0x7fa   : > { %4928 = vmatprep.subr.bf16.mxu1 %v5425_v51 }
 0x7fd   : > { %4929 = vmatpush3.bf16.msra.mxu1 %v5261_v27  ;;  %v5303_v27 = vld [vmem:[%s6522_s24 + $0xc0] sm:$0xff]  }
 0x7fe   : > { %4930 = vmatprep.subr.bf16.mxu1 %v5425_v51 }
 0x801   : > { %4931 = vmatpush3.bf16.msra.mxu1 %v5262_v32  ;;  %v5305_v32 = vld [vmem:[%s6522_s24 + $0x80] sm:$0xff]  }
 0x802   : > { %4949 = vmatprep.subr.bf16.mxu1 %v5425_v51 }
 0x804   : > { %4933 = vmatmul.mubr.msk.bf16.vlgmr.msra.gmra.mrb[32].mxu1 %vm1355_vm3, %v2946_v18  ;;  %v5307_v18 = vld [vmem:[%s6522_s24 + $0xc8] sm:$0xff]  }
 0x805   : > { %4950 = vmatpush3.bf16.msra.mxu1 %v5263_v19  ;;  %4957 = vmatprep.mubr.msk.bf16.mxu1 %vm5424_vm0, %v5425_v51  ;;  %v5309_v19 = vld [vmem:[%s6522_s24 + $0x88] sm:$0xff]  }
 0x806   : > { %4951 = vmatprep.subr.bf16.mxu1 %v5425_v51 }
 0x809   : > { %4952 = vmatpush3.bf16.msra.mxu1 %v5264_v22 }
 0x80a   : > { %4953 = vmatprep.subr.bf16.mxu1 %v5425_v51 }
 0x80d   : > { %4954 = vmatpush3.bf16.msra.mxu1 %v5265_v23 }
 0x80e   : > { %4955 = vmatprep.subr.bf16.mxu1 %v5425_v51 }
 0x811   : > { %4956 = vmatpush3.bf16.msra.mxu1 %v5266_v24  ;;  %v5283_v24 = vld [vmem:[%s6520_s22 + $0x8] ss:$16 sps:$4 sm:$0xff]  }
 0x812   : > { %4974 = vmatprep.subr.bf16.mxu1 %v5425_v51 }
 0x814   : > { %4958 = vmatmul.mubr.msk.bf16.vlgmr.msra.gmra.mrb[32].mxu1 %vm1355_vm3, %v3097_v26 }
 0x815   : > { %4975 = vmatpush3.bf16.msra.mxu1 %v5267_v14  ;;  %4982 = vmatprep.mubr.msk.bf16.mxu1 %vm5424_vm0, %v5425_v51  ;;  %v5288_v14 = vld [vmem:[%s6520_s22 + $0x2c] ss:$16 sps:$4 sm:$0xff]  }
 0x816   : > { %4976 = vmatprep.subr.bf16.mxu1 %v5425_v51 }
 0x819   : > { %4977 = vmatpush3.bf16.msra.mxu1 %v5268_v28  ;;  %v5286_v28 = vld [vmem:[%s6520_s22 + $0x28] ss:$16 sps:$4 sm:$0xff]  }
 0x81a   : > { %4978 = vmatprep.subr.bf16.mxu1 %v5425_v51 }
 0x81d   : > { %4979 = vmatpush3.bf16.msra.mxu1 %v5269_v29  ;;  %v5291_v29 = vld [vmem:[%s6520_s22 + $0x4c] ss:$16 sps:$4 sm:$0xff]  }
 0x81e   : > { %4980 = vmatprep.subr.bf16.mxu1 %v5425_v51 }
 0x821   : > { %4981 = vmatpush3.bf16.msra.mxu1 %v5270_v30  ;;  %v5289_v30 = vld [vmem:[%s6520_s22 + $0x48] ss:$16 sps:$4 sm:$0xff]  }
 0x822   : > { %4635 = vmatprep.subr.bf16.mxu1 %v5303_v27 }
 0x824   : > { %4983 = vmatmul.mubr.msk.bf16.vlgmr.msra.gmra.mrb[32].mxu1 %vm1355_vm3, %v3248_v16  ;;  %v5294_v16 = vld [vmem:[%s6520_s22 + $0x6c] ss:$16 sps:$4 sm:$0xff]  }
 0x825   : > { %4636 = vmatpush3.bf16.msra.mxu1 %v5305_v32 }
 0x826   : > { %4637 = vmatprep.subr.bf16.mxu1 %v5307_v18 }
 0x829   : > { %4638 = vmatpush3.bf16.msra.mxu1 %v5309_v19 }
 0x8f7   : > { %v3318_v35 = vpop.f32.mrb[32].mxu1 }
 0x8f8   : > { %v5108_v36 = vadd.f32 %v4270_v34, %v3318_v35  ;;  %v4984_v37 = vpop.f32.mrb[33].mxu1  ;;  %v5298_v34 = vld [vmem:[%s6522_s24 + $0x8] sm:$0xff]   ;;  %v5299_v35 = vld [vmem:[%s6522_s24 + $0x50] sm:$0xff]  }
 0x8f9   : > { %v3321_v38 = vpop.f32.mrb[34].mxu1  ;;  %v5301_v37 = vld [vmem:[%s6522_s24 + $0x58] sm:$0xff]  }
 0x8fa   : > { %v3325_v39 = vmax.f32 %v5108_v36, 0.0  ;;  %v4985_v40 = vpop.f32.mrb[35].mxu1  ;;  %v5300_v36 = vld [vmem:[%s6522_s24 + $0x10] sm:$0xff]   ;;  %v5302_v38 = vld [vmem:[%s6522_s24 + $0x18] sm:$0xff]  }
 0x8fb   : > { %v5306_v40 = vld [vmem:[%s6522_s24 + $0x20] sm:$0xff]  }
 0x8fc   : > { %5003 = vmatmul.mubr.msk.f32.vlgmr.msra.gmra.mrb[46].mxu0 %vm1355_vm3, %v3325_v39 }
 0x8fd   : > { %5007 = vmatprep.mubr.msk.f32.mxu0 %vm5424_vm0, %v5425_v51  ;;  %5006 = vmatpush3.msk.msra.mxu0 %vm1275_vm1, %v3335_v41  ;;  %v4329_v51 = vld [vmem:[%s6519_s18] ss:$0 sm:$0xff]  ;;  %v5308_v41 = vld [vmem:[%s6522_s24 + $0x68] sm:$0xff]  }
 0x8fe   : > { %3672 = vmatprep.subr.bf16.mxu0 %v5273_v59  ;;  %v3569_v59 = vlaneseq }
 0x9cf   : > { %v3415_v43 = vpop.f32.mrb[46].mxu0 }
 0x9d0   : > { %v3416_v44 = vadd.f32 %v4327_v42, %v3415_v43  ;;  %v5004_v45 = vpop.f32.mrb[47].mxu0  ;;  %v5310_v42 = vld [vmem:[%s6522_s24 + $0x28] sm:$0xff]   ;;  %v5311_v43 = vld [vmem:[%s6522_s24 + $0xd0] sm:$0xff]  }
 0x9d1   : > { %v5313_v45 = vld [vmem:[%s6522_s24 + $0x90] sm:$0xff]   ;;  %4639 = vmatprep.subr.bf16.mxu1 %v5311_v43 }
 0x9d2   : > { %v3419_v46 = vmax.f32 %v3416_v44, 0.0  ;;  %v5312_v44 = vld [vmem:[%s6522_s24 + $0x70] sm:$0xff]   ;;  %4640 = vmatpush3.bf16.msra.mxu1 %v5313_v45 }
 0x9d4   : > { %5008 = vmatmul.mubr.msk.f32.vlgmr.msra.gmra.mrb[48].mxu0 %vm1436_vm4, %v3419_v46  ;;  %v5314_v46 = vld [vmem:[%s6522_s24 + $0x30] sm:$0xff]  }
 0x9d5   : > { %3704 = vmatprep.mubr.bf16.mxu0 %v5426_v4  ;;  %3673 = vmatpush1.bf16.msra.mxu0 %v5271_v58  ;;  %v5326_v58 = vld [vmem:[%s6522_s24 + $0xb8] sm:$0xff]  }
 0x9d6   : > { %3674 = vmatprep.subr.bf16.mxu0 %v5276_v60  ;;  %v3570_v60 = vshrl.u32 %v3569_v59, 7 }
 0x9d9   : > { %3675 = vmatpush1.bf16.msra.mxu0 %v5274_v61  ;;  %v3571_v61 = vsub.s32 0, %v3570_v60 }
 0x9da   : > { %3676 = vmatprep.subr.bf16.mxu0 %v5279_v62  ;;  %v3567_v62 = vld [vmem:[%s6521_s23] sm:$0xf] }
 0x9dd   : > { %3677 = vmatpush1.bf16.msra.mxu0 %v5277_v63  ;;  %v3575_v63 = vsub.s32 1, %v3570_v60 }
 0x9de   : > { %3678 = vmatprep.subr.bf16.mxu0 %v5282_v0  ;;  %v3572_v0 = vrot.slane %v3567_v62, %v3571_v61 }
 0x9e1   : > { %3679 = vmatpush1.bf16.msra.mxu0 %v5280_v1  ;;  %v3576_v1 = vrot.slane %v3567_v62, %v3575_v63 }
 0x9e2   : > { %3713 = vmatprep.subr.bf16.mxu0 %v5285_v20 }
 0xaa7   : > { %v3498_v50 = vpop.f32.mrb[48].mxu0 }
 0xaa8   : > { %v3499_v47 = vadd.f32 %v4329_v51, %v3498_v50  ;;  %v5009_v48 = vpop.f32.mrb[49].mxu0  ;;  %v5315_v51 = vld [vmem:[%s6522_s24 + $0xd8] sm:$0xff]  }
 0xaa9   : > { %v5316_v50 = vld [vmem:[%s6522_s24 + $0x78] sm:$0xff]   ;;  %4641 = vmatprep.subr.bf16.mxu1 %v5315_v51 }
 0xaaa   : > { %v4332_v49 = vmul.f32 -1.442695, %v3499_v47  ;;  %v5317_v47 = vld [vmem:[%s6522_s24 + $0x98] sm:$0xff]  }
 0xaab   : > { %v5318_v48 = vld [vmem:[%s6522_s24 + $0x38] sm:$0xff]   ;;  %4642 = vmatpush3.bf16.msra.mxu1 %v5317_v47 }
 0xaac   : > { %5351 = vpow2.f32 %v4332_v49  ;;  %v5319_v49 = vld [vmem:[%s6522_s24 + $0xe0] sm:$0xff]  }
 0xaad   : > { %4643 = vmatprep.subr.bf16.mxu1 %v5319_v49 }
 0xab6   : > { %v5352_v52 = vpop.eup %5351 }
 0xab7   : > { %v3505_v53 = vadd.f32 1.0, %v5352_v52  ;;  %v5320_v52 = vld [vmem:[%s6522_s24 + $0xa0] sm:$0xff]  }
 0xab8   : > { %4644 = vmatpush3.bf16.msra.mxu1 %v5320_v52 }
 0xab9   : > { %5353 = vrcp.f32 %v3505_v53  ;;  %v5321_v53 = vld [vmem:[%s6522_s24 + $0xe8] sm:$0xff]  }
 0xaba   : > { %4645 = vmatprep.subr.bf16.mxu1 %v5321_v53 }
 0xac3   : > { %v5354_v54 = vpop.eup %5353 }
 0xac4   : > { %v3508_v55 = vmul.f32 %v5354_v54, %v3325_v39  ;;  %v5304_v39 = vld [vmem:[%s6522_s24 + $0x60] sm:$0xff]   ;;  %v5322_v54 = vld [vmem:[%s6522_s24 + $0xa8] sm:$0xff]  }
 0xac5   : > { %4646 = vmatpush3.bf16.msra.mxu1 %v5322_v54 }
 0xac6   : > { %v3512_v56 = vsel %vm1644_vm5, %v3508_v55, 0.0  ;;  %v3509_v57 = vsel %vm1644_vm5, %v3508_v55, -inf }
 0xac7   : > { %3513 = vadd.xlane.f32.xlu1 %v3512_v56  ;;  %3510 = vmax.xlane.f32.xlu0 %v3509_v57  ;;  %v5324_v56 = vld [vmem:[%s6522_s24 + $0xb0] sm:$0xff]   ;;  %v5325_v57 = vld [vmem:[%s6522_s24 + $0xf8] sm:$0xff]  }
 0xb54   : > { %v3514_v3 = vpop.xlane.xlu1 %3513  ;;  %v3511_v6 = vpop.xlane.xlu0 %3510 }
 0xb55   : > { %v3515_v7 = vmul.f32 0.015625, %v3514_v3  ;;  %v3522_v9 = vmul.f32 %v4333_v5, %v3511_v6 }
 0xb57   : > { %v3529_v8 = vmul.f32 %v4334_v2, %v3515_v7 }
 0xb59   : > { %v3530_v11 = vadd.f32 %v3529_v8, %v3522_v9 }
 0xb5b   : > { %v3537_v12 = vadd.f32 %v4335_v10, %v3530_v11 }
 0xb5d   : > { %v4336_v13 = vmul.f32 -1.442695, %v3537_v12 }
 0xb5f   : > { %5355 = vpow2.f32 %v4336_v13  ;;  %v3579_v13 = vsub.s32 2, %v3570_v60 }
 0xb69   : > { %v5356_v17 = vpop.eup %5355 }
 0xb6a   : > { %v3541_v15 = vadd.f32 1.0, %v5356_v17  ;;  %v3583_v17 = vsub.s32 3, %v3570_v60 }
 0xb6c   : > { %5357 = vrcp.f32 %v3541_v15  ;;  %v3580_v15 = vrot.slane %v3567_v62, %v3579_v13 }
 0xb76   : > { %v5358_v25 = vpop.eup %5357 }
 0xb77   : > { %3546 = vperm.xlu1 %5186, %v5358_v25   ;;  %v3584_v25 = vrot.slane %v3567_v62, %v3583_v17 }
 0xbf6   : > { %v3547_v22 = vpop.permute.xlu1 %3546 }
 0xbf7   : > { %v3549_v23 = vmul.f32 %v3547_v22, %v3508_v55  ;;  %v5323_v55 = vld [vmem:[%s6522_s24 + $0xf0] sm:$0xff]  }
 0xbf8   : > { %4647 = vmatprep.subr.bf16.mxu1 %v5323_v55 }
 0xbf9   : > { %v3550_v26 = vpack.c.bf16 %v3549_v23, %v3549_v23  ;;  %4648 = vmatpush3.bf16.msra.mxu1 %v5324_v56 }
 0xbfa   : > { %4649 = vmatprep.subr.bf16.mxu1 %v5325_v57 }
 0xbfb   : > { %4353 = vmatmul.mubr.msk.bf16.vlgmr.msra.gmra.mrb[52].mxu0 %vm1355_vm3, %v3550_v26 }
 0xbfc   : > { %3714 = vmatpush1.bf16.msra.mxu0 %v5283_v24  ;;  %3745 = vmatprep.mubr.bf16.mxu0 %v5426_v4  ;;  %v5292_v4 = vld [vmem:[%s6520_s22 + $0x68] ss:$16 sps:$4 sm:$0xff]  }
 0xbfd   : > { %3715 = vmatprep.subr.bf16.mxu0 %v5288_v14  ;;  %4650 = vmatpush3.bf16.msra.mxu1 %v5326_v58 }
 0xc00   : > { %3716 = vmatpush1.bf16.msra.mxu0 %v5286_v28 }
 0xc01   : > { %3717 = vmatprep.subr.bf16.mxu0 %v5291_v29 }
 0xc04   : > { %3718 = vmatpush1.bf16.msra.mxu0 %v5289_v30 }
 0xc05   : > { %3719 = vmatprep.subr.bf16.mxu0 %v5294_v16 }
 0xc08   : > { %3720 = vmatpush1.bf16.msra.mxu0 %v5292_v4 }
 0xc09   : > { %4613 = vmatprep.subr.bf16.mxu0 %v5295_v21  ;;  %v4355_v21 = vld [vmem:[%s6523_s25] ss:$0 sm:$0xff] }
 0xc0b   : > { %4354 = vmatmul.mubr.msk.bf16.vlgmr.msra.gmra.mrb[56].mxu0 %vm1355_vm3, %v3550_v26 }
 0xc0c   : > { %4614 = vmatpush3.bf16.msra.mxu0 %v5296_v31 }
 0xc0d   : > { %4615 = vmatprep.subr.bf16.mxu0 %v5297_v33 }
 0xc10   : > { %4616 = vmatpush3.bf16.msra.mxu0 %v5298_v34 }
 0xc11   : > { %4617 = vmatprep.subr.bf16.mxu0 %v5299_v35 }
 0xc14   : > { %4618 = vmatpush3.bf16.msra.mxu0 %v5300_v36 }
 0xc15   : > { %4619 = vmatprep.subr.bf16.mxu0 %v5301_v37 }
 0xc18   : > { %4620 = vmatpush3.bf16.msra.mxu0 %v5302_v38 }
 0xc19   : > { %4621 = vmatprep.subr.bf16.mxu0 %v5304_v39 }
 0xc1c   : > { %4622 = vmatpush3.bf16.msra.mxu0 %v5306_v40 }
 0xc1d   : > { %4623 = vmatprep.subr.bf16.mxu0 %v5308_v41 }
 0xc20   : > { %4624 = vmatpush3.bf16.msra.mxu0 %v5310_v42 }
 0xc21   : > { %4625 = vmatprep.subr.bf16.mxu0 %v5312_v44 }
 0xc24   : > { %4626 = vmatpush3.bf16.msra.mxu0 %v5314_v46 }
 0xc25   : > { %4627 = vmatprep.subr.bf16.mxu0 %v5316_v50 }
 0xc28   : > { %4628 = vmatpush3.bf16.msra.mxu0 %v5318_v48 }
 0xcce   : > { %v3706_v2 = vpop.f32.mrb[52].mxu0 }
 0xccf   : > { %v3707_v3 = vadd.f32 %v3706_v2, %v3572_v0  ;;  %v3708_v5 = vpop.f32.mrb[53].mxu0 }
 0xcd0   : > { %v3709_v6 = vadd.f32 %v3708_v5, %v3576_v1  ;;  %v3710_v7 = vpop.f32.mrb[54].mxu0 }
 0xcd1   : > { %v3754_v8 = vmax.f32 %v3707_v3, 0.0  ;;  %v3711_v9 = vpop.f32.mrb[55].mxu0 }
 0xcd2   : > { %v3755_v10 = vmax.f32 %v3709_v6, 0.0 }
 0xcd3   : > { %v3758_v12 = vpack.c.bf16 %v3754_v8, %v3754_v8 }
 0xcd4   : > { %v3759_v11 = vpack.c.bf16 %v3755_v10, %v3755_v10 }
 0xcd6   : > { %4057 = vmatprep.mubr.bf16.mxu0 %v3759_v11 }
 0xcd7   : > { %4058 = vmatmul.mubr.bf16.vlgmr.msra.gmra.mrb[60].mxu0 %v3758_v12 }
 0xcde   : > { %v3747_v20 = vpop.f32.mrb[56].mxu0 }
 0xcdf   : > { %v3748_v27 = vadd.f32 %v3747_v20, %v3580_v15  ;;  %v3749_v32 = vpop.f32.mrb[57].mxu0 }
 0xce0   : > { %v3750_v18 = vadd.f32 %v3749_v32, %v3584_v25  ;;  %v3751_v19 = vpop.f32.mrb[58].mxu0 }
 0xce1   : > { %v3756_v22 = vmax.f32 %v3748_v27, 0.0  ;;  %v3752_v23 = vpop.f32.mrb[59].mxu0 }
 0xce2   : > { %v3757_v24 = vmax.f32 %v3750_v18, 0.0 }
 0xce3   : > { %v3760_v14 = vpack.c.bf16 %v3756_v22, %v3756_v22 }
 0xce4   : > { %v3761_v26 = vpack.c.bf16 %v3757_v24, %v3757_v24 }
 0xce6   : > { %4097 = vmatprep.mubr.bf16.mxu1 %v3761_v26 }
 0xce7   : > { %4098 = vmatmul.mubr.bf16.vlgmr.msra.gmra.mrb[36].mxu1 %v3760_v14 }
 0xdaa   : > { %v4629_v28 = vpop.f32.mrb[60].mxu0 }
 0xdab   : > { %v4630_v29 = vpop.f32.mrb[61].mxu0 }
 0xdac   : > { %v4631_v30 = vadd.f32 %v4630_v29, %v4629_v28  ;;  %v4632_v16 = vpop.f32.mrb[62].mxu0 }
 0xdad   : > { %v4633_v4 = vpop.f32.mrb[63].mxu0 }
 0xdae   : > { %v4060_v34 = vadd.f32 %v4631_v30, %v4355_v21 }
 0xdba   : > { %v4651_v31 = vpop.f32.mrb[36].mxu1 }
 0xdbb   : > { %v4652_v33 = vpop.f32.mrb[37].mxu1 }
 0xdbc   : > { %v4653_v35 = vadd.f32 %v4652_v33, %v4651_v31  ;;  %v4654_v36 = vpop.f32.mrb[38].mxu1 }
 0xdbd   : > { %v4655_v37 = vpop.f32.mrb[39].mxu1 }
 0xdbe   : > { %v4100_v38 = vadd.f32 %v4653_v35, %v4060_v34 }
 0xdc0   : > { %4106 = vst.msk [vmem:[%s792_s5] sm:$0xf] %vm4105_vm6, %v4100_v38 }
 0xdc1   : > { %5372 = shalt.err (!%p5369_p3)
}
 0xdc2   : > { %s5373_s3 = scalar_lea.hbm %s6459_s10, 64  ;;  %s5377_s6 = scalar_lea.hbm %s6524_s26, 128 }
 0xdc3   : > { %p5374_p4 = scmp.ne.s32.totalorder %s6459_s10, %s5373_s3  ;;  %p5378_p9 = scmp.lt.u32.totalorder %s6459_s10, %s6524_s26 }
 0xdc4   : > { %p5379_p10 = scmp.lt.u32.totalorder %s5377_s6, %s5373_s3  ;;  %p5381_p12 = scmp.lt.u32.totalorder %s5373_s3, %s6459_s10 }
 0xdc5   : > { %p5375_p7 = pnand %p5374_p4, %p5613_p5 }
 0xdc6   : > { %p5380_p11 = por %p5379_p10, %p5378_p9 }
 0xdc7   : > { %p5376_p8 = pneg %p5375_p7 }
 0xdc8   : > { %p5382_p13 = por %p5381_p12, %p5380_p11 }
 0xdca   : > { %p5383_p0 = pnand %p5382_p13, %p5376_p8 }
 0xdcc   : > { %5386 = shalt.err (!%p5383_p0)
}
 0xdcd   : > { %5142 = dma.vmem_to_hbm [thread:$0]  (%p5613_p5), %s6461_s2, 64, %s6459_s10, %s4108_s20  }
 0xdce PF: > { %p5148_p1 = scmp.ge.s32.totalorder %s5421_s19, 2  ;;  %s4133_s7 = sand.u32 1, %s5409_s9  }
 0xdcf   : > { %s4134_s8 = scalar_lea.sflag [#allocation7], %s4133_s7 }
 0xdd0   : > { %p5145_p2 = pnand %p5148_p1, %p5617_p6 }
 0xdd2   : > { %5404 = dma.done.wait (!%p5145_p2), %s4134_s8, 64  }
 0xdd3   : > { %5406 = vsyncadd (!%p5145_p2), %s4134_s8, 4294967232  ;;  %s6569_s19 = sld [smem:[#allocation10_spill]]  ;;  %s6570_s3 = sld [smem:[#allocation9_spill]] }
 0xdd4   : > { %s6571_s30 = sld [smem:[#allocation11_spill]]  ;;  %s6572_s9 = smov %s5413_s11 }
 0xdd9   : > { %p44_p3 = scmp.ge.s32.totalorder %s6569_s19, 4   ;;  %s6573_s11 = smov %s6570_s3 }
 0xddb   :  { %46 = sbr.rel (!%p44_p3) target bundleno = 15 (0xf), region = 159 }
 0xde2   :  { %4139 = vsyncpa [#allocation7], 1 }
 0xde3   :  { %4141 = vsyncpa [#allocation7 + $0x1], 1 }

</bundles_post_ra>
